<compile_context>
chip_gen: v6e
topology: v6e:2x2x1
jax: 0.10.0
libtpu: 0.0.40
codegen_flags: <defaults>
</compile_context>

<pallas_src>
import functools
import math

import jax
import jax.numpy as jnp
from jax.experimental import pallas as pl
from jax.experimental.pallas import tpu as pltpu


# --------------------------------------------------------------------------
# Kernel
# --------------------------------------------------------------------------
def _encoder_kernel(x_ref, wqkv_ref, bqkv_ref, wo_ref, fc2_ref, fc1_ref,
                    lnm_ref, vec_ref, o_ref, *, scale, key_chunk, mm_dtype):
    """One lane-merged (L, Bn*E) slab of the att_EncoderLayer forward."""
    L, BE = x_ref.shape

    # Packed, per-batch-tiled 1-D parameters (each row broadcasts over L rows).
    bo, fc2b, fc1b = vec_ref[0:1, :], vec_ref[1:2, :], vec_ref[2:3, :]
    g1, b1 = vec_ref[3:4, :], vec_ref[4:5, :]
    g2, b2 = vec_ref[5:6, :], vec_ref[6:7, :]

    x = x_ref[...].astype(jnp.float32)                      # (L, Bn*E)

    def mm(a, w_ref):                                       # lane-merged linear
        return jnp.dot(a.astype(mm_dtype), w_ref[...],
                       preferred_element_type=jnp.float32)

    # ---- MultiheadAttention: fused QKV projection.  Block-diagonal weights
    #      keep the result lane-merged -> no relayout copies. ----
    qkv = mm(x, wqkv_ref) + bqkv_ref[...]
    q = qkv[:, 0 * BE:1 * BE] * scale
    k = qkv[:, 1 * BE:2 * BE]
    v = qkv[:, 2 * BE:3 * BE]

    # ---- head_dim == 1 attention.  s[j, i, be] = k[j, be] * q[i, be]; all
    #      softmax reductions are over the *leading* key axis (plain VPU adds,
    #      fully lane-dense).  Key axis streamed with an online max/sum so the
    #      O(L^2) temporaries stay bounded (matters on v7x's 64 MiB VMEM). ----
    m = jnp.full((L, BE), -jnp.inf, jnp.float32)
    den = jnp.zeros((L, BE), jnp.float32)
    acc = jnp.zeros((L, BE), jnp.float32)
    # Static unroll over key chunks; the chooser keeps the chunk count small.
    # For very long sequences this could become a lax.fori_loop body instead.
    for j0 in range(0, L, key_chunk):
        kc = k[j0:j0 + key_chunk]                           # (KC, BE)
        vc = v[j0:j0 + key_chunk]
        s = kc[:, None, :] * q[None, :, :]                  # (KC, L, BE)
        m_new = jnp.maximum(m, jnp.max(s, axis=0))
        alpha = jnp.exp(m - m_new)
        p = jnp.exp(s - m_new[None, :, :])
        den = den * alpha + jnp.sum(p, axis=0)
        acc = acc * alpha + jnp.sum(p * vc[:, None, :], axis=0)
        m = m_new
    attn = acc * pl.reciprocal(den, approx=True)            # EUP, not VALU divide

    # ---- out-projection + residual + LayerNorm1 ----
    a1 = mm(attn, wo_ref) + bo

    lnm = lnm_ref[...]                                      # block-diag ones(E,E)/E

    def _ln(t, g, b):
        # Per-group (E-wide) mean / variance via one lane-merged matmul each;
        # result is already broadcast back across the group's lanes.
        mu = jnp.dot(t, lnm, preferred_element_type=jnp.float32)
        d = t - mu
        var = jnp.dot(d * d, lnm, preferred_element_type=jnp.float32)
        return d * jax.lax.rsqrt(var + 1e-5) * g + b

    fea = _ln(x + a1, g1, b1)

    # ---- a = fc1(ELU(fc2(fea_att))) ----
    h = mm(fea, fc2_ref) + fc2b
    h = jnp.where(h > 0, h, jnp.exp(jnp.minimum(h, 0.0)) - 1.0)   # ELU, alpha=1
    a2 = mm(h, fc1_ref) + fc1b

    # ---- fea_att = LayerNorm2(fea_att + a); dropout is identity in eval ----
    o_ref[...] = _ln(fea + a2, g2, b2).astype(o_ref.dtype)


# --------------------------------------------------------------------------
# Chip-aware block / chunk chooser
# --------------------------------------------------------------------------
def _tpu_vmem_info():
    cap = 64 * 1024 * 1024                 # conservative fallback (v7x-sized)
    try:
        info = pltpu.get_tpu_info()
        cap = int(getattr(info, "vmem_capacity_bytes", cap))
    except Exception:
        pass
    multi_tc = cap < 100 * 1024 * 1024     # v7x-like: 64 MiB/TC, 2 TCs per chip
    return cap, multi_tc


def _vmem_bytes(L, E, Bn, KC):
    """Conservative scoped-VMEM estimate for one grid step (f32 everywhere)."""
    BE = Bn * E
    io = 2 * 2 * L * BE * 4                               # double-buffered x + out tiles
    params = 2 * (7 * BE * BE + 12 * BE) * 4              # block-diag weights + slabs (x2 buffers)
    interm = (15 * L * BE + 3 * KC * L * BE) * 4          # qkv/q/k/v/m/den/acc/fea/h... + s/p chunks
    return io + params + interm


def _divisors_desc(n):
    return [d for d in range(n, 0, -1) if n % d == 0]


def _choose_blocks(N_pad, L, E, budget, multi_tc):
    """Pick (Bn sequences per grid step, key-chunk length)."""
    quota = 128 // math.gcd(E, 128)        # smallest Bn with Bn*E % 128 == 0
    bns = [b for b in range(quota, N_pad + 1, quota) if N_pad % b == 0]
    if not bns:
        bns = [N_pad]

    def fit_kc(b):
        for kc in _divisors_desc(L):
            if _vmem_bytes(L, E, b, kc) <= budget:
                return kc
        return None

    feas = [(b, fit_kc(b)) for b in bns]
    feas = [(b, kc) for b, kc in feas if kc is not None]
    if not feas:
        return bns[0], 1
    if multi_tc:
        # Two TensorCores: prefer an even number of (>= 2) grid steps so the
        # "parallel" grid axis keeps both cores busy on the last step.
        even = [t for t in feas if N_pad // t[0] >= 2 and (N_pad // t[0]) % 2 == 0]
        pool = even or [t for t in feas if N_pad // t[0] >= 2] or feas
        return max(pool, key=lambda t: t[0])
    # Single TensorCore (v5e/v6e): the grid is a serial loop, so take the
    # largest block that fits (per-step overhead only costs ~0.35 us each).
    return max(feas, key=lambda t: t[0])


# --------------------------------------------------------------------------
# Wrapper
# --------------------------------------------------------------------------
def att_encoder_layer_forward(src_att, params, num_heads, mm_dtype=jnp.float32):
    """src_att: (L, N, E) -> (L, N, E).  Eval-mode forward of att_EncoderLayer."""
    L, N, E = src_att.shape
    assert E % num_heads == 0
    head_dim = E // num_heads
    assert head_dim == 1, "module is only well-formed when input_att_dim == dim_attn"

    vmem_cap, multi_tc = _tpu_vmem_info()
    vmem_limit = int(min(0.65 * vmem_cap, 48 * 1024 * 1024))
    budget = int(0.75 * vmem_limit)

    quota = 128 // math.gcd(E, 128)
    N_pad = ((N + quota - 1) // quota) * quota             # pad batch -> lane-dense blocks
    Bn, KC = _choose_blocks(N_pad, L, E, budget, multi_tc)
    BE = Bn * E

    x = src_att
    if N_pad != N:
        x = jnp.concatenate([x, jnp.zeros((L, N_pad - N, E), x.dtype)], axis=1)
    x_m = x.reshape(L, N_pad * E)                          # lane-merged HBM layout (free)

    f32 = jnp.float32

    def bd(w):                                             # (E, Eo) -> block-diag (Bn*E, Bn*Eo)
        w = w.astype(f32)
        out = jnp.einsum("bc,io->bico", jnp.eye(Bn, dtype=f32), w)
        return out.reshape(Bn * E, Bn * w.shape[1])

    def tile(vec):                                         # (E,) -> (Bn*E,) per-batch tiled
        return jnp.tile(vec.astype(f32), (Bn,))

    wqkv_bd = jnp.concatenate(
        [bd(params["wq"].T), bd(params["wk"].T), bd(params["wv"].T)], axis=1
    ).astype(mm_dtype)
    bqkv = jnp.concatenate(
        [tile(params["bq"]), tile(params["bk"]), tile(params["bv"])]).reshape(1, 3 * BE)
    wo_bd = bd(params["wo"].T).astype(mm_dtype)
    fc2_bd = bd(params["fc2_w"].T).astype(mm_dtype)
    fc1_bd = bd(params["fc1_w"].T).astype(mm_dtype)
    lnm_bd = bd(jnp.full((E, E), 1.0 / E, f32))            # kept f32 (LN accuracy)
    vec = jnp.stack([tile(params["bo"]), tile(params["fc2_b"]), tile(params["fc1_b"]),
                     tile(params["ln1_g"]), tile(params["ln1_b"]),
                     tile(params["ln2_g"]), tile(params["ln2_b"]),
                     jnp.zeros((BE,), f32)], axis=0)       # (8, Bn*E)

    args = (x_m, wqkv_bd, bqkv, wo_bd, fc2_bd, fc1_bd, lnm_bd, vec)
    kernel = functools.partial(_encoder_kernel, scale=1.0 / math.sqrt(head_dim),
                               key_chunk=KC, mm_dtype=mm_dtype)

    def run(single_buffer_params):
        pm = {"pipeline_mode": pl.Buffered(1)} if single_buffer_params else {}
        p_specs = [pl.BlockSpec(a.shape, lambda g: (0, 0), **pm) for a in args[1:]]
        call = pl.pallas_call(
            kernel,
            out_shape=jax.ShapeDtypeStruct((L, N_pad * E), src_att.dtype),
            grid=(N_pad // Bn,),
            in_specs=[pl.BlockSpec((L, BE), lambda g: (0, g))] + p_specs,
            out_specs=pl.BlockSpec((L, BE), lambda g: (0, g)),
            compiler_params=pltpu.CompilerParams(
                dimension_semantics=("parallel",),
                vmem_limit_bytes=vmem_limit),
        )
        return jax.block_until_ready(call(*args))

    try:
        out_m = run(True)        # grid-invariant params: single pipeline buffer
    except Exception:
        out_m = run(False)       # fallback if pl.Buffered(1) is rejected

    return out_m.reshape(L, N_pad, E)[:, :N, :]


# --------------------------------------------------------------------------
# Synthetic parameters + pure-JAX reference (PyTorch eval-mode semantics)
# --------------------------------------------------------------------------
def init_params(key, E):
    ks = jax.random.split(key, 12)

    def w(k, shape):
        return (jax.random.normal(k, shape) * 0.2).astype(jnp.float32)

    return dict(
        wq=w(ks[0], (E, E)), bq=w(ks[1], (E,)),
        wk=w(ks[2], (E, E)), bk=w(ks[3], (E,)),
        wv=w(ks[4], (E, E)), bv=w(ks[5], (E,)),
        wo=w(ks[6], (E, E)), bo=w(ks[7], (E,)),
        ln1_g=jnp.ones((E,), jnp.float32), ln1_b=jnp.zeros((E,), jnp.float32),
        ln2_g=jnp.ones((E,), jnp.float32), ln2_b=jnp.zeros((E,), jnp.float32),
        fc1_w=w(ks[8], (E, E)), fc1_b=w(ks[9], (E,)),
        fc2_w=w(ks[10], (E, E)), fc2_b=w(ks[11], (E,)),
    )


def ref_forward(src_att, params, num_heads):
    L, N, E = src_att.shape
    hd = E // num_heads
    x = jnp.transpose(src_att, (1, 0, 2)).astype(jnp.float32)   # (N, L, E)

    q = (x @ params["wq"].T + params["bq"]) / math.sqrt(hd)
    k = x @ params["wk"].T + params["bk"]
    v = x @ params["wv"].T + params["bv"]

    def split(t):
        return t.reshape(N, L, num_heads, hd).transpose(0, 2, 1, 3)

    qh, kh, vh = split(q), split(k), split(v)
    s = jnp.einsum('nhid,nhjd->nhij', qh, kh)
    p = jax.nn.softmax(s, axis=-1)
    o = jnp.einsum('nhij,nhjd->nhid', p, vh)
    o = o.transpose(0, 2, 1, 3).reshape(N, L, E)
    a = o @ params["wo"].T + params["bo"]

    def ln(t, g, b):
        mu = t.mean(-1, keepdims=True)
        var = ((t - mu) ** 2).mean(-1, keepdims=True)
        return (t - mu) * jax.lax.rsqrt(var + 1e-5) * g + b

    fea = ln(x + a, params["ln1_g"], params["ln1_b"])
    h = fea @ params["fc2_w"].T + params["fc2_b"]
    h = jnp.where(h > 0, h, jnp.exp(jnp.minimum(h, 0.0)) - 1.0)
    a2 = h @ params["fc1_w"].T + params["fc1_b"]
    fea2 = ln(fea + a2, params["ln2_g"], params["ln2_b"])
    return jnp.transpose(fea2, (1, 0, 2))


if __name__ == "__main__":
    # input_att_dim must equal dim_attn for the PyTorch forward to be well-formed.
    input_att_dim = 8
    dim_attn = 8          # == number of heads passed to nn.MultiheadAttention
    seq_len, batch = 8, 32  # batch*E = 256 lanes -> exercises the lane-dense path

    key = jax.random.PRNGKey(0)
    k_x, k_p = jax.random.split(key)
    src_att = jax.random.normal(k_x, (seq_len, batch, input_att_dim), dtype=jnp.float32)
    params = init_params(k_p, input_att_dim)

    out = att_encoder_layer_forward(src_att, params, num_heads=dim_attn)
    out = jax.block_until_ready(out)

    ref = ref_forward(src_att, params, dim_attn)
    assert out.shape == src_att.shape
    assert bool(jnp.all(jnp.isfinite(out)))
    err = float(jnp.max(jnp.abs(out - ref)))
    assert bool(jnp.allclose(out, ref, atol=5e-3, rtol=5e-3)), err

    print("KERNEL_OK")
</pallas_src>

<mosaic_0001>
module attributes {stable_mosaic.version = 11 : i64} {
  func.func @_encoder_kernel(%arg0: i32, %arg1: memref<8x128xf32, #tpu.memory_space<vmem>>, %arg2: memref<128x384xf32, #tpu.memory_space<vmem>>, %arg3: memref<1x384xf32, #tpu.memory_space<vmem>>, %arg4: memref<128x128xf32, #tpu.memory_space<vmem>>, %arg5: memref<128x128xf32, #tpu.memory_space<vmem>>, %arg6: memref<128x128xf32, #tpu.memory_space<vmem>>, %arg7: memref<128x128xf32, #tpu.memory_space<vmem>>, %arg8: memref<8x128xf32, #tpu.memory_space<vmem>>, %arg9: memref<8x128xf32, #tpu.memory_space<vmem>>) attributes {dimension_semantics = [#tpu.dimension_semantics<parallel>], iteration_bounds = array<i64: 2>, scalar_prefetch = 0 : i64, scratch_operands = 0 : i64, tpu.core_type = #tpu.core_type<tc>, window_params = [{transform_indices = @transform_0, window_bounds = array<i64: 8, 128>}, {pipeline_mode = #tpu.pipeline_mode<synchronous>, transform_indices = @transform_1, window_bounds = array<i64: 128, 384>}, {pipeline_mode = #tpu.pipeline_mode<synchronous>, transform_indices = @transform_2, window_bounds = array<i64: 1, 384>}, {pipeline_mode = #tpu.pipeline_mode<synchronous>, transform_indices = @transform_3, window_bounds = array<i64: 128, 128>}, {pipeline_mode = #tpu.pipeline_mode<synchronous>, transform_indices = @transform_4, window_bounds = array<i64: 128, 128>}, {pipeline_mode = #tpu.pipeline_mode<synchronous>, transform_indices = @transform_5, window_bounds = array<i64: 128, 128>}, {pipeline_mode = #tpu.pipeline_mode<synchronous>, transform_indices = @transform_6, window_bounds = array<i64: 128, 128>}, {pipeline_mode = #tpu.pipeline_mode<synchronous>, transform_indices = @transform_7, window_bounds = array<i64: 8, 128>}, {transform_indices = @transform_8, window_bounds = array<i64: 8, 128>}]} {
    %c0 = arith.constant 0 : index
    %c0_0 = arith.constant 0 : index
    %0 = vector.load %arg8[%c0, %c0_0] : memref<8x128xf32, #tpu.memory_space<vmem>>, vector<1x128xf32>
    %c1 = arith.constant 1 : index
    %c0_1 = arith.constant 0 : index
    %1 = vector.load %arg8[%c1, %c0_1] : memref<8x128xf32, #tpu.memory_space<vmem>>, vector<1x128xf32>
    %c2 = arith.constant 2 : index
    %c0_2 = arith.constant 0 : index
    %2 = vector.load %arg8[%c2, %c0_2] : memref<8x128xf32, #tpu.memory_space<vmem>>, vector<1x128xf32>
    %c3 = arith.constant 3 : index
    %c0_3 = arith.constant 0 : index
    %3 = vector.load %arg8[%c3, %c0_3] : memref<8x128xf32, #tpu.memory_space<vmem>>, vector<1x128xf32>
    %c4 = arith.constant 4 : index
    %c0_4 = arith.constant 0 : index
    %4 = vector.load %arg8[%c4, %c0_4] : memref<8x128xf32, #tpu.memory_space<vmem>>, vector<1x128xf32>
    %c5 = arith.constant 5 : index
    %c0_5 = arith.constant 0 : index
    %5 = vector.load %arg8[%c5, %c0_5] : memref<8x128xf32, #tpu.memory_space<vmem>>, vector<1x128xf32>
    %c6 = arith.constant 6 : index
    %c0_6 = arith.constant 0 : index
    %6 = vector.load %arg8[%c6, %c0_6] : memref<8x128xf32, #tpu.memory_space<vmem>>, vector<1x128xf32>
    %c0_7 = arith.constant 0 : index
    %c0_8 = arith.constant 0 : index
    %7 = vector.load %arg1[%c0_7, %c0_8] : memref<8x128xf32, #tpu.memory_space<vmem>>, vector<8x128xf32>
    %c0_9 = arith.constant 0 : index
    %c0_10 = arith.constant 0 : index
    %8 = vector.load %arg2[%c0_9, %c0_10] : memref<128x384xf32, #tpu.memory_space<vmem>>, vector<128x384xf32>
    %cst = arith.constant dense<0.000000e+00> : vector<8x384xf32>
    %9 = tpu.matmul %7, %8, %cst {dimension_numbers = #tpu.dot_dimension_numbers<[1], [0], [0], [1], [0, 0, 1, 1], [], []>} : vector<8x128xf32>, vector<128x384xf32>, vector<8x384xf32> -> vector<8x384xf32>
    %c0_11 = arith.constant 0 : index
    %c0_12 = arith.constant 0 : index
    %10 = vector.load %arg3[%c0_11, %c0_12] : memref<1x384xf32, #tpu.memory_space<vmem>>, vector<1x384xf32>
    %11 = vector.broadcast %10 : vector<1x384xf32> to vector<8x384xf32>
    %12 = arith.addf %9, %11 : vector<8x384xf32>
    %13 = vector.extract_strided_slice %12 {offsets = [0, 0], sizes = [8, 128], strides = [1, 1]} : vector<8x384xf32> to vector<8x128xf32>
    %cst_13 = arith.constant 1.000000e+00 : f32
    %14 = vector.broadcast %cst_13 : f32 to vector<8x128xf32>
    %15 = arith.mulf %13, %14 : vector<8x128xf32>
    %16 = vector.extract_strided_slice %12 {offsets = [0, 128], sizes = [8, 128], strides = [1, 1]} : vector<8x384xf32> to vector<8x128xf32>
    %17 = vector.extract_strided_slice %12 {offsets = [0, 256], sizes = [8, 128], strides = [1, 1]} : vector<8x384xf32> to vector<8x128xf32>
    %cst_14 = arith.constant 0xFF800000 : f32
    %18 = vector.broadcast %cst_14 : f32 to vector<8x128xf32>
    %cst_15 = arith.constant 0.000000e+00 : f32
    %19 = vector.broadcast %cst_15 : f32 to vector<8x128xf32>
    %cst_16 = arith.constant 0.000000e+00 : f32
    %20 = vector.broadcast %cst_16 : f32 to vector<8x128xf32>
    %21 = vector.shape_cast %16 : vector<8x128xf32> to vector<8x1x128xf32>
    %22 = vector.shape_cast %15 : vector<8x128xf32> to vector<1x8x128xf32>
    %23 = vector.broadcast %21 : vector<8x1x128xf32> to vector<8x8x128xf32>
    %24 = vector.broadcast %22 : vector<1x8x128xf32> to vector<8x8x128xf32>
    %25 = arith.mulf %23, %24 : vector<8x8x128xf32>
    %cst_17 = arith.constant dense<0xFF800000> : vector<8x128xf32>
    %26 = vector.multi_reduction <maximumf>, %25, %cst_17 [0] : vector<8x8x128xf32> to vector<8x128xf32>
    %27 = arith.maximumf %18, %26 : vector<8x128xf32>
    %28 = arith.subf %18, %27 : vector<8x128xf32>
    %29 = math.exp %28 : vector<8x128xf32>
    %30 = vector.shape_cast %27 : vector<8x128xf32> to vector<1x8x128xf32>
    %31 = vector.broadcast %30 : vector<1x8x128xf32> to vector<8x8x128xf32>
    %32 = arith.subf %25, %31 : vector<8x8x128xf32>
    %33 = math.exp %32 : vector<8x8x128xf32>
    %34 = arith.mulf %19, %29 : vector<8x128xf32>
    %cst_18 = arith.constant dense<0.000000e+00> : vector<8x128xf32>
    %35 = vector.multi_reduction <add>, %33, %cst_18 [0] : vector<8x8x128xf32> to vector<8x128xf32>
    %36 = arith.addf %34, %35 : vector<8x128xf32>
    %37 = arith.mulf %20, %29 : vector<8x128xf32>
    %38 = vector.shape_cast %17 : vector<8x128xf32> to vector<8x1x128xf32>
    %39 = vector.broadcast %38 : vector<8x1x128xf32> to vector<8x8x128xf32>
    %40 = arith.mulf %33, %39 : vector<8x8x128xf32>
    %cst_19 = arith.constant dense<0.000000e+00> : vector<8x128xf32>
    %41 = vector.multi_reduction <add>, %40, %cst_19 [0] : vector<8x8x128xf32> to vector<8x128xf32>
    %42 = arith.addf %37, %41 : vector<8x128xf32>
    %43 = tpu.reciprocal %36 {approx = true} : vector<8x128xf32> -> vector<8x128xf32>
    %44 = arith.mulf %42, %43 : vector<8x128xf32>
    %c0_20 = arith.constant 0 : index
    %c0_21 = arith.constant 0 : index
    %45 = vector.load %arg4[%c0_20, %c0_21] : memref<128x128xf32, #tpu.memory_space<vmem>>, vector<128x128xf32>
    %cst_22 = arith.constant dense<0.000000e+00> : vector<8x128xf32>
    %46 = tpu.matmul %44, %45, %cst_22 {dimension_numbers = #tpu.dot_dimension_numbers<[1], [0], [0], [1], [0, 0, 1, 1], [], []>} : vector<8x128xf32>, vector<128x128xf32>, vector<8x128xf32> -> vector<8x128xf32>
    %47 = vector.broadcast %0 : vector<1x128xf32> to vector<8x128xf32>
    %48 = arith.addf %46, %47 : vector<8x128xf32>
    %c0_23 = arith.constant 0 : index
    %c0_24 = arith.constant 0 : index
    %49 = vector.load %arg7[%c0_23, %c0_24] : memref<128x128xf32, #tpu.memory_space<vmem>>, vector<128x128xf32>
    %50 = arith.addf %7, %48 : vector<8x128xf32>
    %cst_25 = arith.constant dense<0.000000e+00> : vector<8x128xf32>
    %51 = tpu.matmul %50, %49, %cst_25 {dimension_numbers = #tpu.dot_dimension_numbers<[1], [0], [0], [1], [0, 0, 1, 1], [], []>} : vector<8x128xf32>, vector<128x128xf32>, vector<8x128xf32> -> vector<8x128xf32>
    %52 = arith.subf %50, %51 : vector<8x128xf32>
    %53 = arith.mulf %52, %52 : vector<8x128xf32>
    %cst_26 = arith.constant dense<0.000000e+00> : vector<8x128xf32>
    %54 = tpu.matmul %53, %49, %cst_26 {dimension_numbers = #tpu.dot_dimension_numbers<[1], [0], [0], [1], [0, 0, 1, 1], [], []>} : vector<8x128xf32>, vector<128x128xf32>, vector<8x128xf32> -> vector<8x128xf32>
    %cst_27 = arith.constant 9.99999974E-6 : f32
    %55 = vector.broadcast %cst_27 : f32 to vector<8x128xf32>
    %56 = arith.addf %54, %55 : vector<8x128xf32>
    %57 = math.rsqrt %56 : vector<8x128xf32>
    %58 = arith.mulf %52, %57 : vector<8x128xf32>
    %59 = vector.broadcast %3 : vector<1x128xf32> to vector<8x128xf32>
    %60 = arith.mulf %58, %59 : vector<8x128xf32>
    %61 = vector.broadcast %4 : vector<1x128xf32> to vector<8x128xf32>
    %62 = arith.addf %60, %61 : vector<8x128xf32>
    %c0_28 = arith.constant 0 : index
    %c0_29 = arith.constant 0 : index
    %63 = vector.load %arg5[%c0_28, %c0_29] : memref<128x128xf32, #tpu.memory_space<vmem>>, vector<128x128xf32>
    %cst_30 = arith.constant dense<0.000000e+00> : vector<8x128xf32>
    %64 = tpu.matmul %62, %63, %cst_30 {dimension_numbers = #tpu.dot_dimension_numbers<[1], [0], [0], [1], [0, 0, 1, 1], [], []>} : vector<8x128xf32>, vector<128x128xf32>, vector<8x128xf32> -> vector<8x128xf32>
    %65 = vector.broadcast %1 : vector<1x128xf32> to vector<8x128xf32>
    %66 = arith.addf %64, %65 : vector<8x128xf32>
    %cst_31 = arith.constant 0.000000e+00 : f32
    %67 = vector.broadcast %cst_31 : f32 to vector<8x128xf32>
    %68 = arith.cmpf ogt, %66, %67 : vector<8x128xf32>
    %cst_32 = arith.constant 0.000000e+00 : f32
    %69 = vector.broadcast %cst_32 : f32 to vector<8x128xf32>
    %70 = arith.minimumf %66, %69 : vector<8x128xf32>
    %71 = math.exp %70 : vector<8x128xf32>
    %cst_33 = arith.constant 1.000000e+00 : f32
    %72 = vector.broadcast %cst_33 : f32 to vector<8x128xf32>
    %73 = arith.subf %71, %72 : vector<8x128xf32>
    %74 = arith.select %68, %66, %73 : vector<8x128xi1>, vector<8x128xf32>
    %c0_34 = arith.constant 0 : index
    %c0_35 = arith.constant 0 : index
    %75 = vector.load %arg6[%c0_34, %c0_35] : memref<128x128xf32, #tpu.memory_space<vmem>>, vector<128x128xf32>
    %cst_36 = arith.constant dense<0.000000e+00> : vector<8x128xf32>
    %76 = tpu.matmul %74, %75, %cst_36 {dimension_numbers = #tpu.dot_dimension_numbers<[1], [0], [0], [1], [0, 0, 1, 1], [], []>} : vector<8x128xf32>, vector<128x128xf32>, vector<8x128xf32> -> vector<8x128xf32>
    %77 = vector.broadcast %2 : vector<1x128xf32> to vector<8x128xf32>
    %78 = arith.addf %76, %77 : vector<8x128xf32>
    %79 = arith.addf %62, %78 : vector<8x128xf32>
    %cst_37 = arith.constant dense<0.000000e+00> : vector<8x128xf32>
    %80 = tpu.matmul %79, %49, %cst_37 {dimension_numbers = #tpu.dot_dimension_numbers<[1], [0], [0], [1], [0, 0, 1, 1], [], []>} : vector<8x128xf32>, vector<128x128xf32>, vector<8x128xf32> -> vector<8x128xf32>
    %81 = arith.subf %79, %80 : vector<8x128xf32>
    %82 = arith.mulf %81, %81 : vector<8x128xf32>
    %cst_38 = arith.constant dense<0.000000e+00> : vector<8x128xf32>
    %83 = tpu.matmul %82, %49, %cst_38 {dimension_numbers = #tpu.dot_dimension_numbers<[1], [0], [0], [1], [0, 0, 1, 1], [], []>} : vector<8x128xf32>, vector<128x128xf32>, vector<8x128xf32> -> vector<8x128xf32>
    %cst_39 = arith.constant 9.99999974E-6 : f32
    %84 = vector.broadcast %cst_39 : f32 to vector<8x128xf32>
    %85 = arith.addf %83, %84 : vector<8x128xf32>
    %86 = math.rsqrt %85 : vector<8x128xf32>
    %87 = arith.mulf %81, %86 : vector<8x128xf32>
    %88 = vector.broadcast %5 : vector<1x128xf32> to vector<8x128xf32>
    %89 = arith.mulf %87, %88 : vector<8x128xf32>
    %90 = vector.broadcast %6 : vector<1x128xf32> to vector<8x128xf32>
    %91 = arith.addf %89, %90 : vector<8x128xf32>
    %c0_40 = arith.constant 0 : index
    %c0_41 = arith.constant 0 : index
    %92 = vector.load %arg9[%c0_40, %c0_41] : memref<8x128xf32, #tpu.memory_space<vmem>>, vector<8x128xf32>
    tpu.vector_store %arg9[%c0_40, %c0_41], %91 {strides = array<i32>} : memref<8x128xf32, #tpu.memory_space<vmem>>, vector<8x128xf32>,
    return
  }
  func.func @transform_0(%arg0: i32) -> (i32, i32) {
    %c0_i32 = arith.constant 0 : i32
    %c0_i32_0 = arith.constant 0 : i32
    return %c0_i32, %arg0 : i32, i32
  }
  func.func @transform_1(%arg0: i32) -> (i32, i32) {
    %c0_i32 = arith.constant 0 : i32
    %c0_i32_0 = arith.constant 0 : i32
    %c0_i32_1 = arith.constant 0 : i32
    return %c0_i32, %c0_i32_0 : i32, i32
  }
  func.func @transform_2(%arg0: i32) -> (i32, i32) {
    %c0_i32 = arith.constant 0 : i32
    %c0_i32_0 = arith.constant 0 : i32
    %c0_i32_1 = arith.constant 0 : i32
    return %c0_i32, %c0_i32_0 : i32, i32
  }
  func.func @transform_3(%arg0: i32) -> (i32, i32) {
    %c0_i32 = arith.constant 0 : i32
    %c0_i32_0 = arith.constant 0 : i32
    %c0_i32_1 = arith.constant 0 : i32
    return %c0_i32, %c0_i32_0 : i32, i32
  }
  func.func @transform_4(%arg0: i32) -> (i32, i32) {
    %c0_i32 = arith.constant 0 : i32
    %c0_i32_0 = arith.constant 0 : i32
    %c0_i32_1 = arith.constant 0 : i32
    return %c0_i32, %c0_i32_0 : i32, i32
  }
  func.func @transform_5(%arg0: i32) -> (i32, i32) {
    %c0_i32 = arith.constant 0 : i32
    %c0_i32_0 = arith.constant 0 : i32
    %c0_i32_1 = arith.constant 0 : i32
    return %c0_i32, %c0_i32_0 : i32, i32
  }
  func.func @transform_6(%arg0: i32) -> (i32, i32) {
    %c0_i32 = arith.constant 0 : i32
    %c0_i32_0 = arith.constant 0 : i32
    %c0_i32_1 = arith.constant 0 : i32
    return %c0_i32, %c0_i32_0 : i32, i32
  }
  func.func @transform_7(%arg0: i32) -> (i32, i32) {
    %c0_i32 = arith.constant 0 : i32
    %c0_i32_0 = arith.constant 0 : i32
    %c0_i32_1 = arith.constant 0 : i32
    return %c0_i32, %c0_i32_0 : i32, i32
  }
  func.func @transform_8(%arg0: i32) -> (i32, i32) {
    %c0_i32 = arith.constant 0 : i32
    %c0_i32_0 = arith.constant 0 : i32
    return %c0_i32, %arg0 : i32, i32
  }
}

module attributes {stable_mosaic.version = 11 : i64} {
  func.func @_encoder_kernel(%arg0: i32, %arg1: memref<8x128xf32, #tpu.memory_space<vmem>>, %arg2: memref<128x384xf32, #tpu.memory_space<vmem>>, %arg3: memref<1x384xf32, #tpu.memory_space<vmem>>, %arg4: memref<128x128xf32, #tpu.memory_space<vmem>>, %arg5: memref<128x128xf32, #tpu.memory_space<vmem>>, %arg6: memref<128x128xf32, #tpu.memory_space<vmem>>, %arg7: memref<128x128xf32, #tpu.memory_space<vmem>>, %arg8: memref<8x128xf32, #tpu.memory_space<vmem>>, %arg9: memref<8x128xf32, #tpu.memory_space<vmem>>) attributes {dimension_semantics = [#tpu.dimension_semantics<parallel>], iteration_bounds = array<i64: 2>, scalar_prefetch = 0 : i64, scratch_operands = 0 : i64, tpu.core_type = #tpu.core_type<tc>, window_params = [{transform_indices = @transform_0, window_bounds = array<i64: 8, 128>}, {pipeline_mode = #tpu.pipeline_mode<synchronous>, transform_indices = @transform_1, window_bounds = array<i64: 128, 384>}, {pipeline_mode = #tpu.pipeline_mode<synchronous>, transform_indices = @transform_2, window_bounds = array<i64: 1, 384>}, {pipeline_mode = #tpu.pipeline_mode<synchronous>, transform_indices = @transform_3, window_bounds = array<i64: 128, 128>}, {pipeline_mode = #tpu.pipeline_mode<synchronous>, transform_indices = @transform_4, window_bounds = array<i64: 128, 128>}, {pipeline_mode = #tpu.pipeline_mode<synchronous>, transform_indices = @transform_5, window_bounds = array<i64: 128, 128>}, {pipeline_mode = #tpu.pipeline_mode<synchronous>, transform_indices = @transform_6, window_bounds = array<i64: 128, 128>}, {pipeline_mode = #tpu.pipeline_mode<synchronous>, transform_indices = @transform_7, window_bounds = array<i64: 8, 128>}, {transform_indices = @transform_8, window_bounds = array<i64: 8, 128>}]} {
    %c0 = arith.constant 0 : index
    %c0_0 = arith.constant 0 : index
    %0 = vector.load %arg8[%c0, %c0_0] : memref<8x128xf32, #tpu.memory_space<vmem>>, vector<1x128xf32>
    %c1 = arith.constant 1 : index
    %c0_1 = arith.constant 0 : index
    %1 = vector.load %arg8[%c1, %c0_1] : memref<8x128xf32, #tpu.memory_space<vmem>>, vector<1x128xf32>
    %c2 = arith.constant 2 : index
    %c0_2 = arith.constant 0 : index
    %2 = vector.load %arg8[%c2, %c0_2] : memref<8x128xf32, #tpu.memory_space<vmem>>, vector<1x128xf32>
    %c3 = arith.constant 3 : index
    %c0_3 = arith.constant 0 : index
    %3 = vector.load %arg8[%c3, %c0_3] : memref<8x128xf32, #tpu.memory_space<vmem>>, vector<1x128xf32>
    %c4 = arith.constant 4 : index
    %c0_4 = arith.constant 0 : index
    %4 = vector.load %arg8[%c4, %c0_4] : memref<8x128xf32, #tpu.memory_space<vmem>>, vector<1x128xf32>
    %c5 = arith.constant 5 : index
    %c0_5 = arith.constant 0 : index
    %5 = vector.load %arg8[%c5, %c0_5] : memref<8x128xf32, #tpu.memory_space<vmem>>, vector<1x128xf32>
    %c6 = arith.constant 6 : index
    %c0_6 = arith.constant 0 : index
    %6 = vector.load %arg8[%c6, %c0_6] : memref<8x128xf32, #tpu.memory_space<vmem>>, vector<1x128xf32>
    %c0_7 = arith.constant 0 : index
    %c0_8 = arith.constant 0 : index
    %7 = vector.load %arg1[%c0_7, %c0_8] : memref<8x128xf32, #tpu.memory_space<vmem>>, vector<8x128xf32>
    %c0_9 = arith.constant 0 : index
    %c0_10 = arith.constant 0 : index
    %8 = vector.load %arg2[%c0_9, %c0_10] : memref<128x384xf32, #tpu.memory_space<vmem>>, vector<128x384xf32>
    %cst = arith.constant dense<0.000000e+00> : vector<8x384xf32>
    %9 = tpu.matmul %7, %8, %cst {dimension_numbers = #tpu.dot_dimension_numbers<[1], [0], [0], [1], [0, 0, 1, 1], [], []>} : vector<8x128xf32>, vector<128x384xf32>, vector<8x384xf32> -> vector<8x384xf32>
    %c0_11 = arith.constant 0 : index
    %c0_12 = arith.constant 0 : index
    %10 = vector.load %arg3[%c0_11, %c0_12] : memref<1x384xf32, #tpu.memory_space<vmem>>, vector<1x384xf32>
    %11 = vector.broadcast %10 : vector<1x384xf32> to vector<8x384xf32>
    %12 = arith.addf %9, %11 : vector<8x384xf32>
    %13 = vector.extract_strided_slice %12 {offsets = [0, 0], sizes = [8, 128], strides = [1, 1]} : vector<8x384xf32> to vector<8x128xf32>
    %cst_13 = arith.constant 1.000000e+00 : f32
    %14 = vector.broadcast %cst_13 : f32 to vector<8x128xf32>
    %15 = arith.mulf %13, %14 : vector<8x128xf32>
    %16 = vector.extract_strided_slice %12 {offsets = [0, 128], sizes = [8, 128], strides = [1, 1]} : vector<8x384xf32> to vector<8x128xf32>
    %17 = vector.extract_strided_slice %12 {offsets = [0, 256], sizes = [8, 128], strides = [1, 1]} : vector<8x384xf32> to vector<8x128xf32>
    %cst_14 = arith.constant 0xFF800000 : f32
    %18 = vector.broadcast %cst_14 : f32 to vector<8x128xf32>
    %cst_15 = arith.constant 0.000000e+00 : f32
    %19 = vector.broadcast %cst_15 : f32 to vector<8x128xf32>
    %cst_16 = arith.constant 0.000000e+00 : f32
    %20 = vector.broadcast %cst_16 : f32 to vector<8x128xf32>
    %21 = vector.shape_cast %16 : vector<8x128xf32> to vector<8x1x128xf32>
    %22 = vector.shape_cast %15 : vector<8x128xf32> to vector<1x8x128xf32>
    %23 = vector.broadcast %21 : vector<8x1x128xf32> to vector<8x8x128xf32>
    %24 = vector.broadcast %22 : vector<1x8x128xf32> to vector<8x8x128xf32>
    %25 = arith.mulf %23, %24 : vector<8x8x128xf32>
    %cst_17 = arith.constant dense<0xFF800000> : vector<8x128xf32>
    %26 = vector.multi_reduction <maximumf>, %25, %cst_17 [0] : vector<8x8x128xf32> to vector<8x128xf32>
    %27 = arith.maximumf %18, %26 : vector<8x128xf32>
    %28 = arith.subf %18, %27 : vector<8x128xf32>
    %29 = math.exp %28 : vector<8x128xf32>
    %30 = vector.shape_cast %27 : vector<8x128xf32> to vector<1x8x128xf32>
    %31 = vector.broadcast %30 : vector<1x8x128xf32> to vector<8x8x128xf32>
    %32 = arith.subf %25, %31 : vector<8x8x128xf32>
    %33 = math.exp %32 : vector<8x8x128xf32>
    %34 = arith.mulf %19, %29 : vector<8x128xf32>
    %cst_18 = arith.constant dense<0.000000e+00> : vector<8x128xf32>
    %35 = vector.multi_reduction <add>, %33, %cst_18 [0] : vector<8x8x128xf32> to vector<8x128xf32>
    %36 = arith.addf %34, %35 : vector<8x128xf32>
    %37 = arith.mulf %20, %29 : vector<8x128xf32>
    %38 = vector.shape_cast %17 : vector<8x128xf32> to vector<8x1x128xf32>
    %39 = vector.broadcast %38 : vector<8x1x128xf32> to vector<8x8x128xf32>
    %40 = arith.mulf %33, %39 : vector<8x8x128xf32>
    %cst_19 = arith.constant dense<0.000000e+00> : vector<8x128xf32>
    %41 = vector.multi_reduction <add>, %40, %cst_19 [0] : vector<8x8x128xf32> to vector<8x128xf32>
    %42 = arith.addf %37, %41 : vector<8x128xf32>
    %43 = tpu.reciprocal %36 {approx = true} : vector<8x128xf32> -> vector<8x128xf32>
    %44 = arith.mulf %42, %43 : vector<8x128xf32>
    %c0_20 = arith.constant 0 : index
    %c0_21 = arith.constant 0 : index
    %45 = vector.load %arg4[%c0_20, %c0_21] : memref<128x128xf32, #tpu.memory_space<vmem>>, vector<128x128xf32>
    %cst_22 = arith.constant dense<0.000000e+00> : vector<8x128xf32>
    %46 = tpu.matmul %44, %45, %cst_22 {dimension_numbers = #tpu.dot_dimension_numbers<[1], [0], [0], [1], [0, 0, 1, 1], [], []>} : vector<8x128xf32>, vector<128x128xf32>, vector<8x128xf32> -> vector<8x128xf32>
    %47 = vector.broadcast %0 : vector<1x128xf32> to vector<8x128xf32>
    %48 = arith.addf %46, %47 : vector<8x128xf32>
    %c0_23 = arith.constant 0 : index
    %c0_24 = arith.constant 0 : index
    %49 = vector.load %arg7[%c0_23, %c0_24] : memref<128x128xf32, #tpu.memory_space<vmem>>, vector<128x128xf32>
    %50 = arith.addf %7, %48 : vector<8x128xf32>
    %cst_25 = arith.constant dense<0.000000e+00> : vector<8x128xf32>
    %51 = tpu.matmul %50, %49, %cst_25 {dimension_numbers = #tpu.dot_dimension_numbers<[1], [0], [0], [1], [0, 0, 1, 1], [], []>} : vector<8x128xf32>, vector<128x128xf32>, vector<8x128xf32> -> vector<8x128xf32>
    %52 = arith.subf %50, %51 : vector<8x128xf32>
    %53 = arith.mulf %52, %52 : vector<8x128xf32>
    %cst_26 = arith.constant dense<0.000000e+00> : vector<8x128xf32>
    %54 = tpu.matmul %53, %49, %cst_26 {dimension_numbers = #tpu.dot_dimension_numbers<[1], [0], [0], [1], [0, 0, 1, 1], [], []>} : vector<8x128xf32>, vector<128x128xf32>, vector<8x128xf32> -> vector<8x128xf32>
    %cst_27 = arith.constant 9.99999974E-6 : f32
    %55 = vector.broadcast %cst_27 : f32 to vector<8x128xf32>
    %56 = arith.addf %54, %55 : vector<8x128xf32>
    %57 = math.rsqrt %56 : vector<8x128xf32>
    %58 = arith.mulf %52, %57 : vector<8x128xf32>
    %59 = vector.broadcast %3 : vector<1x128xf32> to vector<8x128xf32>
    %60 = arith.mulf %58, %59 : vector<8x128xf32>
    %61 = vector.broadcast %4 : vector<1x128xf32> to vector<8x128xf32>
    %62 = arith.addf %60, %61 : vector<8x128xf32>
    %c0_28 = arith.constant 0 : index
    %c0_29 = arith.constant 0 : index
    %63 = vector.load %arg5[%c0_28, %c0_29] : memref<128x128xf32, #tpu.memory_space<vmem>>, vector<128x128xf32>
    %cst_30 = arith.constant dense<0.000000e+00> : vector<8x128xf32>
    %64 = tpu.matmul %62, %63, %cst_30 {dimension_numbers = #tpu.dot_dimension_numbers<[1], [0], [0], [1], [0, 0, 1, 1], [], []>} : vector<8x128xf32>, vector<128x128xf32>, vector<8x128xf32> -> vector<8x128xf32>
    %65 = vector.broadcast %1 : vector<1x128xf32> to vector<8x128xf32>
    %66 = arith.addf %64, %65 : vector<8x128xf32>
    %cst_31 = arith.constant 0.000000e+00 : f32
    %67 = vector.broadcast %cst_31 : f32 to vector<8x128xf32>
    %68 = arith.cmpf ogt, %66, %67 : vector<8x128xf32>
    %cst_32 = arith.constant 0.000000e+00 : f32
    %69 = vector.broadcast %cst_32 : f32 to vector<8x128xf32>
    %70 = arith.minimumf %66, %69 : vector<8x128xf32>
    %71 = math.exp %70 : vector<8x128xf32>
    %cst_33 = arith.constant 1.000000e+00 : f32
    %72 = vector.broadcast %cst_33 : f32 to vector<8x128xf32>
    %73 = arith.subf %71, %72 : vector<8x128xf32>
    %74 = arith.select %68, %66, %73 : vector<8x128xi1>, vector<8x128xf32>
    %c0_34 = arith.constant 0 : index
    %c0_35 = arith.constant 0 : index
    %75 = vector.load %arg6[%c0_34, %c0_35] : memref<128x128xf32, #tpu.memory_space<vmem>>, vector<128x128xf32>
    %cst_36 = arith.constant dense<0.000000e+00> : vector<8x128xf32>
    %76 = tpu.matmul %74, %75, %cst_36 {dimension_numbers = #tpu.dot_dimension_numbers<[1], [0], [0], [1], [0, 0, 1, 1], [], []>} : vector<8x128xf32>, vector<128x128xf32>, vector<8x128xf32> -> vector<8x128xf32>
    %77 = vector.broadcast %2 : vector<1x128xf32> to vector<8x128xf32>
    %78 = arith.addf %76, %77 : vector<8x128xf32>
    %79 = arith.addf %62, %78 : vector<8x128xf32>
    %cst_37 = arith.constant dense<0.000000e+00> : vector<8x128xf32>
    %80 = tpu.matmul %79, %49, %cst_37 {dimension_numbers = #tpu.dot_dimension_numbers<[1], [0], [0], [1], [0, 0, 1, 1], [], []>} : vector<8x128xf32>, vector<128x128xf32>, vector<8x128xf32> -> vector<8x128xf32>
    %81 = arith.subf %79, %80 : vector<8x128xf32>
    %82 = arith.mulf %81, %81 : vector<8x128xf32>
    %cst_38 = arith.constant dense<0.000000e+00> : vector<8x128xf32>
    %83 = tpu.matmul %82, %49, %cst_38 {dimension_numbers = #tpu.dot_dimension_numbers<[1], [0], [0], [1], [0, 0, 1, 1], [], []>} : vector<8x128xf32>, vector<128x128xf32>, vector<8x128xf32> -> vector<8x128xf32>
    %cst_39 = arith.constant 9.99999974E-6 : f32
    %84 = vector.broadcast %cst_39 : f32 to vector<8x128xf32>
    %85 = arith.addf %83, %84 : vector<8x128xf32>
    %86 = math.rsqrt %85 : vector<8x128xf32>
    %87 = arith.mulf %81, %86 : vector<8x128xf32>
    %88 = vector.broadcast %5 : vector<1x128xf32> to vector<8x128xf32>
    %89 = arith.mulf %87, %88 : vector<8x128xf32>
    %90 = vector.broadcast %6 : vector<1x128xf32> to vector<8x128xf32>
    %91 = arith.addf %89, %90 : vector<8x128xf32>
    %c0_40 = arith.constant 0 : index
    %c0_41 = arith.constant 0 : index
    %92 = vector.load %arg9[%c0_40, %c0_41] : memref<8x128xf32, #tpu.memory_space<vmem>>, vector<8x128xf32>
    tpu.vector_store %arg9[%c0_40, %c0_41], %91 {strides = array<i32>} : memref<8x128xf32, #tpu.memory_space<vmem>>, vector<8x128xf32>,
    return
  }
  func.func @transform_0(%arg0: i32) -> (i32, i32) {
    %c0_i32 = arith.constant 0 : i32
    %c0_i32_0 = arith.constant 0 : i32
    return %c0_i32, %arg0 : i32, i32
  }
  func.func @transform_1(%arg0: i32) -> (i32, i32) {
    %c0_i32 = arith.constant 0 : i32
    %c0_i32_0 = arith.constant 0 : i32
    %c0_i32_1 = arith.constant 0 : i32
    return %c0_i32, %c0_i32_0 : i32, i32
  }
  func.func @transform_2(%arg0: i32) -> (i32, i32) {
    %c0_i32 = arith.constant 0 : i32
    %c0_i32_0 = arith.constant 0 : i32
    %c0_i32_1 = arith.constant 0 : i32
    return %c0_i32, %c0_i32_0 : i32, i32
  }
  func.func @transform_3(%arg0: i32) -> (i32, i32) {
    %c0_i32 = arith.constant 0 : i32
    %c0_i32_0 = arith.constant 0 : i32
    %c0_i32_1 = arith.constant 0 : i32
    return %c0_i32, %c0_i32_0 : i32, i32
  }
  func.func @transform_4(%arg0: i32) -> (i32, i32) {
    %c0_i32 = arith.constant 0 : i32
    %c0_i32_0 = arith.constant 0 : i32
    %c0_i32_1 = arith.constant 0 : i32
    return %c0_i32, %c0_i32_0 : i32, i32
  }
  func.func @transform_5(%arg0: i32) -> (i32, i32) {
    %c0_i32 = arith.constant 0 : i32
    %c0_i32_0 = arith.constant 0 : i32
    %c0_i32_1 = arith.constant 0 : i32
    return %c0_i32, %c0_i32_0 : i32, i32
  }
  func.func @transform_6(%arg0: i32) -> (i32, i32) {
    %c0_i32 = arith.constant 0 : i32
    %c0_i32_0 = arith.constant 0 : i32
    %c0_i32_1 = arith.constant 0 : i32
    return %c0_i32, %c0_i32_0 : i32, i32
  }
  func.func @transform_7(%arg0: i32) -> (i32, i32) {
    %c0_i32 = arith.constant 0 : i32
    %c0_i32_0 = arith.constant 0 : i32
    %c0_i32_1 = arith.constant 0 : i32
    return %c0_i32, %c0_i32_0 : i32, i32
  }
  func.func @transform_8(%arg0: i32) -> (i32, i32) {
    %c0_i32 = arith.constant 0 : i32
    %c0_i32_0 = arith.constant 0 : i32
    return %c0_i32, %arg0 : i32, i32
  }
}

</mosaic_0001>

<bundles_post_ra>
// kernel: tpu_custom_call.1
= control target key start
LH: loop header
LB: loop body
LE: loop exit
PB: predicated region body
PF: predicated region fallthrough
CT: control target
= control target key end

     0   :  { %s2993_s0 = inlined_call_operand.hbm [shape: f32[8,256], index: 0, kind: input, shape index: {}]   ;;  %s2994_s1 = inlined_call_operand.hbm [shape: f32[128,384], index: 1, kind: input, shape index: {}]   ;;  %s2995_s2 = inlined_call_operand.vmem [shape: f32[1,384], index: 2, kind: input, shape index: {}]   ;;  %s2996_s3 = inlined_call_operand.hbm [shape: f32[128,128], index: 3, kind: input, shape index: {}]   ;;  %s2997_s4 = inlined_call_operand.hbm [shape: f32[128,128], index: 4, kind: input, shape index: {}]   ;;  %s2998_s5 = inlined_call_operand.hbm [shape: f32[128,128], index: 5, kind: input, shape index: {}]   ;;  %s2999_s6 = inlined_call_operand.hbm [shape: f32[128,128], index: 6, kind: input, shape index: {}]   ;;  %s3000_s7 = inlined_call_operand.vmem [shape: f32[8,128], index: 7, kind: input, shape index: {}]   ;;  %s3001_s8 = inlined_call_operand.hbm [shape: f32[8,256], index: 8, kind: output, shape index: {}]  }
   0x1   :  { %3006 = sst [smem:[#allocation19_spill]] %s2994_s1 }
   0x2   :  { %3007 = sst [smem:[#allocation20_spill]] %s2996_s3 }
   0x3   :  { %3008 = sst [smem:[#allocation21_spill]] %s2997_s4 }
   0x4   :  { %13 = vsyncpa [#allocation3], 0 }
   0x5   :  { %15 = vsyncpa [#allocation3 + $0x1], 0 }
   0x6   :  { %16 = vsyncpa [#allocation6], 0 }
   0x7   :  { %17 = vsyncpa [#allocation9], 0 }
   0x8   :  { %18 = vsyncpa [#allocation12], 0 }
   0x9   :  { %19 = vsyncpa [#allocation4], 0 }
   0xa   :  { %21 = vsyncpa [#allocation4 + $0x1], 0  ;;  %s2463_s27 = smov 0   ;;  %s2465_s28 = smov 0  }
   0xb   :  { %s2467_s29 = smov 0   ;;  %s2469_s30 = smov 0  }
   0xc LB: > { %s2404_s9 = smov [#allocation5]   ;;  %s2484_s11 = sadd.s32 4294967295, %s2402_s30   ;;  %s2402_s30 = sphi %s2469_s30, %s3033_s30   ;;  %s2398_s29 = sphi %s2467_s29, %s3032_s29   ;;  %s2394_s28 = sphi %s2465_s28, %s3031_s28   ;;  %s2390_s27 = sphi %s2463_s27, %s3030_s27  }
   0xd   : > { %s243_s10 = sshll.u32 %s2404_s9, 4  ;;  %p1593_p0 = scmp.ge.s32.totalorder %s2402_s30, 1  ;;  %s244_s10 = int_to_ptr.vmem [resolvable:$true] %s243_s10 }
   0xe   : > { %p3002_p1 = scmp.eq.s32.totalorder %s2484_s11, 0  ;;  %p231_p2 = scmp.lt.s32.totalorder %s2402_s30, 3 }
   0xf   : > { %s2405_s14 = smov [#allocation8]   ;;  %s2406_s16 = smov [#allocation7]  }
  0x10   : > { %p2489_p3 = pnand %p1593_p0, %p231_p2  ;;  %s272_s15 = sshll.u32 %s2405_s14, 4  ;;  %s2502_s15 = int_to_ptr.vmem [resolvable:$true] %s272_s15 }
  0x11   : > { %s2504_s17 = sshll.u32 %s2406_s16, 4  ;;  %s2179_s19 = scalar_lea.vmem %s244_s10, 6144  ;;  %s260_s17 = int_to_ptr.vmem [resolvable:$true] %s2504_s17 }
  0x12   : > { %s3009_s12 = scalar_select %p2489_p3, 1, 0 }
  0x13   : > { %p2062_p5 = pneg %p2489_p3  ;;  %p2180_p8 = scmp.ne.s32.totalorder %s244_s10, %s2179_s19 }
  0x14   : > { %p2187_p11 = scmp.lt.s32.totalorder %s244_s10, %s244_s10  ;;  %p2188_p12 = scmp.lt.s32.totalorder %s2179_s19, %s2179_s19 }
  0x15   : > { %p2498_p6 = pnand %p2062_p5, %p3002_p1 }
  0x16   : > { %p2189_p13 = por %p2188_p12, %p2187_p11 }
  0x17   : > { %p2508_p7 = pneg %p2498_p6 }
  0x19   : > { %p2182_p9 = pnand %p2180_p8, %p2508_p7 }
  0x1b   : > { %p2183_p10 = pneg %p2182_p9 }
  0x1d   : > { %p2190_p0 = pnand %p2189_p13, %p2183_p10 }
  0x1f   : > { %2193 = shalt.err (!%p2190_p0)
}
  0x20   : > { %s2407_s20 = smov 384   ;;  %s2408_s21 = smov 24  }
  0x21   : > { %s3012_s1 = sld [smem:[#allocation19_spill]]  ;;  %s2205_s24 = scalar_lea.vmem %s2502_s15, 2048 }
  0x22   : > { %p2206_p2 = scmp.ne.s32.totalorder %s2502_s15, %s2205_s24  ;;  %p2213_p9 = scmp.lt.s32.totalorder %s2502_s15, %s2502_s15 }
  0x23   : > { %p2214_p10 = scmp.lt.s32.totalorder %s2205_s24, %s2205_s24 }
  0x24   : > { %p2208_p5 = pnand %p2206_p2, %p2508_p7 }
  0x25   : > { %p2215_p11 = por %p2214_p10, %p2213_p9 }
  0x26   : > { %p2209_p8 = pneg %p2208_p5 }
  0x27   : > { %2065 = dma.hbm_to_vmem [thread:$0]  (!%p2498_p6), %s3012_s1, 6144, %s244_s10, [#allocation6], %s2407_s20, %s2407_s20, %s2408_s21  }
  0x28   : > { %p2216_p12 = pnand %p2215_p11, %p2209_p8 }
  0x2a   : > { %2219 = shalt.err (!%p2216_p12)
}
  0x2b   : > { %s2409_s25 = smov 128   ;;  %s2410_s26 = smov 8  }
  0x2c   : > { %s3013_s4 = sld [smem:[#allocation21_spill]]  ;;  %s2231_s14 = scalar_lea.vmem %s260_s17, 2048 }
  0x2d   : > { %p2232_p13 = scmp.ne.s32.totalorder %s260_s17, %s2231_s14  ;;  %p2239_p5 = scmp.lt.s32.totalorder %s260_s17, %s260_s17 }
  0x2e   : > { %p2240_p8 = scmp.lt.s32.totalorder %s2231_s14, %s2231_s14 }
  0x2f   : > { %p2234_p0 = pnand %p2232_p13, %p2508_p7 }
  0x30   : > { %p2241_p9 = por %p2240_p8, %p2239_p5 }
  0x31   : > { %p2235_p2 = pneg %p2234_p0 }
  0x32   : > { %2071 = dma.hbm_to_vmem [thread:$0]  (!%p2498_p6), %s3013_s4, 2048, %s2502_s15, [#allocation9], %s2409_s25, %s2409_s25, %s2410_s26  }
  0x33   : > { %p2242_p10 = pnand %p2241_p9, %p2235_p2 }
  0x35   : > { %2245 = shalt.err (!%p2242_p10)
}
  0x36   : > { %s3014_s3 = sld [smem:[#allocation20_spill]]  ;;  %s2411_s15 = smov [#allocation10]  }
  0x37   : > { %s285_s20 = sshll.u32 %s2411_s15, 4  ;;  %s2412_s21 = smov [#allocation11]   ;;  %s286_s20 = int_to_ptr.vmem [resolvable:$true] %s285_s20 }
  0x38   : > { %s298_s22 = sshll.u32 %s2412_s21, 4  ;;  %s2257_s23 = scalar_lea.vmem %s286_s20, 2048  ;;  %s299_s22 = int_to_ptr.vmem [resolvable:$true] %s298_s22 }
  0x39   : > { %p2258_p11 = scmp.ne.s32.totalorder %s286_s20, %s2257_s23  ;;  %p2265_p0 = scmp.lt.s32.totalorder %s286_s20, %s286_s20 }
  0x3a   : > { %p2266_p2 = scmp.lt.s32.totalorder %s2257_s23, %s2257_s23 }
  0x3b   : > { %p2260_p12 = pnand %p2258_p11, %p2508_p7 }
  0x3c   : > { %2068 = dma.hbm_to_vmem [thread:$0]  (!%p2498_p6), %s3014_s3, 2048, %s260_s17, [#allocation6], %s2409_s25, %s2409_s25, %s2410_s26  }
  0x3d   : > { %p2261_p13 = pneg %p2260_p12  ;;  %p2267_p5 = por %p2266_p2, %p2265_p0 }
  0x3f   : > { %p2268_p8 = pnand %p2267_p5, %p2261_p13 }
  0x41   : > { %2271 = shalt.err (!%p2268_p8)
}
  0x42   : > { %2074 = dma.hbm_to_vmem [thread:$0]  (!%p2498_p6), %s2998_s5, 2048, %s286_s20, [#allocation9], %s2409_s25, %s2409_s25, %s2410_s26  }
  0x43   : > { %s2283_s9 = scalar_lea.vmem %s299_s22, 2048  ;;  %p2291_p12 = scmp.lt.s32.totalorder %s299_s22, %s299_s22 }
  0x44   : > { %p2284_p9 = scmp.ne.s32.totalorder %s299_s22, %s2283_s9  ;;  %p2292_p0 = scmp.lt.s32.totalorder %s2283_s9, %s2283_s9 }
  0x46   : > { %p2286_p10 = pnand %p2284_p9, %p2508_p7  ;;  %p2293_p13 = por %p2292_p0, %p2291_p12 }
  0x48   : > { %p2287_p11 = pneg %p2286_p10 }
  0x4a   : > { %p2294_p2 = pnand %p2293_p13, %p2287_p11 }
  0x4c   : > { %2297 = shalt.err (!%p2294_p2)
}
  0x4d   : > { %2077 = dma.hbm_to_vmem [thread:$0]  (!%p2498_p6), %s2999_s6, 2048, %s299_s22, [#allocation12], %s2409_s25, %s2409_s25, %s2410_s26  }
  0x4e   : > { %s1592_s13 = sadd.s32 4294967294, %s2402_s30   ;;  %s2567_s18 = sadd.s32 1, %s2402_s30  }
  0x4f   : > { %s34_s16 = sadd.s32 1, %s2398_s29  ;;  %s31_s19 = ssub.s32 %s2402_s30, %s2567_s18 }
  0x50   : > { %p41_p7 = scmp.ne.s32.totalorder %s2398_s29, %s2394_s28  ;;  %p32_p5 = scmp.eq.s32.totalorder %s31_s19, 0 }
  0x51   : > { %p42_p8 = scmp.eq.s32.totalorder %s2402_s30, 0  ;;  %p47_p9 = scmp.ne.s32.totalorder %s2394_s28, %s2390_s27 }
  0x52   : > { %p218_p10 = scmp.eq.s32.totalorder %s2484_s11, 1  ;;  %p224_p0 = scmp.eq.s32.totalorder %s1592_s13, 1 }
  0x53   : > { %s2579_s15 = scalar_select %p32_p5, %s2398_s29, %s34_s16  }
  0x54   : > { %p43_p11 = por %p42_p8, %p41_p7  ;;  %p2583_p12 = por %p3002_p1, %p47_p9 }
  0x55   : > { %p2587_p6 = por %p218_p10, %p41_p7  ;;  %p2091_p13 = scmp.lt.s32.totalorder %s2402_s30, 2 }
  0x56   : > { %s3015_s20 = scalar_select %p2583_p12, 1, 0 }
  0x57   : > { %s3016_s25 = scalar_select %p2587_p6, 1, 0 }
  0x58   : > { %s315_s26 = sand.u32 1, %s2398_s29   ;;  %p2593_p2 = por %p224_p0, %p47_p9 }
  0x59   : > { %s1600_s22 = sshll.u32 %s315_s26, 3  ;;  %s1601_s23 = sshll.u32 %s2402_s30, 7 }
  0x5a   : > { %s3017_s21 = scalar_select %p2593_p2, 1, 0 }
  0x5b   : > { %s2601_s9 = scalar_lea.hbm %s2993_s0, %s1601_s23  ;;  %s319_s10 = scalar_lea.vmem [#allocation2], %s1600_s22 }
  0x5c   : > { %s326_s14 = sshll.u32 %s319_s10, 4  ;;  %p2603_p7 = pnand %p2091_p13, %p43_p11  ;;  %s327_s14 = int_to_ptr.vmem [resolvable:$true] %s326_s14 }
  0x5d   : > { %s316_s16 = scalar_lea.sflag [#allocation3], %s315_s26  ;;  %s2298_s19 = scalar_lea.hbm %s2601_s9, 128 }
  0x5e   : > { %p2299_p5 = scmp.ne.s32.totalorder %s2601_s9, %s2298_s19  ;;  %p2300_p8 = pneg %p2603_p7 }
  0x5f   : > { %s2303_s24 = scalar_lea.hbm %s2993_s0, 256  ;;  %p2304_p11 = scmp.lt.s32.totalorder %s2601_s9, %s2993_s0 }
  0x60   : > { %p2301_p9 = pnand %p2300_p8, %p2299_p5  ;;  %p2305_p0 = scmp.lt.s32.totalorder %s2303_s24, %s2298_s19 }
  0x62   : > { %p2302_p10 = pneg %p2301_p9  ;;  %p2306_p13 = por %p2305_p0, %p2304_p11 }
  0x64   : > { %p2307_p4 = pnand %p2306_p13, %p2302_p10 }
  0x66   : > { %2310 = shalt.err (!%p2307_p4)
}
  0x67   : > { %s2311_s10 = scalar_lea.vmem %s327_s14, 128  ;;  %s2413_s26 = smov [#allocation2]  }
  0x68   : > { %p2312_p1 = scmp.ne.s32.totalorder %s327_s14, %s2311_s10  ;;  %s2316_s3 = sshll.u32 %s2413_s26, 4  ;;  %s2317_s3 = int_to_ptr.vmem [resolvable:$false] %s2316_s3 }
  0x69   : > { %s2318_s4 = scalar_lea.vmem %s2317_s3, 256  ;;  %p2319_p5 = scmp.lt.s32.totalorder %s327_s14, %s2317_s3 }
  0x6a   : > { %p2314_p2 = pnand %p2312_p1, %p2300_p8  ;;  %p2320_p9 = scmp.lt.s32.totalorder %s2318_s4, %s2311_s10 }
  0x6c   : > { %p2315_p6 = pneg %p2314_p2  ;;  %p2321_p12 = por %p2320_p9, %p2319_p5 }
  0x6e   : > { %p2322_p3 = pnand %p2321_p12, %p2315_p6 }
  0x70   : > { %2325 = shalt.err (!%p2322_p3)
}
  0x71   : > { %2081 = dma.hbm_to_vmem [thread:$0]  (!%p2603_p7), %s2601_s9, 128, %s327_s14, %s316_s16  }
  0x72   : > { %p3019_p10 = scmp.ne.s32.totalorder %s3009_s12, 0 }
  0x73   : > { %s2624_s1 = sand.u32 (!%p3019_p10), 1, %s2394_s28   ;;  %p3020_p1 = scmp.ne.s32.totalorder (!%p3019_p10), %s3015_s20, 0 }
  0x74   : > { %335 = sbr.rel (%p3019_p10) target bundleno = 1880 (0x758), region = 52  ;;  %s1603_s19 = sshll.u32 (!%p3019_p10), %s2624_s1, 3 }
  0x75   : > { %s338_s3 = scalar_lea.sflag (!%p3019_p10), [#allocation3], %s2624_s1  ;;  %s2630_s4 = scalar_lea.vmem (!%p3019_p10), [#allocation2], %s1603_s19 }
  0x79   : > { %2369 = dma.done.wait (%p3020_p1), %s338_s3, 128  }
  0x7a   : > { %2371 = vsyncadd (%p3020_p1), %s338_s3, 4294967168  ;;  %p3021_p3 = scmp.eq.s32.totalorder %s2484_s11, 0 }
  0x7c   : > { %2373 = dma.done.wait (%p3021_p3), [#allocation6], 8192   ;;  %p3022_p4 = pmov %p3021_p3 }
  0x7d   : > { %p3023_p12 = pmov %p3021_p3 }
  0x7e   : > { %2375 = vsyncadd (%p3022_p4), [#allocation6], 4294959104 }
  0x7f   : > { %2377 = dma.done.wait (%p3023_p12), [#allocation9], 4096   ;;  %p3024_p6 = pmov %p3021_p3 }
  0x80   : > { %p3025_p2 = pmov %p3021_p3 }
  0x81   : > { %2379 = vsyncadd (%p3024_p6), [#allocation9], 4294963200 }
  0x82   : > { %2381 = dma.done.wait (%p3025_p2), [#allocation12], 2048   ;;  %p3026_p7 = pmov %p3025_p2 }
  0x83   : > { %v2414_v0 = vmov 0.0   ;;  %vm2415_vm0 = vmmov 0   ;;  %v448_v1 = vld [vmem:[#allocation5 + $0x170] sm:$0xff]  ;;  %v447_v2 = vld [vmem:[#allocation5 + $0x168] sm:$0xff]  ;;  %v445_v3 = vld [vmem:[#allocation5 + $0x158] sm:$0xff]  ;;  %s1619_s9 = sshll.u32 %s2484_s11, 7 }
  0x84   : > { %2383 = vsyncadd (%p3026_p7), [#allocation12], 4294965248  ;;  %1758 = vmatprep.subr.mxu1 %v2414_v0  ;;  %531 = vmatprep.mubr.f32.mxu0 %v2414_v0  ;;  %v444_v4 = vld [vmem:[#allocation5 + $0x150] sm:$0xff]  ;;  %v442_v5 = vld [vmem:[#allocation5 + $0x140] sm:$0xff]  ;;  %s393_s14 = scalar_lea.vmem [#allocation13], %s1603_s19  ;;  %s1472_s17 = scalar_lea.hbm %s3001_s8, %s1619_s9 }
  0x85   : > { %1790 = vmatprep.mubr.msk.f32.mxu1 %vm2415_vm0, %v2414_v0  ;;  %467 = vmatprep.subr.mxu0 %v448_v1  ;;  %v441_v6 = vld [vmem:[#allocation5 + $0x138] sm:$0xff]  ;;  %v439_v7 = vld [vmem:[#allocation5 + $0x128] sm:$0xff]  ;;  %v438_v8 = vld [vmem:[#allocation5 + $0x120] sm:$0xff]  ;;  %s1474_s13 = sshll.u32 %s393_s14, 4  ;;  %s1461_s24 = scalar_lea.sflag [#allocation4], %s2624_s1  ;;  %s1475_s13 = int_to_ptr.vmem [resolvable:$true] %s1474_s13 }
  0x86   : > { %468 = vmatpush1.msra.mxu0 %v447_v2  ;;  %v436_v9 = vld [vmem:[#allocation5 + $0x110] sm:$0xff]  ;;  %v435_v10 = vld [vmem:[#allocation5 + $0x108] sm:$0xff]  ;;  %v433_v11 = vld [vmem:[#allocation5 + $0xf8] sm:$0xff]  ;;  %s2326_s22 = scalar_lea.vmem %s1475_s13, 128  ;;  %p3027_p11 = scmp.ne.s32.totalorder %s3016_s25, 0 }
  0x87   : > { %469 = vmatprep.subr.mxu0 %v445_v3  ;;  %v432_v12 = vld [vmem:[#allocation5 + $0xf0] sm:$0xff]  ;;  %v430_v13 = vld [vmem:[#allocation5 + $0xe0] sm:$0xff]  ;;  %v449_v14 = vld [vmem:[#allocation5 + $0x178] sm:$0xff]  ;;  %p2327_p8 = scmp.ne.s32.totalorder %s1475_s13, %s2326_s22  ;;  %s2417_s10 = smov [#allocation13]  }
  0x88   : > { %470 = vmatpush1.msra.mxu0 %v444_v4  ;;  %v429_v15 = vld [vmem:[#allocation5 + $0xd8] sm:$0xff]  ;;  %1759 = vmatpush3.msra.mxu1 %v449_v14  ;;  %v446_v16 = vld [vmem:[#allocation5 + $0x160] sm:$0xff]  ;;  %v427_v17 = vld [vmem:[#allocation5 + $0xc8] sm:$0xff]  ;;  %s2330_s26 = sshll.u32 %s2417_s10, 4  ;;  %s2331_s26 = int_to_ptr.vmem [resolvable:$false] %s2330_s26 }
  0x89   : > { %471 = vmatprep.subr.mxu0 %v442_v5  ;;  %1760 = vmatprep.subr.mxu1 %v2414_v0  ;;  %v443_v18 = vld [vmem:[#allocation5 + $0x148] sm:$0xff]  ;;  %v426_v19 = vld [vmem:[#allocation5 + $0xc0] sm:$0xff]  ;;  %v424_v20 = vld [vmem:[#allocation5 + $0xb0] sm:$0xff]  ;;  %p2328_p0 = pnand %p2327_p8, %p3027_p11  ;;  %s2332_s11 = scalar_lea.vmem %s2331_s26, 256 }
  0x8a   : > { %472 = vmatpush1.msra.mxu0 %v441_v6  ;;  %1761 = vmatpush3.msra.mxu1 %v446_v16  ;;  %v440_v21 = vld [vmem:[#allocation5 + $0x130] sm:$0xff]  ;;  %v423_v22 = vld [vmem:[#allocation5 + $0xa8] sm:$0xff]  ;;  %v421_v23 = vld [vmem:[#allocation5 + $0x98] sm:$0xff]  ;;  %v452_v16 = vlaneseq  ;;  %p2333_p5 = scmp.lt.s32.totalorder %s1475_s13, %s2331_s26  ;;  %p2334_p9 = scmp.lt.s32.totalorder %s2332_s11, %s2326_s22 }
  0x8b   : > { %473 = vmatprep.subr.mxu0 %v439_v7  ;;  %1762 = vmatprep.subr.mxu1 %v2414_v0  ;;  %v437_v24 = vld [vmem:[#allocation5 + $0x118] sm:$0xff]  ;;  %v420_v25 = vld [vmem:[#allocation5 + $0x90] sm:$0xff]  ;;  %v418_v26 = vld [vmem:[#allocation5 + $0x80] sm:$0xff]  ;;  %p2329_p13 = pneg %p2328_p0 }
  0x8c   : > { %474 = vmatpush1.msra.mxu0 %v438_v8  ;;  %1763 = vmatpush3.msra.mxu1 %v443_v18  ;;  %v434_v27 = vld [vmem:[#allocation5 + $0x100] sm:$0xff]  ;;  %v417_v28 = vld [vmem:[#allocation5 + $0x78] sm:$0xff]  ;;  %v415_v29 = vld [vmem:[#allocation5 + $0x68] sm:$0xff]  ;;  %v2416_v18 = vmov 1966171168   ;;  %p2335_p10 = por %p2334_p9, %p2333_p5 }
  0x8d   : > { %475 = vmatprep.subr.mxu0 %v436_v9  ;;  %1764 = vmatprep.subr.mxu1 %v2414_v0  ;;  %v431_v30 = vld [vmem:[#allocation5 + $0xe8] sm:$0xff]  ;;  %v414_v31 = vld [vmem:[#allocation5 + $0x60] sm:$0xff]  ;;  %v412_v32 = vld [vmem:[#allocation5 + $0x50] sm:$0xff] }
  0x8e   : > { %476 = vmatpush1.msra.mxu0 %v435_v10  ;;  %1765 = vmatpush3.msra.mxu1 %v440_v21  ;;  %v428_v33 = vld [vmem:[#allocation5 + $0xd0] sm:$0xff]  ;;  %v411_v34 = vld [vmem:[#allocation5 + $0x48] sm:$0xff]  ;;  %v409_v35 = vld [vmem:[#allocation5 + $0x38] sm:$0xff]  ;;  %p2336_p1 = pnand %p2335_p10, %p2329_p13 }
  0x8f   : > { %477 = vmatprep.subr.mxu0 %v433_v11  ;;  %1766 = vmatprep.subr.mxu1 %v2414_v0  ;;  %v425_v36 = vld [vmem:[#allocation5 + $0xb8] sm:$0xff]  ;;  %v408_v37 = vld [vmem:[#allocation5 + $0x30] sm:$0xff]  ;;  %v406_v38 = vld [vmem:[#allocation5 + $0x20] sm:$0xff] }
  0x90   : > { %478 = vmatpush1.msra.mxu0 %v432_v12  ;;  %1767 = vmatpush3.msra.mxu1 %v437_v24  ;;  %v422_v39 = vld [vmem:[#allocation5 + $0xa0] sm:$0xff]  ;;  %v405_v40 = vld [vmem:[#allocation5 + $0x18] sm:$0xff]  ;;  %v403_v41 = vld [vmem:[#allocation5 + $0x8] sm:$0xff] }
  0x91   : > { %479 = vmatprep.subr.mxu0 %v430_v13  ;;  %1768 = vmatprep.subr.mxu1 %v2414_v0  ;;  %v419_v42 = vld [vmem:[#allocation5 + $0x88] sm:$0xff]  ;;  %v402_v43 = vld [vmem:[#allocation5] sm:$0xff]  ;;  %v2662_v44 = vld [vmem:[%s2630_s4] sm:$0xff] }
  0x92   : > { %480 = vmatpush1.msra.mxu0 %v429_v15  ;;  %1769 = vmatpush3.msra.mxu1 %v434_v27  ;;  %v416_v45 = vld [vmem:[#allocation5 + $0x70] sm:$0xff]  ;;  %v413_v46 = vld [vmem:[#allocation5 + $0x58] sm:$0xff]  ;;  %v410_v47 = vld [vmem:[#allocation5 + $0x40] sm:$0xff] }
  0x93   : > { %481 = vmatprep.subr.mxu0 %v427_v17  ;;  %1770 = vmatprep.subr.mxu1 %v2414_v0  ;;  %v407_v48 = vld [vmem:[#allocation5 + $0x28] sm:$0xff]  ;;  %v404_v49 = vld [vmem:[#allocation5 + $0x10] sm:$0xff]  ;;  %v872_v50 = vld [vmem:[#allocation7 + $0x78] sm:$0xff]  ;;  %v453_v17 = vshrl.u32 %v452_v16, 7 }
  0x94   : > { %482 = vmatpush1.msra.mxu0 %v426_v19  ;;  %1771 = vmatpush3.msra.mxu1 %v431_v30  ;;  %v871_v51 = vld [vmem:[#allocation7 + $0x70] sm:$0xff]  ;;  %v870_v52 = vld [vmem:[#allocation7 + $0x68] sm:$0xff]  ;;  %v869_v53 = vld [vmem:[#allocation7 + $0x60] sm:$0xff]  ;;  %v611_v19 = vunpack.c.l.s4 %v2416_v18 }
  0x95   : > { %483 = vmatprep.subr.mxu0 %v424_v20  ;;  %1772 = vmatprep.subr.mxu1 %v2414_v0  ;;  %v868_v54 = vld [vmem:[#allocation7 + $0x58] sm:$0xff]  ;;  %v867_v55 = vld [vmem:[#allocation7 + $0x50] sm:$0xff]  ;;  %v866_v56 = vld [vmem:[#allocation7 + $0x48] sm:$0xff]  ;;  %v458_v20 = vsub.s32 1, %v453_v17  ;;  %v462_v18 = vsub.s32 2, %v453_v17 }
  0x96   : > { %484 = vmatpush1.msra.mxu0 %v423_v22  ;;  %1773 = vmatpush3.msra.mxu1 %v428_v33  ;;  %v865_v57 = vld [vmem:[#allocation7 + $0x40] sm:$0xff]  ;;  %v864_v58 = vld [vmem:[#allocation7 + $0x38] sm:$0xff]  ;;  %v863_v59 = vld [vmem:[#allocation7 + $0x30] sm:$0xff]  ;;  %v612_v21 = vunpack.c.0.s8 %v611_v19 }
  0x97   : > { %485 = vmatprep.subr.mxu0 %v421_v23  ;;  %1774 = vmatprep.subr.mxu1 %v2414_v0  ;;  %v862_v60 = vld [vmem:[#allocation7 + $0x28] sm:$0xff]  ;;  %v861_v61 = vld [vmem:[#allocation7 + $0x20] sm:$0xff]  ;;  %v860_v62 = vld [vmem:[#allocation7 + $0x18] sm:$0xff] }
  0x98   : > { %486 = vmatpush1.msra.mxu0 %v420_v25  ;;  %1775 = vmatpush3.msra.mxu1 %v425_v36  ;;  %v859_v63 = vld [vmem:[#allocation7 + $0x10] sm:$0xff]  ;;  %v858_v1 = vld [vmem:[#allocation7 + $0x8] sm:$0xff]  ;;  %v2691_v2 = vld [vmem:[#allocation11 + $0x78] sm:$0xff]  ;;  %v2749_v25 = vsub.s32 %v612_v21, %v453_v17 }
  0x99   : > { %487 = vmatprep.subr.mxu0 %v418_v26  ;;  %1776 = vmatprep.subr.mxu1 %v2414_v0  ;;  %v2693_v3 = vld [vmem:[#allocation11 + $0x70] sm:$0xff]  ;;  %v857_v4 = vld [vmem:[#allocation7] sm:$0xff]  ;;  %v2698_v5 = vld [vmem:[#allocation11 + $0x68] sm:$0xff] }
  0x9a   : > { %488 = vmatpush1.msra.mxu0 %v417_v28  ;;  %1777 = vmatpush3.msra.mxu1 %v422_v39  ;;  %v2703_v6 = vld [vmem:[#allocation11 + $0x60] sm:$0xff]  ;;  %v2707_v7 = vld [vmem:[#allocation11 + $0x58] sm:$0xff]  ;;  %v2712_v8 = vld [vmem:[#allocation11 + $0x50] sm:$0xff]  ;;  %v2751_v28 = vsub.s32 0, %v453_v17 }
  0x9b   : > { %489 = vmatprep.subr.mxu0 %v415_v29  ;;  %1778 = vmatprep.subr.mxu1 %v2414_v0  ;;  %v2716_v9 = vld [vmem:[#allocation11 + $0x48] sm:$0xff]  ;;  %v2720_v10 = vld [vmem:[#allocation11 + $0x40] sm:$0xff]  ;;  %v2724_v11 = vld [vmem:[#allocation11 + $0x38] sm:$0xff] }
  0x9c   : > { %490 = vmatpush1.msra.mxu0 %v414_v31  ;;  %1779 = vmatpush3.msra.mxu1 %v419_v42  ;;  %v2728_v12 = vld [vmem:[#allocation11 + $0x30] sm:$0xff]  ;;  %v2732_v13 = vld [vmem:[#allocation11 + $0x28] sm:$0xff]  ;;  %v2736_v14 = vld [vmem:[#allocation11 + $0x20] sm:$0xff] }
  0x9d   : > { %491 = vmatprep.subr.mxu0 %v412_v32  ;;  %1780 = vmatprep.subr.mxu1 %v2414_v0  ;;  %v2740_v15 = vld [vmem:[#allocation11 + $0x18] sm:$0xff]  ;;  %v450_v22 = vld [vmem:[%s2995_s2] sm:$0x7] }
  0x9e   : > { %492 = vmatpush1.msra.mxu0 %v411_v34  ;;  %1781 = vmatpush3.msra.mxu1 %v416_v45  ;;  %v459_v23 = vrot.slane %v450_v22, %v458_v20  ;;  %v455_v34 = vrot.slane %v450_v22, %v2751_v28 }
  0x9f   : > { %493 = vmatprep.subr.mxu0 %v409_v35  ;;  %1782 = vmatprep.subr.mxu1 %v2414_v0 }
  0xa0   : > { %494 = vmatpush1.msra.mxu0 %v408_v37  ;;  %1783 = vmatpush3.msra.mxu1 %v413_v46 }
  0xa1   : > { %495 = vmatprep.subr.mxu0 %v406_v38  ;;  %1784 = vmatprep.subr.mxu1 %v2414_v0 }
  0xa2   : > { %496 = vmatpush1.msra.mxu0 %v405_v40  ;;  %1785 = vmatpush3.msra.mxu1 %v410_v47 }
  0xa3   : > { %497 = vmatprep.subr.mxu0 %v403_v41  ;;  %1786 = vmatprep.subr.mxu1 %v2414_v0 }
  0xa4   : > { %498 = vmatpush1.msra.mxu0 %v402_v43  ;;  %1787 = vmatpush3.msra.mxu1 %v407_v48 }
  0xa5   : > { %532 = vmatmul.mubr.f32.vlgmr.msra.gmra.mxu0 %v2662_v44  ;;  %1793 = vmatprep.subr.mxu0 %v2414_v0 }
  0xa6   : > { %1825 = vmatprep.mubr.msk.f32.mxu0 %vm2415_vm0, %v2414_v0  ;;  %1788 = vmatprep.subr.mxu1 %v2414_v0 }
  0xa7   : > { %1789 = vmatpush3.msra.mxu1 %v404_v49  ;;  %1794 = vmatpush3.msra.mxu0 %v872_v50 }
  0xa8   : > { %1791 = vmatmul.mubr.f32.vlgmr.msra.gmra.mxu1 %v2662_v44  ;;  %1828 = vmatprep.subr.mxu1 %v2414_v0 }
  0xa9   : > { %1860 = vmatprep.mubr.msk.f32.mxu1 %vm2415_vm0, %v2414_v0  ;;  %1795 = vmatprep.subr.mxu0 %v2414_v0 }
  0xaa   : > { %1796 = vmatpush3.msra.mxu0 %v871_v51  ;;  %1829 = vmatpush3.msra.mxu1 %v2691_v2 }
  0xab   : > { %1797 = vmatprep.subr.mxu0 %v2414_v0  ;;  %1830 = vmatprep.subr.mxu1 %v2414_v0 }
  0xac   : > { %1798 = vmatpush3.msra.mxu0 %v870_v52  ;;  %1831 = vmatpush3.msra.mxu1 %v2693_v3 }
  0xad   : > { %1799 = vmatprep.subr.mxu0 %v2414_v0  ;;  %1832 = vmatprep.subr.mxu1 %v2414_v0 }
  0xae   : > { %1800 = vmatpush3.msra.mxu0 %v869_v53  ;;  %1833 = vmatpush3.msra.mxu1 %v2698_v5 }
  0xaf   : > { %1801 = vmatprep.subr.mxu0 %v2414_v0  ;;  %1834 = vmatprep.subr.mxu1 %v2414_v0 }
  0xb0   : > { %1802 = vmatpush3.msra.mxu0 %v868_v54  ;;  %1835 = vmatpush3.msra.mxu1 %v2703_v6 }
  0xb1   : > { %1803 = vmatprep.subr.mxu0 %v2414_v0  ;;  %1836 = vmatprep.subr.mxu1 %v2414_v0 }
  0xb2   : > { %1804 = vmatpush3.msra.mxu0 %v867_v55  ;;  %1837 = vmatpush3.msra.mxu1 %v2707_v7 }
  0xb3   : > { %1805 = vmatprep.subr.mxu0 %v2414_v0  ;;  %1838 = vmatprep.subr.mxu1 %v2414_v0 }
  0xb4   : > { %1806 = vmatpush3.msra.mxu0 %v866_v56  ;;  %1839 = vmatpush3.msra.mxu1 %v2712_v8 }
  0xb5   : > { %1807 = vmatprep.subr.mxu0 %v2414_v0  ;;  %1840 = vmatprep.subr.mxu1 %v2414_v0 }
  0xb6   : > { %1808 = vmatpush3.msra.mxu0 %v865_v57  ;;  %1841 = vmatpush3.msra.mxu1 %v2716_v9 }
  0xb7   : > { %1809 = vmatprep.subr.mxu0 %v2414_v0  ;;  %1842 = vmatprep.subr.mxu1 %v2414_v0 }
  0xb8   : > { %1810 = vmatpush3.msra.mxu0 %v864_v58  ;;  %1843 = vmatpush3.msra.mxu1 %v2720_v10 }
  0xb9   : > { %1811 = vmatprep.subr.mxu0 %v2414_v0  ;;  %1844 = vmatprep.subr.mxu1 %v2414_v0 }
  0xba   : > { %1812 = vmatpush3.msra.mxu0 %v863_v59  ;;  %1845 = vmatpush3.msra.mxu1 %v2724_v11 }
  0xbb   : > { %1813 = vmatprep.subr.mxu0 %v2414_v0  ;;  %1846 = vmatprep.subr.mxu1 %v2414_v0 }
  0xbc   : > { %1814 = vmatpush3.msra.mxu0 %v862_v60  ;;  %1847 = vmatpush3.msra.mxu1 %v2728_v12 }
  0xbd   : > { %1815 = vmatprep.subr.mxu0 %v2414_v0  ;;  %1848 = vmatprep.subr.mxu1 %v2414_v0 }
  0xbe   : > { %1816 = vmatpush3.msra.mxu0 %v861_v61  ;;  %1849 = vmatpush3.msra.mxu1 %v2732_v13 }
  0xbf   : > { %1817 = vmatprep.subr.mxu0 %v2414_v0  ;;  %1850 = vmatprep.subr.mxu1 %v2414_v0 }
  0xc0   : > { %1818 = vmatpush3.msra.mxu0 %v860_v62  ;;  %1851 = vmatpush3.msra.mxu1 %v2736_v14 }
  0xc1   : > { %1819 = vmatprep.subr.mxu0 %v2414_v0  ;;  %1852 = vmatprep.subr.mxu1 %v2414_v0 }
  0xc2   : > { %1820 = vmatpush3.msra.mxu0 %v859_v63  ;;  %1853 = vmatpush3.msra.mxu1 %v2740_v15 }
  0xc3   : > { %1821 = vmatprep.subr.mxu0 %v2414_v0  ;;  %1854 = vmatprep.subr.mxu1 %v2414_v0 }
  0xc4   : > { %1822 = vmatpush3.msra.mxu0 %v858_v1 }
  0xc5   : > { %1823 = vmatprep.subr.mxu0 %v2414_v0 }
  0xc6   : > { %1824 = vmatpush3.msra.mxu0 %v857_v4 }
  0xc7   : > { %1863 = vmatprep.subr.mxu0 %v2414_v0 }
 0x165   : > { %v533_v24 = vpop.f32.mrf.mxu0 }
 0x166   : > { %v534_v46 = vadd.f32 %v533_v24, %v455_v34 }
 0x167   : > { %v535_v26 = vpop.f32.mrf.mxu0 }
 0x168   : > { %v536_v27 = vadd.f32 %v535_v26, %v459_v23  ;;  %v604_v39 = vpop.f32.mrf.mxu1  ;;  %v463_v23 = vrot.slane %v450_v22, %v462_v18 }
 0x16a   : > { %v609_v29 = vcombine.high %v536_v27, %v536_v27  ;;  %v616_v30 = vrot.slane %v536_v27, %v2749_v25  ;;  %v1792_v45 = vpop.f32.mrf.mxu1 }
 0x16c   : > { %v623_v31 = vrot.slane %v609_v29, %v2749_v25  ;;  %v624_v32 = vcombine.high %v616_v30, %v616_v30  ;;  %v632_v33 = vrot.slane %v616_v30, %v2749_v25 }
 0x16e   : > { %v625_v35 = vcombine.high %v623_v31, %v623_v31  ;;  %v639_v36 = vrot.slane %v623_v31, %v2749_v25  ;;  %v646_v37 = vrot.slane %v624_v32, %v2749_v25  ;;  %v654_v38 = vcombine.high %v632_v33, %v632_v33 }
 0x16f   : > { %v661_v47 = vrot.slane %v632_v33, %v2751_v28  ;;  %v605_v33 = vadd.f32 %v604_v39, %v463_v23 }
 0x170   : > { %v653_v40 = vrot.slane %v625_v35, %v2749_v25  ;;  %v655_v41 = vcombine.high %v639_v36, %v639_v36  ;;  %v656_v42 = vcombine.high %v646_v37, %v646_v37  ;;  %v665_v43 = vrot.slane %v646_v37, %v2751_v28 }
 0x171   : > { %v669_v48 = vrot.slane %v654_v38, %v2751_v28  ;;  %v677_v49 = vrot.slane %v639_v36, %v2751_v28  ;;  %v698_v59 = vmul.f32 %v661_v47, %v534_v46  ;;  %v757_v35 = vrot.slane %v605_v33, %v2749_v25 }
 0x172   : > { %v657_v50 = vcombine.high %v653_v40, %v653_v40  ;;  %v673_v51 = vrot.slane %v656_v42, %v2751_v28  ;;  %v681_v52 = vrot.slane %v653_v40, %v2751_v28  ;;  %v685_v53 = vrot.slane %v655_v41, %v2751_v28 }
 0x173   : > { %v699_v54 = vmul.f32 %v665_v43, %v534_v46  ;;  %v702_v56 = vmul.f32 %v677_v49, %v534_v46  ;;  %v700_v60 = vmul.f32 %v669_v48, %v534_v46  ;;  %v765_v22 = vcombine.high %v757_v35, %v757_v35 }
 0x174   : > { %v689_v55 = vrot.slane %v657_v50, %v2751_v28  ;;  %v703_v57 = vmul.f32 %v681_v52, %v534_v46  ;;  %v704_v58 = vmul.f32 %v685_v53, %v534_v46  ;;  %v701_v61 = vmul.f32 %v673_v51, %v534_v46 }
 0x175   : > { %v706_v1 = vmax.f32 %v698_v59, %v702_v56  ;;  %v773_v43 = vrot.slane %v757_v35, %v2749_v25  ;;  %v787_v47 = vrot.slane %v765_v22, %v2749_v25  ;;  %v750_v50 = vcombine.high %v605_v33, %v605_v33 }
 0x176   : > { %v705_v62 = vmul.f32 %v689_v55, %v534_v46  ;;  %v707_v63 = vmax.f32 %v699_v54, %v703_v57  ;;  %v708_v4 = vmax.f32 %v700_v60, %v704_v58 }
 0x177   : > { %v795_v48 = vcombine.high %v773_v43, %v773_v43  ;;  %v802_v49 = vrot.slane %v773_v43, %v2751_v28  ;;  %v806_v51 = vrot.slane %v787_v47, %v2751_v28  ;;  %v797_v53 = vcombine.high %v787_v47, %v787_v47 }
 0x178   : > { %v709_v16 = vmax.f32 %v701_v61, %v705_v62  ;;  %v710_v19 = vmax.f32 %v706_v1, %v707_v63 }
 0x17a   : > { %v711_v20 = vmax.f32 %v708_v4, %v709_v16 }
 0x17c   : > { %v712_v21 = vmax.f32 %v710_v19, %v711_v20 }
 0x17e   : > { %v716_v24 = vsub.f32 %v698_v59, %v712_v21  ;;  %v717_v26 = vsub.f32 %v699_v54, %v712_v21  ;;  %v718_v27 = vsub.f32 %v700_v60, %v712_v21  ;;  %v719_v29 = vsub.f32 %v701_v61, %v712_v21 }
 0x17f   : > { %v720_v34 = vsub.f32 %v702_v56, %v712_v21  ;;  %v721_v36 = vsub.f32 %v703_v57, %v712_v21  ;;  %v722_v17 = vsub.f32 %v704_v58, %v712_v21  ;;  %v713_v40 = vsub.f32 -inf, %v712_v21 }
 0x180   : > { %v724_v30 = vmul.f32 1.442695, %v716_v24  ;;  %v726_v31 = vmul.f32 1.442695, %v717_v26  ;;  %v728_v32 = vmul.f32 1.442695, %v718_v27  ;;  %v723_v41 = vsub.f32 %v705_v62, %v712_v21 }
 0x181   : > { %v730_v37 = vmul.f32 1.442695, %v719_v29  ;;  %v732_v38 = vmul.f32 1.442695, %v720_v34  ;;  %v734_v42 = vmul.f32 1.442695, %v721_v36  ;;  %v810_v54 = vrot.slane %v795_v48, %v2751_v28 }
 0x182   : > { %2142 = vpow2.f32 %v724_v30  ;;  %v736_v45 = vmul.f32 1.442695, %v722_v17  ;;  %v714_v39 = vmul.f32 1.442695, %v713_v40  ;;  %v738_v46 = vmul.f32 1.442695, %v723_v41 }
 0x183   : > { %2144 = vpow2.f32 %v726_v31  ;;  %v764_v59 = vrot.slane %v750_v50, %v2749_v25  ;;  %v814_v61 = vrot.slane %v797_v53, %v2751_v28  ;;  %v2812_v53 = vld [vmem:[#allocation11 + $0x8] sm:$0xff] }
 0x184   : > { %2146 = vpow2.f32 %v728_v32 }
 0x185   : > { %2148 = vpow2.f32 %v730_v37  ;;  %v766_v16 = vcombine.high %v764_v59, %v764_v59  ;;  %v780_v18 = vrot.slane %v764_v59, %v2749_v25 }
 0x186   : > { %2150 = vpow2.f32 %v732_v38 }
 0x187   : > { %2152 = vpow2.f32 %v734_v42  ;;  %v818_v23 = vrot.slane %v780_v18, %v2751_v28  ;;  %v794_v30 = vrot.slane %v766_v16, %v2749_v25  ;;  %v796_v34 = vcombine.high %v780_v18, %v780_v18  ;;  %v1129_v18 = vld [vmem:[#allocation8 + $0x58] sm:$0xff] }
 0x188   : > { %2154 = vpow2.f32 %v736_v45 }
 0x189   : > { %2156 = vpow2.f32 %v714_v39  ;;  %v822_v35 = vrot.slane %v794_v30, %v2751_v28  ;;  %v798_v41 = vcombine.high %v794_v30, %v794_v30  ;;  %v826_v42 = vrot.slane %v796_v34, %v2751_v28  ;;  %v1120_v30 = vld [vmem:[#allocation8 + $0x10] sm:$0xff] }
 0x18a   : > { %2158 = vpow2.f32 %v738_v46  ;;  %v1228_v34 = vld [vmem:[#allocation10 + $0x70] sm:$0xff] }
 0x18b   : > { %v830_v25 = vrot.slane %v798_v41, %v2751_v28  ;;  %v2810_v28 = vld [vmem:[#allocation11 + $0x10] sm:$0xff] }
 0x18c   : > { %1855 = vmatpush3.msra.mxu1 %v2810_v28 }
 0x18d   : > { %1856 = vmatprep.subr.mxu1 %v2414_v0 }
 0x18e   : > { %1857 = vmatpush3.msra.mxu1 %v2812_v53 }
 0x18f   : > { %v2143_v52 = vpop.eup %2142  ;;  %1858 = vmatprep.subr.mxu1 %v2414_v0 }
 0x190   : > { %v2145_v55 = vpop.eup %2144  ;;  %v839_v56 = vmul.f32 %v2143_v52, %v802_v49 }
 0x191   : > { %v2147_v57 = vpop.eup %2146  ;;  %v741_v58 = vadd.f32 %v2145_v55, %v2143_v52  ;;  %v840_v60 = vmul.f32 %v2145_v55, %v806_v51  ;;  %v1610_v55 = vld [vmem:[%s3000_s7] ss:$0 sm:$0xff] }
 0x192   : > { %v841_v62 = vmul.f32 %v2147_v57, %v810_v54  ;;  %v2149_v4 = vpop.eup %2148  ;;  %v2817_v54 = vld [vmem:[#allocation11] sm:$0xff] }
 0x193   : > { %v847_v63 = vadd.f32 %v840_v60, %v839_v56  ;;  %v742_v1 = vadd.f32 %v2147_v57, %v741_v58  ;;  %v2151_v21 = vpop.eup %2150  ;;  %v842_v24 = vmul.f32 %v2149_v4, %v814_v61  ;;  %1859 = vmatpush3.msra.mxu1 %v2817_v54  ;;  %v1133_v60 = vld [vmem:[#allocation8 + $0x78] sm:$0xff]  ;;  %v1132_v61 = vld [vmem:[#allocation8 + $0x70] sm:$0xff] }
 0x194   : > { %v2153_v27 = vpop.eup %2152  ;;  %v843_v36 = vmul.f32 %v2151_v21, %v818_v23  ;;  %1898 = vmatprep.subr.mxu1 %v2414_v0  ;;  %v1125_v23 = vld [vmem:[#allocation8 + $0x38] sm:$0xff] }
 0x195   : > { %v848_v19 = vadd.f32 %v847_v63, %v841_v62  ;;  %v743_v20 = vadd.f32 %v2149_v4, %v742_v1  ;;  %v2155_v29 = vpop.eup %2154  ;;  %v844_v43 = vmul.f32 %v2153_v27, %v822_v35  ;;  %v1131_v62 = vld [vmem:[#allocation8 + $0x68] sm:$0xff]  ;;  %v1130_v63 = vld [vmem:[#allocation8 + $0x60] sm:$0xff] }
 0x196   : > { %v2157_v33 = vpop.eup %2156  ;;  %v845_v46 = vmul.f32 %v2155_v29, %v826_v42  ;;  %v1227_v35 = vld [vmem:[#allocation10 + $0x68] sm:$0xff]  ;;  %v1612_v42 = vld [vmem:[%s3000_s7 + $0x4] ss:$0 sm:$0xff] }
 0x197   : > { %v744_v26 = vadd.f32 %v2151_v21, %v743_v20  ;;  %v849_v31 = vadd.f32 %v848_v19, %v842_v24  ;;  %v2159_v17 = vpop.eup %2158  ;;  %v740_v40 = vmul.f32 0.0, %v2157_v33  ;;  %v1128_v19 = vld [vmem:[#allocation8 + $0x50] sm:$0xff]  ;;  %v1127_v20 = vld [vmem:[#allocation8 + $0x48] sm:$0xff]  ;;  %v1126_v21 = vld [vmem:[#allocation8 + $0x40] sm:$0xff] }
 0x198   : > { %v846_v48 = vmul.f32 %v2159_v17, %v830_v25  ;;  %v1124_v24 = vld [vmem:[#allocation8 + $0x30] sm:$0xff]  ;;  %v1229_v33 = vld [vmem:[#allocation10 + $0x78] sm:$0xff] }
 0x199   : > { %v745_v32 = vadd.f32 %v2153_v27, %v744_v26  ;;  %v850_v38 = vadd.f32 %v849_v31, %v843_v36  ;;  %v1123_v26 = vld [vmem:[#allocation8 + $0x28] sm:$0xff]  ;;  %v1122_v27 = vld [vmem:[#allocation8 + $0x20] sm:$0xff]  ;;  %v1224_v25 = vld [vmem:[#allocation10 + $0x50] sm:$0xff] }
 0x19a   : > { %v1119_v31 = vld [vmem:[#allocation8 + $0x8] sm:$0xff]  ;;  %v1226_v36 = vld [vmem:[#allocation10 + $0x60] sm:$0xff] }
 0x19b   : > { %v746_v37 = vadd.f32 %v2155_v29, %v745_v32  ;;  %v851_v39 = vadd.f32 %v850_v38, %v844_v43  ;;  %v1121_v29 = vld [vmem:[#allocation8 + $0x18] sm:$0xff]  ;;  %v1118_v32 = vld [vmem:[#allocation8] sm:$0xff] }
 0x19d   : > { %v747_v22 = vadd.f32 %v2159_v17, %v746_v37  ;;  %v852_v47 = vadd.f32 %v851_v39, %v845_v46  ;;  %v1225_v39 = vld [vmem:[#allocation10 + $0x58] sm:$0xff]  ;;  %v1223_v46 = vld [vmem:[#allocation10 + $0x48] sm:$0xff] }
 0x19f   : > { %v748_v45 = vadd.f32 %v747_v22, %v740_v40  ;;  %v853_v49 = vadd.f32 %v852_v47, %v846_v48  ;;  %v1611_v22 = vld [vmem:[%s3000_s7 + $0x3] ss:$0 sm:$0xff]  ;;  %v1222_v47 = vld [vmem:[#allocation10 + $0x40] sm:$0xff]  ;;  %v1221_v48 = vld [vmem:[#allocation10 + $0x38] sm:$0xff] }
 0x1a1   : > { %2160 = vrcp.f32 %v748_v45  ;;  %v854_v50 = vadd.f32 %v853_v49, %v740_v40  ;;  %v1220_v49 = vld [vmem:[#allocation10 + $0x30] sm:$0xff] }
 0x1ae   : > { %v2161_v51 = vpop.eup %2160 }
 0x1af   : > { %v856_v52 = vmul.f32 %v2161_v51, %v854_v50  ;;  %v1219_v50 = vld [vmem:[#allocation10 + $0x28] sm:$0xff]  ;;  %v1218_v51 = vld [vmem:[#allocation10 + $0x20] sm:$0xff] }
 0x1b1   : > { %1826 = vmatmul.mubr.f32.vlgmr.msra.gmra.mxu0 %v856_v52  ;;  %v1217_v52 = vld [vmem:[#allocation10 + $0x18] sm:$0xff] }
 0x1b2   : > { %1864 = vmatpush3.msra.mxu0 %v2691_v2  ;;  %1895 = vmatprep.mubr.msk.f32.mxu0 %vm2415_vm0, %v2414_v0 }
 0x1b3   : > { %1865 = vmatprep.subr.mxu0 %v2414_v0 }
 0x1b4   : > { %1866 = vmatpush3.msra.mxu0 %v2693_v3 }
 0x1b5   : > { %1867 = vmatprep.subr.mxu0 %v2414_v0 }
 0x1b6   : > { %1868 = vmatpush3.msra.mxu0 %v2698_v5 }
 0x1b7   : > { %1869 = vmatprep.subr.mxu0 %v2414_v0 }
 0x1b8   : > { %1870 = vmatpush3.msra.mxu0 %v2703_v6 }
 0x1b9   : > { %1871 = vmatprep.subr.mxu0 %v2414_v0 }
 0x1ba   : > { %1872 = vmatpush3.msra.mxu0 %v2707_v7 }
 0x1bb   : > { %1873 = vmatprep.subr.mxu0 %v2414_v0 }
 0x1bc   : > { %1874 = vmatpush3.msra.mxu0 %v2712_v8 }
 0x1bd   : > { %1875 = vmatprep.subr.mxu0 %v2414_v0 }
 0x1be   : > { %1876 = vmatpush3.msra.mxu0 %v2716_v9 }
 0x1bf   : > { %1877 = vmatprep.subr.mxu0 %v2414_v0 }
 0x1c0   : > { %1878 = vmatpush3.msra.mxu0 %v2720_v10 }
 0x1c1   : > { %1879 = vmatprep.subr.mxu0 %v2414_v0 }
 0x1c2   : > { %1880 = vmatpush3.msra.mxu0 %v2724_v11 }
 0x1c3   : > { %1881 = vmatprep.subr.mxu0 %v2414_v0 }
 0x1c4   : > { %1882 = vmatpush3.msra.mxu0 %v2728_v12 }
 0x1c5   : > { %1883 = vmatprep.subr.mxu0 %v2414_v0 }
 0x1c6   : > { %1884 = vmatpush3.msra.mxu0 %v2732_v13 }
 0x1c7   : > { %1885 = vmatprep.subr.mxu0 %v2414_v0 }
 0x1c8   : > { %1886 = vmatpush3.msra.mxu0 %v2736_v14 }
 0x1c9   : > { %1887 = vmatprep.subr.mxu0 %v2414_v0 }
 0x1ca   : > { %1888 = vmatpush3.msra.mxu0 %v2740_v15 }
 0x1cb   : > { %1889 = vmatprep.subr.mxu0 %v2414_v0 }
 0x1cc   : > { %1890 = vmatpush3.msra.mxu0 %v2810_v28 }
 0x1cd   : > { %1891 = vmatprep.subr.mxu0 %v2414_v0 }
 0x1ce   : > { %1892 = vmatpush3.msra.mxu0 %v2812_v53 }
 0x1cf   : > { %1893 = vmatprep.subr.mxu0 %v2414_v0 }
 0x1d0   : > { %1894 = vmatpush3.msra.mxu0 %v2817_v54 }
 0x1d1   : > { %1933 = vmatprep.subr.mxu0 %v2414_v0 }
 0x271   : > { %v943_v56 = vpop.f32.mrf.mxu0 }
 0x272   : > { %v944_v57 = vadd.f32 %v1610_v55, %v943_v56  ;;  %v1216_v55 = vld [vmem:[#allocation10 + $0x10] sm:$0xff]  ;;  %v1215_v56 = vld [vmem:[#allocation10 + $0x8] sm:$0xff] }
 0x273   : > { %v1827_v58 = vpop.f32.mrf.mxu0 }
 0x274   : > { %v963_v59 = vadd.f32 %v944_v57, %v2662_v44  ;;  %v1214_v57 = vld [vmem:[#allocation10] sm:$0xff]  ;;  %v1613_v58 = vld [vmem:[%s3000_s7 + $0x1] ss:$0 sm:$0xff] }
 0x276   : > { %1861 = vmatmul.mubr.f32.vlgmr.msra.gmra.mxu1 %v963_v59 }
 0x277   : > { %1930 = vmatprep.mubr.msk.f32.mxu1 %vm2415_vm0, %v2414_v0  ;;  %1899 = vmatpush3.msra.mxu1 %v1133_v60 }
 0x278   : > { %1900 = vmatprep.subr.mxu1 %v2414_v0 }
 0x279   : > { %1901 = vmatpush3.msra.mxu1 %v1132_v61 }
 0x27a   : > { %1902 = vmatprep.subr.mxu1 %v2414_v0 }
 0x27b   : > { %1903 = vmatpush3.msra.mxu1 %v1131_v62 }
 0x27c   : > { %1904 = vmatprep.subr.mxu1 %v2414_v0 }
 0x27d   : > { %1905 = vmatpush3.msra.mxu1 %v1130_v63 }
 0x27e   : > { %1906 = vmatprep.subr.mxu1 %v2414_v0 }
 0x27f   : > { %1907 = vmatpush3.msra.mxu1 %v1129_v18 }
 0x280   : > { %1908 = vmatprep.subr.mxu1 %v2414_v0 }
 0x281   : > { %1909 = vmatpush3.msra.mxu1 %v1128_v19 }
 0x282   : > { %1910 = vmatprep.subr.mxu1 %v2414_v0 }
 0x283   : > { %1911 = vmatpush3.msra.mxu1 %v1127_v20 }
 0x284   : > { %1912 = vmatprep.subr.mxu1 %v2414_v0 }
 0x285   : > { %1913 = vmatpush3.msra.mxu1 %v1126_v21 }
 0x286   : > { %1914 = vmatprep.subr.mxu1 %v2414_v0 }
 0x287   : > { %1915 = vmatpush3.msra.mxu1 %v1125_v23 }
 0x288   : > { %1916 = vmatprep.subr.mxu1 %v2414_v0 }
 0x289   : > { %1917 = vmatpush3.msra.mxu1 %v1124_v24 }
 0x28a   : > { %1918 = vmatprep.subr.mxu1 %v2414_v0 }
 0x28b   : > { %1919 = vmatpush3.msra.mxu1 %v1123_v26 }
 0x28c   : > { %1920 = vmatprep.subr.mxu1 %v2414_v0 }
 0x28d   : > { %1921 = vmatpush3.msra.mxu1 %v1122_v27 }
 0x28e   : > { %1922 = vmatprep.subr.mxu1 %v2414_v0 }
 0x28f   : > { %1923 = vmatpush3.msra.mxu1 %v1121_v29 }
 0x290   : > { %1924 = vmatprep.subr.mxu1 %v2414_v0 }
 0x291   : > { %1925 = vmatpush3.msra.mxu1 %v1120_v30 }
 0x292   : > { %1926 = vmatprep.subr.mxu1 %v2414_v0 }
 0x293   : > { %1927 = vmatpush3.msra.mxu1 %v1119_v31 }
 0x294   : > { %1928 = vmatprep.subr.mxu1 %v2414_v0 }
 0x295   : > { %1929 = vmatpush3.msra.mxu1 %v1118_v32 }
 0x296   : > { %1968 = vmatprep.subr.mxu1 %v2414_v0 }
 0x336   : > { %v1030_v44 = vpop.f32.mrf.mxu1 }
 0x337   : > { %v1034_v1 = vsub.f32 %v963_v59, %v1030_v44 }
 0x338   : > { %v1862_v4 = vpop.f32.mrf.mxu1 }
 0x339   : > { %v1035_v16 = vmul.f32 %v1034_v1, %v1034_v1 }
 0x33b   : > { %1896 = vmatmul.mubr.f32.vlgmr.msra.gmra.mxu0 %v1035_v16 }
 0x33c   : > { %1965 = vmatprep.mubr.msk.f32.mxu0 %vm2415_vm0, %v2414_v0  ;;  %1934 = vmatpush3.msra.mxu0 %v1229_v33 }
 0x33d   : > { %1935 = vmatprep.subr.mxu0 %v2414_v0 }
 0x33e   : > { %1936 = vmatpush3.msra.mxu0 %v1228_v34 }
 0x33f   : > { %1937 = vmatprep.subr.mxu0 %v2414_v0 }
 0x340   : > { %1938 = vmatpush3.msra.mxu0 %v1227_v35 }
 0x341   : > { %1939 = vmatprep.subr.mxu0 %v2414_v0 }
 0x342   : > { %1940 = vmatpush3.msra.mxu0 %v1226_v36 }
 0x343   : > { %1941 = vmatprep.subr.mxu0 %v2414_v0 }
 0x344   : > { %1942 = vmatpush3.msra.mxu0 %v1225_v39 }
 0x345   : > { %1943 = vmatprep.subr.mxu0 %v2414_v0 }
 0x346   : > { %1944 = vmatpush3.msra.mxu0 %v1224_v25 }
 0x347   : > { %1945 = vmatprep.subr.mxu0 %v2414_v0 }
 0x348   : > { %1946 = vmatpush3.msra.mxu0 %v1223_v46 }
 0x349   : > { %1947 = vmatprep.subr.mxu0 %v2414_v0 }
 0x34a   : > { %1948 = vmatpush3.msra.mxu0 %v1222_v47 }
 0x34b   : > { %1949 = vmatprep.subr.mxu0 %v2414_v0 }
 0x34c   : > { %1950 = vmatpush3.msra.mxu0 %v1221_v48 }
 0x34d   : > { %1951 = vmatprep.subr.mxu0 %v2414_v0 }
 0x34e   : > { %1952 = vmatpush3.msra.mxu0 %v1220_v49 }
 0x34f   : > { %1953 = vmatprep.subr.mxu0 %v2414_v0 }
 0x350   : > { %1954 = vmatpush3.msra.mxu0 %v1219_v50 }
 0x351   : > { %1955 = vmatprep.subr.mxu0 %v2414_v0 }
 0x352   : > { %1956 = vmatpush3.msra.mxu0 %v1218_v51 }
 0x353   : > { %1957 = vmatprep.subr.mxu0 %v2414_v0 }
 0x354   : > { %1958 = vmatpush3.msra.mxu0 %v1217_v52 }
 0x355   : > { %1959 = vmatprep.subr.mxu0 %v2414_v0 }
 0x356   : > { %1960 = vmatpush3.msra.mxu0 %v1216_v55 }
 0x357   : > { %1961 = vmatprep.subr.mxu0 %v2414_v0 }
 0x358   : > { %1962 = vmatpush3.msra.mxu0 %v1215_v56 }
 0x359   : > { %1963 = vmatprep.subr.mxu0 %v2414_v0 }
 0x35a   : > { %1964 = vmatpush3.msra.mxu0 %v1214_v57 }
 0x35b   : > { %2003 = vmatprep.subr.mxu0 %v2414_v0 }
 0x3fb   : > { %v1102_v37 = vpop.f32.mrf.mxu0 }
 0x3fc   : > { %v1103_v17 = vadd.f32 1e-05, %v1102_v37 }
 0x3fd   : > { %v1897_v38 = vpop.f32.mrf.mxu0 }
 0x3fe   : > { %2162 = vrsqrt.f32 %v1103_v17 }
 0x40b   : > { %v2163_v40 = vpop.eup %2162 }
 0x40c   : > { %v1107_v41 = vmul.f32 %v2163_v40, %v1034_v1 }
 0x40e   : > { %v1112_v43 = vmul.f32 %v1611_v22, %v1107_v41 }
 0x410   : > { %v2862_v45 = vadd.f32 %v1612_v42, %v1112_v43 }
 0x412   : > { %1931 = vmatmul.mubr.f32.vlgmr.msra.gmra.mxu1 %v2862_v45 }
 0x413   : > { %1969 = vmatpush3.msra.mxu1 %v2691_v2  ;;  %2000 = vmatprep.mubr.msk.f32.mxu1 %vm2415_vm0, %v2414_v0 }
 0x414   : > { %1970 = vmatprep.subr.mxu1 %v2414_v0 }
 0x415   : > { %1971 = vmatpush3.msra.mxu1 %v2693_v3 }
 0x416   : > { %1972 = vmatprep.subr.mxu1 %v2414_v0 }
 0x417   : > { %1973 = vmatpush3.msra.mxu1 %v2698_v5 }
 0x418   : > { %1974 = vmatprep.subr.mxu1 %v2414_v0 }
 0x419   : > { %1975 = vmatpush3.msra.mxu1 %v2703_v6 }
 0x41a   : > { %1976 = vmatprep.subr.mxu1 %v2414_v0 }
 0x41b   : > { %1977 = vmatpush3.msra.mxu1 %v2707_v7 }
 0x41c   : > { %1978 = vmatprep.subr.mxu1 %v2414_v0 }
 0x41d   : > { %1979 = vmatpush3.msra.mxu1 %v2712_v8 }
 0x41e   : > { %1980 = vmatprep.subr.mxu1 %v2414_v0 }
 0x41f   : > { %1981 = vmatpush3.msra.mxu1 %v2716_v9 }
 0x420   : > { %1982 = vmatprep.subr.mxu1 %v2414_v0 }
 0x421   : > { %1983 = vmatpush3.msra.mxu1 %v2720_v10 }
 0x422   : > { %1984 = vmatprep.subr.mxu1 %v2414_v0 }
 0x423   : > { %1985 = vmatpush3.msra.mxu1 %v2724_v11 }
 0x424   : > { %1986 = vmatprep.subr.mxu1 %v2414_v0 }
 0x425   : > { %1987 = vmatpush3.msra.mxu1 %v2728_v12 }
 0x426   : > { %1988 = vmatprep.subr.mxu1 %v2414_v0 }
 0x427   : > { %1989 = vmatpush3.msra.mxu1 %v2732_v13 }
 0x428   : > { %1990 = vmatprep.subr.mxu1 %v2414_v0 }
 0x429   : > { %1991 = vmatpush3.msra.mxu1 %v2736_v14 }
 0x42a   : > { %1992 = vmatprep.subr.mxu1 %v2414_v0 }
 0x42b   : > { %1993 = vmatpush3.msra.mxu1 %v2740_v15 }
 0x42c   : > { %1994 = vmatprep.subr.mxu1 %v2414_v0 }
 0x42d   : > { %1995 = vmatpush3.msra.mxu1 %v2810_v28 }
 0x42e   : > { %1996 = vmatprep.subr.mxu1 %v2414_v0 }
 0x42f   : > { %1997 = vmatpush3.msra.mxu1 %v2812_v53 }
 0x430   : > { %1998 = vmatprep.subr.mxu1 %v2414_v0 }
 0x431   : > { %1999 = vmatpush3.msra.mxu1 %v2817_v54 }
 0x4d2   : > { %v1204_v59 = vpop.f32.mrf.mxu1 }
 0x4d3   : > { %v1205_v60 = vadd.f32 %v1613_v58, %v1204_v59 }
 0x4d4   : > { %v1932_v61 = vpop.f32.mrf.mxu1 }
 0x4d5   : > { %v1209_v62 = vmin.f32 %v1205_v60, 0.0  ;;  %vm1208_vm1 = vcmp.gt.f32.partialorder %v1205_v60, 0.0 }
 0x4d7   : > { %v1210_v63 = vmul.f32 1.442695, %v1209_v62 }
 0x4d9   : > { %2164 = vpow2.f32 %v1210_v63 }
 0x4e6   : > { %v2165_v44 = vpop.eup %2164 }
 0x4e7   : > { %v1614_v1 = vadd.f32 -1.0, %v2165_v44 }
 0x4e9   : > { %v1213_v4 = vsel %vm1208_vm1, %v1205_v60, %v1614_v1 }
 0x4ea   : > { %1966 = vmatmul.mubr.f32.vlgmr.msra.gmra.mxu0 %v1213_v4 }
 0x4eb   : > { %2004 = vmatpush3.msra.mxu0 %v2691_v2  ;;  %2035 = vmatprep.mubr.msk.f32.mxu0 %vm2415_vm0, %v2414_v0  ;;  %v1615_v2 = vld [vmem:[%s3000_s7 + $0x2] ss:$0 sm:$0xff] }
 0x4ec   : > { %2005 = vmatprep.subr.mxu0 %v2414_v0 }
 0x4ed   : > { %2006 = vmatpush3.msra.mxu0 %v2693_v3 }
 0x4ee   : > { %2007 = vmatprep.subr.mxu0 %v2414_v0 }
 0x4ef   : > { %2008 = vmatpush3.msra.mxu0 %v2698_v5 }
 0x4f0   : > { %2009 = vmatprep.subr.mxu0 %v2414_v0 }
 0x4f1   : > { %2010 = vmatpush3.msra.mxu0 %v2703_v6 }
 0x4f2   : > { %2011 = vmatprep.subr.mxu0 %v2414_v0 }
 0x4f3   : > { %2012 = vmatpush3.msra.mxu0 %v2707_v7 }
 0x4f4   : > { %2013 = vmatprep.subr.mxu0 %v2414_v0 }
 0x4f5   : > { %2014 = vmatpush3.msra.mxu0 %v2712_v8 }
 0x4f6   : > { %2015 = vmatprep.subr.mxu0 %v2414_v0 }
 0x4f7   : > { %2016 = vmatpush3.msra.mxu0 %v2716_v9 }
 0x4f8   : > { %2017 = vmatprep.subr.mxu0 %v2414_v0 }
 0x4f9   : > { %2018 = vmatpush3.msra.mxu0 %v2720_v10 }
 0x4fa   : > { %2019 = vmatprep.subr.mxu0 %v2414_v0 }
 0x4fb   : > { %2020 = vmatpush3.msra.mxu0 %v2724_v11 }
 0x4fc   : > { %2021 = vmatprep.subr.mxu0 %v2414_v0 }
 0x4fd   : > { %2022 = vmatpush3.msra.mxu0 %v2728_v12 }
 0x4fe   : > { %2023 = vmatprep.subr.mxu0 %v2414_v0 }
 0x4ff   : > { %2024 = vmatpush3.msra.mxu0 %v2732_v13 }
 0x500   : > { %2025 = vmatprep.subr.mxu0 %v2414_v0 }
 0x501   : > { %2026 = vmatpush3.msra.mxu0 %v2736_v14 }
 0x502   : > { %2027 = vmatprep.subr.mxu0 %v2414_v0 }
 0x503   : > { %2028 = vmatpush3.msra.mxu0 %v2740_v15  ;;  %v1616_v15 = vld [vmem:[%s3000_s7 + $0x5] ss:$0 sm:$0xff] }
 0x504   : > { %2029 = vmatprep.subr.mxu0 %v2414_v0 }
 0x505   : > { %2030 = vmatpush3.msra.mxu0 %v2810_v28 }
 0x506   : > { %2031 = vmatprep.subr.mxu0 %v2414_v0 }
 0x507   : > { %2032 = vmatpush3.msra.mxu0 %v2812_v53  ;;  %v1617_v53 = vld [vmem:[%s3000_s7 + $0x6] ss:$0 sm:$0xff] }
 0x508   : > { %2033 = vmatprep.subr.mxu0 %v2414_v0 }
 0x509   : > { %2034 = vmatpush3.msra.mxu0 %v2817_v54 }
 0x5aa   : > { %v1300_v3 = vpop.f32.mrf.mxu0 }
 0x5ab   : > { %v1301_v5 = vadd.f32 %v1615_v2, %v1300_v3 }
 0x5ac   : > { %v1967_v6 = vpop.f32.mrf.mxu0 }
 0x5ad   : > { %v1304_v7 = vadd.f32 %v1301_v5, %v2862_v45 }
 0x5af   : > { %2001 = vmatmul.mubr.f32.vlgmr.msra.gmra.mxu1 %v1304_v7 }
 0x66f   : > { %v1371_v8 = vpop.f32.mrf.mxu1 }
 0x670   : > { %v1375_v9 = vsub.f32 %v1304_v7, %v1371_v8 }
 0x671   : > { %v2002_v10 = vpop.f32.mrf.mxu1 }
 0x672   : > { %v1376_v11 = vmul.f32 %v1375_v9, %v1375_v9 }
 0x674   : > { %2036 = vmatmul.mubr.f32.vlgmr.msra.gmra.mxu0 %v1376_v11 }
 0x734   : > { %v1443_v0 = vpop.f32.mrf.mxu0 }
 0x735   : > { %v1444_v12 = vadd.f32 1e-05, %v1443_v0 }
 0x736   : > { %v2037_v13 = vpop.f32.mrf.mxu0 }
 0x737   : > { %2166 = vrsqrt.f32 %v1444_v12 }
 0x744   : > { %v2167_v14 = vpop.eup %2166 }
 0x745   : > { %v1448_v28 = vmul.f32 %v2167_v14, %v1375_v9 }
 0x747   : > { %v1453_v54 = vmul.f32 %v1616_v15, %v1448_v28 }
 0x749   : > { %v1458_v16 = vadd.f32 %v1617_v53, %v1453_v54 }
 0x74b   : > { %1459 = vst [vmem:[%s393_s14] sm:$0xff] %v1458_v16 }
 0x74c   : > { %2339 = shalt.err (!%p2336_p1)
}
 0x74d   : > { %s2340_s19 = scalar_lea.hbm %s1472_s17, 128  ;;  %s2344_s4 = scalar_lea.hbm %s3001_s8, 256 }
 0x74e   : > { %p2341_p3 = scmp.ne.s32.totalorder %s1472_s17, %s2340_s19  ;;  %p2345_p6 = scmp.lt.s32.totalorder %s1472_s17, %s3001_s8 }
 0x74f   : > { %p2346_p2 = scmp.lt.s32.totalorder %s2344_s4, %s2340_s19 }
 0x750   : > { %p2342_p4 = pnand %p2341_p3, %p3027_p11 }
 0x751   : > { %p2347_p7 = por %p2346_p2, %p2345_p6 }
 0x752   : > { %p2343_p12 = pneg %p2342_p4 }
 0x754   : > { %p2348_p8 = pnand %p2347_p7, %p2343_p12 }
 0x756   : > { %2351 = shalt.err (!%p2348_p8)
}
 0x757   : > { %2060 = dma.vmem_to_hbm [thread:$0]  (%p3027_p11), %s1475_s13, 128, %s1472_s17, %s1461_s24  }
 0x758 PF: > { %s1486_s9 = sand.u32 1, %s2390_s27   ;;  %p3028_p0 = scmp.ne.s32.totalorder %s3017_s21, 0 }
 0x759   : > { %p3029_p13 = scmp.ge.s32.totalorder %s2402_s30, 2  ;;  %s1487_s14 = scalar_lea.sflag [#allocation4], %s1486_s9 }
 0x75b   : > { %p2083_p5 = pnand %p3029_p13, %p3028_p0 }
 0x75d   : > { %p2084_p9 = pneg %p2083_p5 }
 0x75f   : > { %2385 = dma.done.wait (%p2084_p9), %s1487_s14, 128  }
 0x760   : > { %2387 = vsyncadd (%p2084_p9), %s1487_s14, 4294967168  ;;  %p24_p10 = scmp.ge.s32.totalorder %s2567_s18, 4   ;;  %s3030_s27 = smov %s2394_s28 }
 0x761   : > { %s3031_s28 = smov %s2398_s29  ;;  %s3032_s29 = smov %s2579_s15 }
 0x762   : > { %s3033_s30 = smov %s2567_s18  ;;  %26 = sbr.rel (!%p24_p10) target bundleno = 12 (0xc), region = 117 }
 0x767   :  { %1492 = vsyncpa [#allocation3], 1 }
 0x768   :  { %1494 = vsyncpa [#allocation3 + $0x1], 1 }
 0x769   :  { %1495 = vsyncpa [#allocation6], 1 }
 0x76a   :  { %1496 = vsyncpa [#allocation9], 1 }
 0x76b   :  { %1497 = vsyncpa [#allocation12], 1 }
 0x76c   :  { %1498 = vsyncpa [#allocation4], 1 }
 0x76d   :  { %1500 = vsyncpa [#allocation4 + $0x1], 1 }

// kernel: tpu_custom_call.1
= control target key start
LH: loop header
LB: loop body
LE: loop exit
PB: predicated region body
PF: predicated region fallthrough
CT: control target
= control target key end

     0   :  { %s2993_s0 = inlined_call_operand.hbm [shape: f32[8,256], index: 0, kind: input, shape index: {}]   ;;  %s2994_s1 = inlined_call_operand.hbm [shape: f32[128,384], index: 1, kind: input, shape index: {}]   ;;  %s2995_s2 = inlined_call_operand.vmem [shape: f32[1,384], index: 2, kind: input, shape index: {}]   ;;  %s2996_s3 = inlined_call_operand.hbm [shape: f32[128,128], index: 3, kind: input, shape index: {}]   ;;  %s2997_s4 = inlined_call_operand.hbm [shape: f32[128,128], index: 4, kind: input, shape index: {}]   ;;  %s2998_s5 = inlined_call_operand.hbm [shape: f32[128,128], index: 5, kind: input, shape index: {}]   ;;  %s2999_s6 = inlined_call_operand.hbm [shape: f32[128,128], index: 6, kind: input, shape index: {}]   ;;  %s3000_s7 = inlined_call_operand.vmem [shape: f32[8,128], index: 7, kind: input, shape index: {}]   ;;  %s3001_s8 = inlined_call_operand.hbm [shape: f32[8,256], index: 8, kind: output, shape index: {}]  }
   0x1   :  { %3006 = sst [smem:[#allocation19_spill]] %s2994_s1 }
   0x2   :  { %3007 = sst [smem:[#allocation20_spill]] %s2996_s3 }
   0x3   :  { %3008 = sst [smem:[#allocation21_spill]] %s2997_s4 }
   0x4   :  { %13 = vsyncpa [#allocation3], 0 }
   0x5   :  { %15 = vsyncpa [#allocation3 + $0x1], 0 }
   0x6   :  { %16 = vsyncpa [#allocation6], 0 }
   0x7   :  { %17 = vsyncpa [#allocation9], 0 }
   0x8   :  { %18 = vsyncpa [#allocation12], 0 }
   0x9   :  { %19 = vsyncpa [#allocation4], 0 }
   0xa   :  { %21 = vsyncpa [#allocation4 + $0x1], 0  ;;  %s2463_s27 = smov 0   ;;  %s2465_s28 = smov 0  }
   0xb   :  { %s2467_s29 = smov 0   ;;  %s2469_s30 = smov 0  }
   0xc LB: > { %s2404_s9 = smov [#allocation5]   ;;  %s2484_s11 = sadd.s32 4294967295, %s2402_s30   ;;  %s2402_s30 = sphi %s2469_s30, %s3033_s30   ;;  %s2398_s29 = sphi %s2467_s29, %s3032_s29   ;;  %s2394_s28 = sphi %s2465_s28, %s3031_s28   ;;  %s2390_s27 = sphi %s2463_s27, %s3030_s27  }
   0xd   : > { %s243_s10 = sshll.u32 %s2404_s9, 4  ;;  %p1593_p0 = scmp.ge.s32.totalorder %s2402_s30, 1  ;;  %s244_s10 = int_to_ptr.vmem [resolvable:$true] %s243_s10 }
   0xe   : > { %p3002_p1 = scmp.eq.s32.totalorder %s2484_s11, 0  ;;  %p231_p2 = scmp.lt.s32.totalorder %s2402_s30, 3 }
   0xf   : > { %s2405_s14 = smov [#allocation8]   ;;  %s2406_s16 = smov [#allocation7]  }
  0x10   : > { %p2489_p3 = pnand %p1593_p0, %p231_p2  ;;  %s272_s15 = sshll.u32 %s2405_s14, 4  ;;  %s2502_s15 = int_to_ptr.vmem [resolvable:$true] %s272_s15 }
  0x11   : > { %s2504_s17 = sshll.u32 %s2406_s16, 4  ;;  %s2179_s19 = scalar_lea.vmem %s244_s10, 6144  ;;  %s260_s17 = int_to_ptr.vmem [resolvable:$true] %s2504_s17 }
  0x12   : > { %s3009_s12 = scalar_select %p2489_p3, 1, 0 }
  0x13   : > { %p2062_p5 = pneg %p2489_p3  ;;  %p2180_p8 = scmp.ne.s32.totalorder %s244_s10, %s2179_s19 }
  0x14   : > { %p2187_p11 = scmp.lt.s32.totalorder %s244_s10, %s244_s10  ;;  %p2188_p12 = scmp.lt.s32.totalorder %s2179_s19, %s2179_s19 }
  0x15   : > { %p2498_p6 = pnand %p2062_p5, %p3002_p1 }
  0x16   : > { %p2189_p13 = por %p2188_p12, %p2187_p11 }
  0x17   : > { %p2508_p7 = pneg %p2498_p6 }
  0x19   : > { %p2182_p9 = pnand %p2180_p8, %p2508_p7 }
  0x1b   : > { %p2183_p10 = pneg %p2182_p9 }
  0x1d   : > { %p2190_p0 = pnand %p2189_p13, %p2183_p10 }
  0x1f   : > { %2193 = shalt.err (!%p2190_p0)
}
  0x20   : > { %s2407_s20 = smov 384   ;;  %s2408_s21 = smov 24  }
  0x21   : > { %s3012_s1 = sld [smem:[#allocation19_spill]]  ;;  %s2205_s24 = scalar_lea.vmem %s2502_s15, 2048 }
  0x22   : > { %p2206_p2 = scmp.ne.s32.totalorder %s2502_s15, %s2205_s24  ;;  %p2213_p9 = scmp.lt.s32.totalorder %s2502_s15, %s2502_s15 }
  0x23   : > { %p2214_p10 = scmp.lt.s32.totalorder %s2205_s24, %s2205_s24 }
  0x24   : > { %p2208_p5 = pnand %p2206_p2, %p2508_p7 }
  0x25   : > { %p2215_p11 = por %p2214_p10, %p2213_p9 }
  0x26   : > { %p2209_p8 = pneg %p2208_p5 }
  0x27   : > { %2065 = dma.hbm_to_vmem [thread:$0]  (!%p2498_p6), %s3012_s1, 6144, %s244_s10, [#allocation6], %s2407_s20, %s2407_s20, %s2408_s21  }
  0x28   : > { %p2216_p12 = pnand %p2215_p11, %p2209_p8 }
  0x2a   : > { %2219 = shalt.err (!%p2216_p12)
}
  0x2b   : > { %s2409_s25 = smov 128   ;;  %s2410_s26 = smov 8  }
  0x2c   : > { %s3013_s4 = sld [smem:[#allocation21_spill]]  ;;  %s2231_s14 = scalar_lea.vmem %s260_s17, 2048 }
  0x2d   : > { %p2232_p13 = scmp.ne.s32.totalorder %s260_s17, %s2231_s14  ;;  %p2239_p5 = scmp.lt.s32.totalorder %s260_s17, %s260_s17 }
  0x2e   : > { %p2240_p8 = scmp.lt.s32.totalorder %s2231_s14, %s2231_s14 }
  0x2f   : > { %p2234_p0 = pnand %p2232_p13, %p2508_p7 }
  0x30   : > { %p2241_p9 = por %p2240_p8, %p2239_p5 }
  0x31   : > { %p2235_p2 = pneg %p2234_p0 }
  0x32   : > { %2071 = dma.hbm_to_vmem [thread:$0]  (!%p2498_p6), %s3013_s4, 2048, %s2502_s15, [#allocation9], %s2409_s25, %s2409_s25, %s2410_s26  }
  0x33   : > { %p2242_p10 = pnand %p2241_p9, %p2235_p2 }
  0x35   : > { %2245 = shalt.err (!%p2242_p10)
}
  0x36   : > { %s3014_s3 = sld [smem:[#allocation20_spill]]  ;;  %s2411_s15 = smov [#allocation10]  }
  0x37   : > { %s285_s20 = sshll.u32 %s2411_s15, 4  ;;  %s2412_s21 = smov [#allocation11]   ;;  %s286_s20 = int_to_ptr.vmem [resolvable:$true] %s285_s20 }
  0x38   : > { %s298_s22 = sshll.u32 %s2412_s21, 4  ;;  %s2257_s23 = scalar_lea.vmem %s286_s20, 2048  ;;  %s299_s22 = int_to_ptr.vmem [resolvable:$true] %s298_s22 }
  0x39   : > { %p2258_p11 = scmp.ne.s32.totalorder %s286_s20, %s2257_s23  ;;  %p2265_p0 = scmp.lt.s32.totalorder %s286_s20, %s286_s20 }
  0x3a   : > { %p2266_p2 = scmp.lt.s32.totalorder %s2257_s23, %s2257_s23 }
  0x3b   : > { %p2260_p12 = pnand %p2258_p11, %p2508_p7 }
  0x3c   : > { %2068 = dma.hbm_to_vmem [thread:$0]  (!%p2498_p6), %s3014_s3, 2048, %s260_s17, [#allocation6], %s2409_s25, %s2409_s25, %s2410_s26  }
  0x3d   : > { %p2261_p13 = pneg %p2260_p12  ;;  %p2267_p5 = por %p2266_p2, %p2265_p0 }
  0x3f   : > { %p2268_p8 = pnand %p2267_p5, %p2261_p13 }
  0x41   : > { %2271 = shalt.err (!%p2268_p8)
}
  0x42   : > { %2074 = dma.hbm_to_vmem [thread:$0]  (!%p2498_p6), %s2998_s5, 2048, %s286_s20, [#allocation9], %s2409_s25, %s2409_s25, %s2410_s26  }
  0x43   : > { %s2283_s9 = scalar_lea.vmem %s299_s22, 2048  ;;  %p2291_p12 = scmp.lt.s32.totalorder %s299_s22, %s299_s22 }
  0x44   : > { %p2284_p9 = scmp.ne.s32.totalorder %s299_s22, %s2283_s9  ;;  %p2292_p0 = scmp.lt.s32.totalorder %s2283_s9, %s2283_s9 }
  0x46   : > { %p2286_p10 = pnand %p2284_p9, %p2508_p7  ;;  %p2293_p13 = por %p2292_p0, %p2291_p12 }
  0x48   : > { %p2287_p11 = pneg %p2286_p10 }
  0x4a   : > { %p2294_p2 = pnand %p2293_p13, %p2287_p11 }
  0x4c   : > { %2297 = shalt.err (!%p2294_p2)
}
  0x4d   : > { %2077 = dma.hbm_to_vmem [thread:$0]  (!%p2498_p6), %s2999_s6, 2048, %s299_s22, [#allocation12], %s2409_s25, %s2409_s25, %s2410_s26  }
  0x4e   : > { %s1592_s13 = sadd.s32 4294967294, %s2402_s30   ;;  %s2567_s18 = sadd.s32 1, %s2402_s30  }
  0x4f   : > { %s34_s16 = sadd.s32 1, %s2398_s29  ;;  %s31_s19 = ssub.s32 %s2402_s30, %s2567_s18 }
  0x50   : > { %p41_p7 = scmp.ne.s32.totalorder %s2398_s29, %s2394_s28  ;;  %p32_p5 = scmp.eq.s32.totalorder %s31_s19, 0 }
  0x51   : > { %p42_p8 = scmp.eq.s32.totalorder %s2402_s30, 0  ;;  %p47_p9 = scmp.ne.s32.totalorder %s2394_s28, %s2390_s27 }
  0x52   : > { %p218_p10 = scmp.eq.s32.totalorder %s2484_s11, 1  ;;  %p224_p0 = scmp.eq.s32.totalorder %s1592_s13, 1 }
  0x53   : > { %s2579_s15 = scalar_select %p32_p5, %s2398_s29, %s34_s16  }
  0x54   : > { %p43_p11 = por %p42_p8, %p41_p7  ;;  %p2583_p12 = por %p3002_p1, %p47_p9 }
  0x55   : > { %p2587_p6 = por %p218_p10, %p41_p7  ;;  %p2091_p13 = scmp.lt.s32.totalorder %s2402_s30, 2 }
  0x56   : > { %s3015_s20 = scalar_select %p2583_p12, 1, 0 }
  0x57   : > { %s3016_s25 = scalar_select %p2587_p6, 1, 0 }
  0x58   : > { %s315_s26 = sand.u32 1, %s2398_s29   ;;  %p2593_p2 = por %p224_p0, %p47_p9 }
  0x59   : > { %s1600_s22 = sshll.u32 %s315_s26, 3  ;;  %s1601_s23 = sshll.u32 %s2402_s30, 7 }
  0x5a   : > { %s3017_s21 = scalar_select %p2593_p2, 1, 0 }
  0x5b   : > { %s2601_s9 = scalar_lea.hbm %s2993_s0, %s1601_s23  ;;  %s319_s10 = scalar_lea.vmem [#allocation2], %s1600_s22 }
  0x5c   : > { %s326_s14 = sshll.u32 %s319_s10, 4  ;;  %p2603_p7 = pnand %p2091_p13, %p43_p11  ;;  %s327_s14 = int_to_ptr.vmem [resolvable:$true] %s326_s14 }
  0x5d   : > { %s316_s16 = scalar_lea.sflag [#allocation3], %s315_s26  ;;  %s2298_s19 = scalar_lea.hbm %s2601_s9, 128 }
  0x5e   : > { %p2299_p5 = scmp.ne.s32.totalorder %s2601_s9, %s2298_s19  ;;  %p2300_p8 = pneg %p2603_p7 }
  0x5f   : > { %s2303_s24 = scalar_lea.hbm %s2993_s0, 256  ;;  %p2304_p11 = scmp.lt.s32.totalorder %s2601_s9, %s2993_s0 }
  0x60   : > { %p2301_p9 = pnand %p2300_p8, %p2299_p5  ;;  %p2305_p0 = scmp.lt.s32.totalorder %s2303_s24, %s2298_s19 }
  0x62   : > { %p2302_p10 = pneg %p2301_p9  ;;  %p2306_p13 = por %p2305_p0, %p2304_p11 }
  0x64   : > { %p2307_p4 = pnand %p2306_p13, %p2302_p10 }
  0x66   : > { %2310 = shalt.err (!%p2307_p4)
}
  0x67   : > { %s2311_s10 = scalar_lea.vmem %s327_s14, 128  ;;  %s2413_s26 = smov [#allocation2]  }
  0x68   : > { %p2312_p1 = scmp.ne.s32.totalorder %s327_s14, %s2311_s10  ;;  %s2316_s3 = sshll.u32 %s2413_s26, 4  ;;  %s2317_s3 = int_to_ptr.vmem [resolvable:$false] %s2316_s3 }
  0x69   : > { %s2318_s4 = scalar_lea.vmem %s2317_s3, 256  ;;  %p2319_p5 = scmp.lt.s32.totalorder %s327_s14, %s2317_s3 }
  0x6a   : > { %p2314_p2 = pnand %p2312_p1, %p2300_p8  ;;  %p2320_p9 = scmp.lt.s32.totalorder %s2318_s4, %s2311_s10 }
  0x6c   : > { %p2315_p6 = pneg %p2314_p2  ;;  %p2321_p12 = por %p2320_p9, %p2319_p5 }
  0x6e   : > { %p2322_p3 = pnand %p2321_p12, %p2315_p6 }
  0x70   : > { %2325 = shalt.err (!%p2322_p3)
}
  0x71   : > { %2081 = dma.hbm_to_vmem [thread:$0]  (!%p2603_p7), %s2601_s9, 128, %s327_s14, %s316_s16  }
  0x72   : > { %p3019_p10 = scmp.ne.s32.totalorder %s3009_s12, 0 }
  0x73   : > { %s2624_s1 = sand.u32 (!%p3019_p10), 1, %s2394_s28   ;;  %p3020_p1 = scmp.ne.s32.totalorder (!%p3019_p10), %s3015_s20, 0 }
  0x74   : > { %335 = sbr.rel (%p3019_p10) target bundleno = 1880 (0x758), region = 52  ;;  %s1603_s19 = sshll.u32 (!%p3019_p10), %s2624_s1, 3 }
  0x75   : > { %s338_s3 = scalar_lea.sflag (!%p3019_p10), [#allocation3], %s2624_s1  ;;  %s2630_s4 = scalar_lea.vmem (!%p3019_p10), [#allocation2], %s1603_s19 }
  0x79   : > { %2369 = dma.done.wait (%p3020_p1), %s338_s3, 128  }
  0x7a   : > { %2371 = vsyncadd (%p3020_p1), %s338_s3, 4294967168  ;;  %p3021_p3 = scmp.eq.s32.totalorder %s2484_s11, 0 }
  0x7c   : > { %2373 = dma.done.wait (%p3021_p3), [#allocation6], 8192   ;;  %p3022_p4 = pmov %p3021_p3 }
  0x7d   : > { %p3023_p12 = pmov %p3021_p3 }
  0x7e   : > { %2375 = vsyncadd (%p3022_p4), [#allocation6], 4294959104 }
  0x7f   : > { %2377 = dma.done.wait (%p3023_p12), [#allocation9], 4096   ;;  %p3024_p6 = pmov %p3021_p3 }
  0x80   : > { %p3025_p2 = pmov %p3021_p3 }
  0x81   : > { %2379 = vsyncadd (%p3024_p6), [#allocation9], 4294963200 }
  0x82   : > { %2381 = dma.done.wait (%p3025_p2), [#allocation12], 2048   ;;  %p3026_p7 = pmov %p3025_p2 }
  0x83   : > { %v2414_v0 = vmov 0.0   ;;  %vm2415_vm0 = vmmov 0   ;;  %v448_v1 = vld [vmem:[#allocation5 + $0x170] sm:$0xff]  ;;  %v447_v2 = vld [vmem:[#allocation5 + $0x168] sm:$0xff]  ;;  %v445_v3 = vld [vmem:[#allocation5 + $0x158] sm:$0xff]  ;;  %s1619_s9 = sshll.u32 %s2484_s11, 7 }
  0x84   : > { %2383 = vsyncadd (%p3026_p7), [#allocation12], 4294965248  ;;  %1758 = vmatprep.subr.mxu1 %v2414_v0  ;;  %531 = vmatprep.mubr.f32.mxu0 %v2414_v0  ;;  %v444_v4 = vld [vmem:[#allocation5 + $0x150] sm:$0xff]  ;;  %v442_v5 = vld [vmem:[#allocation5 + $0x140] sm:$0xff]  ;;  %s393_s14 = scalar_lea.vmem [#allocation13], %s1603_s19  ;;  %s1472_s17 = scalar_lea.hbm %s3001_s8, %s1619_s9 }
  0x85   : > { %1790 = vmatprep.mubr.msk.f32.mxu1 %vm2415_vm0, %v2414_v0  ;;  %467 = vmatprep.subr.mxu0 %v448_v1  ;;  %v441_v6 = vld [vmem:[#allocation5 + $0x138] sm:$0xff]  ;;  %v439_v7 = vld [vmem:[#allocation5 + $0x128] sm:$0xff]  ;;  %v438_v8 = vld [vmem:[#allocation5 + $0x120] sm:$0xff]  ;;  %s1474_s13 = sshll.u32 %s393_s14, 4  ;;  %s1461_s24 = scalar_lea.sflag [#allocation4], %s2624_s1  ;;  %s1475_s13 = int_to_ptr.vmem [resolvable:$true] %s1474_s13 }
  0x86   : > { %468 = vmatpush1.msra.mxu0 %v447_v2  ;;  %v436_v9 = vld [vmem:[#allocation5 + $0x110] sm:$0xff]  ;;  %v435_v10 = vld [vmem:[#allocation5 + $0x108] sm:$0xff]  ;;  %v433_v11 = vld [vmem:[#allocation5 + $0xf8] sm:$0xff]  ;;  %s2326_s22 = scalar_lea.vmem %s1475_s13, 128  ;;  %p3027_p11 = scmp.ne.s32.totalorder %s3016_s25, 0 }
  0x87   : > { %469 = vmatprep.subr.mxu0 %v445_v3  ;;  %v432_v12 = vld [vmem:[#allocation5 + $0xf0] sm:$0xff]  ;;  %v430_v13 = vld [vmem:[#allocation5 + $0xe0] sm:$0xff]  ;;  %v449_v14 = vld [vmem:[#allocation5 + $0x178] sm:$0xff]  ;;  %p2327_p8 = scmp.ne.s32.totalorder %s1475_s13, %s2326_s22  ;;  %s2417_s10 = smov [#allocation13]  }
  0x88   : > { %470 = vmatpush1.msra.mxu0 %v444_v4  ;;  %v429_v15 = vld [vmem:[#allocation5 + $0xd8] sm:$0xff]  ;;  %1759 = vmatpush3.msra.mxu1 %v449_v14  ;;  %v446_v16 = vld [vmem:[#allocation5 + $0x160] sm:$0xff]  ;;  %v427_v17 = vld [vmem:[#allocation5 + $0xc8] sm:$0xff]  ;;  %s2330_s26 = sshll.u32 %s2417_s10, 4  ;;  %s2331_s26 = int_to_ptr.vmem [resolvable:$false] %s2330_s26 }
  0x89   : > { %471 = vmatprep.subr.mxu0 %v442_v5  ;;  %1760 = vmatprep.subr.mxu1 %v2414_v0  ;;  %v443_v18 = vld [vmem:[#allocation5 + $0x148] sm:$0xff]  ;;  %v426_v19 = vld [vmem:[#allocation5 + $0xc0] sm:$0xff]  ;;  %v424_v20 = vld [vmem:[#allocation5 + $0xb0] sm:$0xff]  ;;  %p2328_p0 = pnand %p2327_p8, %p3027_p11  ;;  %s2332_s11 = scalar_lea.vmem %s2331_s26, 256 }
  0x8a   : > { %472 = vmatpush1.msra.mxu0 %v441_v6  ;;  %1761 = vmatpush3.msra.mxu1 %v446_v16  ;;  %v440_v21 = vld [vmem:[#allocation5 + $0x130] sm:$0xff]  ;;  %v423_v22 = vld [vmem:[#allocation5 + $0xa8] sm:$0xff]  ;;  %v421_v23 = vld [vmem:[#allocation5 + $0x98] sm:$0xff]  ;;  %v452_v16 = vlaneseq  ;;  %p2333_p5 = scmp.lt.s32.totalorder %s1475_s13, %s2331_s26  ;;  %p2334_p9 = scmp.lt.s32.totalorder %s2332_s11, %s2326_s22 }
  0x8b   : > { %473 = vmatprep.subr.mxu0 %v439_v7  ;;  %1762 = vmatprep.subr.mxu1 %v2414_v0  ;;  %v437_v24 = vld [vmem:[#allocation5 + $0x118] sm:$0xff]  ;;  %v420_v25 = vld [vmem:[#allocation5 + $0x90] sm:$0xff]  ;;  %v418_v26 = vld [vmem:[#allocation5 + $0x80] sm:$0xff]  ;;  %p2329_p13 = pneg %p2328_p0 }
  0x8c   : > { %474 = vmatpush1.msra.mxu0 %v438_v8  ;;  %1763 = vmatpush3.msra.mxu1 %v443_v18  ;;  %v434_v27 = vld [vmem:[#allocation5 + $0x100] sm:$0xff]  ;;  %v417_v28 = vld [vmem:[#allocation5 + $0x78] sm:$0xff]  ;;  %v415_v29 = vld [vmem:[#allocation5 + $0x68] sm:$0xff]  ;;  %v2416_v18 = vmov 1966171168   ;;  %p2335_p10 = por %p2334_p9, %p2333_p5 }
  0x8d   : > { %475 = vmatprep.subr.mxu0 %v436_v9  ;;  %1764 = vmatprep.subr.mxu1 %v2414_v0  ;;  %v431_v30 = vld [vmem:[#allocation5 + $0xe8] sm:$0xff]  ;;  %v414_v31 = vld [vmem:[#allocation5 + $0x60] sm:$0xff]  ;;  %v412_v32 = vld [vmem:[#allocation5 + $0x50] sm:$0xff] }
  0x8e   : > { %476 = vmatpush1.msra.mxu0 %v435_v10  ;;  %1765 = vmatpush3.msra.mxu1 %v440_v21  ;;  %v428_v33 = vld [vmem:[#allocation5 + $0xd0] sm:$0xff]  ;;  %v411_v34 = vld [vmem:[#allocation5 + $0x48] sm:$0xff]  ;;  %v409_v35 = vld [vmem:[#allocation5 + $0x38] sm:$0xff]  ;;  %p2336_p1 = pnand %p2335_p10, %p2329_p13 }
  0x8f   : > { %477 = vmatprep.subr.mxu0 %v433_v11  ;;  %1766 = vmatprep.subr.mxu1 %v2414_v0  ;;  %v425_v36 = vld [vmem:[#allocation5 + $0xb8] sm:$0xff]  ;;  %v408_v37 = vld [vmem:[#allocation5 + $0x30] sm:$0xff]  ;;  %v406_v38 = vld [vmem:[#allocation5 + $0x20] sm:$0xff] }
  0x90   : > { %478 = vmatpush1.msra.mxu0 %v432_v12  ;;  %1767 = vmatpush3.msra.mxu1 %v437_v24  ;;  %v422_v39 = vld [vmem:[#allocation5 + $0xa0] sm:$0xff]  ;;  %v405_v40 = vld [vmem:[#allocation5 + $0x18] sm:$0xff]  ;;  %v403_v41 = vld [vmem:[#allocation5 + $0x8] sm:$0xff] }
  0x91   : > { %479 = vmatprep.subr.mxu0 %v430_v13  ;;  %1768 = vmatprep.subr.mxu1 %v2414_v0  ;;  %v419_v42 = vld [vmem:[#allocation5 + $0x88] sm:$0xff]  ;;  %v402_v43 = vld [vmem:[#allocation5] sm:$0xff]  ;;  %v2662_v44 = vld [vmem:[%s2630_s4] sm:$0xff] }
  0x92   : > { %480 = vmatpush1.msra.mxu0 %v429_v15  ;;  %1769 = vmatpush3.msra.mxu1 %v434_v27  ;;  %v416_v45 = vld [vmem:[#allocation5 + $0x70] sm:$0xff]  ;;  %v413_v46 = vld [vmem:[#allocation5 + $0x58] sm:$0xff]  ;;  %v410_v47 = vld [vmem:[#allocation5 + $0x40] sm:$0xff] }
  0x93   : > { %481 = vmatprep.subr.mxu0 %v427_v17  ;;  %1770 = vmatprep.subr.mxu1 %v2414_v0  ;;  %v407_v48 = vld [vmem:[#allocation5 + $0x28] sm:$0xff]  ;;  %v404_v49 = vld [vmem:[#allocation5 + $0x10] sm:$0xff]  ;;  %v872_v50 = vld [vmem:[#allocation7 + $0x78] sm:$0xff]  ;;  %v453_v17 = vshrl.u32 %v452_v16, 7 }
  0x94   : > { %482 = vmatpush1.msra.mxu0 %v426_v19  ;;  %1771 = vmatpush3.msra.mxu1 %v431_v30  ;;  %v871_v51 = vld [vmem:[#allocation7 + $0x70] sm:$0xff]  ;;  %v870_v52 = vld [vmem:[#allocation7 + $0x68] sm:$0xff]  ;;  %v869_v53 = vld [vmem:[#allocation7 + $0x60] sm:$0xff]  ;;  %v611_v19 = vunpack.c.l.s4 %v2416_v18 }
  0x95   : > { %483 = vmatprep.subr.mxu0 %v424_v20  ;;  %1772 = vmatprep.subr.mxu1 %v2414_v0  ;;  %v868_v54 = vld [vmem:[#allocation7 + $0x58] sm:$0xff]  ;;  %v867_v55 = vld [vmem:[#allocation7 + $0x50] sm:$0xff]  ;;  %v866_v56 = vld [vmem:[#allocation7 + $0x48] sm:$0xff]  ;;  %v458_v20 = vsub.s32 1, %v453_v17  ;;  %v462_v18 = vsub.s32 2, %v453_v17 }
  0x96   : > { %484 = vmatpush1.msra.mxu0 %v423_v22  ;;  %1773 = vmatpush3.msra.mxu1 %v428_v33  ;;  %v865_v57 = vld [vmem:[#allocation7 + $0x40] sm:$0xff]  ;;  %v864_v58 = vld [vmem:[#allocation7 + $0x38] sm:$0xff]  ;;  %v863_v59 = vld [vmem:[#allocation7 + $0x30] sm:$0xff]  ;;  %v612_v21 = vunpack.c.0.s8 %v611_v19 }
  0x97   : > { %485 = vmatprep.subr.mxu0 %v421_v23  ;;  %1774 = vmatprep.subr.mxu1 %v2414_v0  ;;  %v862_v60 = vld [vmem:[#allocation7 + $0x28] sm:$0xff]  ;;  %v861_v61 = vld [vmem:[#allocation7 + $0x20] sm:$0xff]  ;;  %v860_v62 = vld [vmem:[#allocation7 + $0x18] sm:$0xff] }
  0x98   : > { %486 = vmatpush1.msra.mxu0 %v420_v25  ;;  %1775 = vmatpush3.msra.mxu1 %v425_v36  ;;  %v859_v63 = vld [vmem:[#allocation7 + $0x10] sm:$0xff]  ;;  %v858_v1 = vld [vmem:[#allocation7 + $0x8] sm:$0xff]  ;;  %v2691_v2 = vld [vmem:[#allocation11 + $0x78] sm:$0xff]  ;;  %v2749_v25 = vsub.s32 %v612_v21, %v453_v17 }
  0x99   : > { %487 = vmatprep.subr.mxu0 %v418_v26  ;;  %1776 = vmatprep.subr.mxu1 %v2414_v0  ;;  %v2693_v3 = vld [vmem:[#allocation11 + $0x70] sm:$0xff]  ;;  %v857_v4 = vld [vmem:[#allocation7] sm:$0xff]  ;;  %v2698_v5 = vld [vmem:[#allocation11 + $0x68] sm:$0xff] }
  0x9a   : > { %488 = vmatpush1.msra.mxu0 %v417_v28  ;;  %1777 = vmatpush3.msra.mxu1 %v422_v39  ;;  %v2703_v6 = vld [vmem:[#allocation11 + $0x60] sm:$0xff]  ;;  %v2707_v7 = vld [vmem:[#allocation11 + $0x58] sm:$0xff]  ;;  %v2712_v8 = vld [vmem:[#allocation11 + $0x50] sm:$0xff]  ;;  %v2751_v28 = vsub.s32 0, %v453_v17 }
  0x9b   : > { %489 = vmatprep.subr.mxu0 %v415_v29  ;;  %1778 = vmatprep.subr.mxu1 %v2414_v0  ;;  %v2716_v9 = vld [vmem:[#allocation11 + $0x48] sm:$0xff]  ;;  %v2720_v10 = vld [vmem:[#allocation11 + $0x40] sm:$0xff]  ;;  %v2724_v11 = vld [vmem:[#allocation11 + $0x38] sm:$0xff] }
  0x9c   : > { %490 = vmatpush1.msra.mxu0 %v414_v31  ;;  %1779 = vmatpush3.msra.mxu1 %v419_v42  ;;  %v2728_v12 = vld [vmem:[#allocation11 + $0x30] sm:$0xff]  ;;  %v2732_v13 = vld [vmem:[#allocation11 + $0x28] sm:$0xff]  ;;  %v2736_v14 = vld [vmem:[#allocation11 + $0x20] sm:$0xff] }
  0x9d   : > { %491 = vmatprep.subr.mxu0 %v412_v32  ;;  %1780 = vmatprep.subr.mxu1 %v2414_v0  ;;  %v2740_v15 = vld [vmem:[#allocation11 + $0x18] sm:$0xff]  ;;  %v450_v22 = vld [vmem:[%s2995_s2] sm:$0x7] }
  0x9e   : > { %492 = vmatpush1.msra.mxu0 %v411_v34  ;;  %1781 = vmatpush3.msra.mxu1 %v416_v45  ;;  %v459_v23 = vrot.slane %v450_v22, %v458_v20  ;;  %v455_v34 = vrot.slane %v450_v22, %v2751_v28 }
  0x9f   : > { %493 = vmatprep.subr.mxu0 %v409_v35  ;;  %1782 = vmatprep.subr.mxu1 %v2414_v0 }
  0xa0   : > { %494 = vmatpush1.msra.mxu0 %v408_v37  ;;  %1783 = vmatpush3.msra.mxu1 %v413_v46 }
  0xa1   : > { %495 = vmatprep.subr.mxu0 %v406_v38  ;;  %1784 = vmatprep.subr.mxu1 %v2414_v0 }
  0xa2   : > { %496 = vmatpush1.msra.mxu0 %v405_v40  ;;  %1785 = vmatpush3.msra.mxu1 %v410_v47 }
  0xa3   : > { %497 = vmatprep.subr.mxu0 %v403_v41  ;;  %1786 = vmatprep.subr.mxu1 %v2414_v0 }
  0xa4   : > { %498 = vmatpush1.msra.mxu0 %v402_v43  ;;  %1787 = vmatpush3.msra.mxu1 %v407_v48 }
  0xa5   : > { %532 = vmatmul.mubr.f32.vlgmr.msra.gmra.mxu0 %v2662_v44  ;;  %1793 = vmatprep.subr.mxu0 %v2414_v0 }
  0xa6   : > { %1825 = vmatprep.mubr.msk.f32.mxu0 %vm2415_vm0, %v2414_v0  ;;  %1788 = vmatprep.subr.mxu1 %v2414_v0 }
  0xa7   : > { %1789 = vmatpush3.msra.mxu1 %v404_v49  ;;  %1794 = vmatpush3.msra.mxu0 %v872_v50 }
  0xa8   : > { %1791 = vmatmul.mubr.f32.vlgmr.msra.gmra.mxu1 %v2662_v44  ;;  %1828 = vmatprep.subr.mxu1 %v2414_v0 }
  0xa9   : > { %1860 = vmatprep.mubr.msk.f32.mxu1 %vm2415_vm0, %v2414_v0  ;;  %1795 = vmatprep.subr.mxu0 %v2414_v0 }
  0xaa   : > { %1796 = vmatpush3.msra.mxu0 %v871_v51  ;;  %1829 = vmatpush3.msra.mxu1 %v2691_v2 }
  0xab   : > { %1797 = vmatprep.subr.mxu0 %v2414_v0  ;;  %1830 = vmatprep.subr.mxu1 %v2414_v0 }
  0xac   : > { %1798 = vmatpush3.msra.mxu0 %v870_v52  ;;  %1831 = vmatpush3.msra.mxu1 %v2693_v3 }
  0xad   : > { %1799 = vmatprep.subr.mxu0 %v2414_v0  ;;  %1832 = vmatprep.subr.mxu1 %v2414_v0 }
  0xae   : > { %1800 = vmatpush3.msra.mxu0 %v869_v53  ;;  %1833 = vmatpush3.msra.mxu1 %v2698_v5 }
  0xaf   : > { %1801 = vmatprep.subr.mxu0 %v2414_v0  ;;  %1834 = vmatprep.subr.mxu1 %v2414_v0 }
  0xb0   : > { %1802 = vmatpush3.msra.mxu0 %v868_v54  ;;  %1835 = vmatpush3.msra.mxu1 %v2703_v6 }
  0xb1   : > { %1803 = vmatprep.subr.mxu0 %v2414_v0  ;;  %1836 = vmatprep.subr.mxu1 %v2414_v0 }
  0xb2   : > { %1804 = vmatpush3.msra.mxu0 %v867_v55  ;;  %1837 = vmatpush3.msra.mxu1 %v2707_v7 }
  0xb3   : > { %1805 = vmatprep.subr.mxu0 %v2414_v0  ;;  %1838 = vmatprep.subr.mxu1 %v2414_v0 }
  0xb4   : > { %1806 = vmatpush3.msra.mxu0 %v866_v56  ;;  %1839 = vmatpush3.msra.mxu1 %v2712_v8 }
  0xb5   : > { %1807 = vmatprep.subr.mxu0 %v2414_v0  ;;  %1840 = vmatprep.subr.mxu1 %v2414_v0 }
  0xb6   : > { %1808 = vmatpush3.msra.mxu0 %v865_v57  ;;  %1841 = vmatpush3.msra.mxu1 %v2716_v9 }
  0xb7   : > { %1809 = vmatprep.subr.mxu0 %v2414_v0  ;;  %1842 = vmatprep.subr.mxu1 %v2414_v0 }
  0xb8   : > { %1810 = vmatpush3.msra.mxu0 %v864_v58  ;;  %1843 = vmatpush3.msra.mxu1 %v2720_v10 }
  0xb9   : > { %1811 = vmatprep.subr.mxu0 %v2414_v0  ;;  %1844 = vmatprep.subr.mxu1 %v2414_v0 }
  0xba   : > { %1812 = vmatpush3.msra.mxu0 %v863_v59  ;;  %1845 = vmatpush3.msra.mxu1 %v2724_v11 }
  0xbb   : > { %1813 = vmatprep.subr.mxu0 %v2414_v0  ;;  %1846 = vmatprep.subr.mxu1 %v2414_v0 }
  0xbc   : > { %1814 = vmatpush3.msra.mxu0 %v862_v60  ;;  %1847 = vmatpush3.msra.mxu1 %v2728_v12 }
  0xbd   : > { %1815 = vmatprep.subr.mxu0 %v2414_v0  ;;  %1848 = vmatprep.subr.mxu1 %v2414_v0 }
  0xbe   : > { %1816 = vmatpush3.msra.mxu0 %v861_v61  ;;  %1849 = vmatpush3.msra.mxu1 %v2732_v13 }
  0xbf   : > { %1817 = vmatprep.subr.mxu0 %v2414_v0  ;;  %1850 = vmatprep.subr.mxu1 %v2414_v0 }
  0xc0   : > { %1818 = vmatpush3.msra.mxu0 %v860_v62  ;;  %1851 = vmatpush3.msra.mxu1 %v2736_v14 }
  0xc1   : > { %1819 = vmatprep.subr.mxu0 %v2414_v0  ;;  %1852 = vmatprep.subr.mxu1 %v2414_v0 }
  0xc2   : > { %1820 = vmatpush3.msra.mxu0 %v859_v63  ;;  %1853 = vmatpush3.msra.mxu1 %v2740_v15 }
  0xc3   : > { %1821 = vmatprep.subr.mxu0 %v2414_v0  ;;  %1854 = vmatprep.subr.mxu1 %v2414_v0 }
  0xc4   : > { %1822 = vmatpush3.msra.mxu0 %v858_v1 }
  0xc5   : > { %1823 = vmatprep.subr.mxu0 %v2414_v0 }
  0xc6   : > { %1824 = vmatpush3.msra.mxu0 %v857_v4 }
  0xc7   : > { %1863 = vmatprep.subr.mxu0 %v2414_v0 }
 0x165   : > { %v533_v24 = vpop.f32.mrf.mxu0 }
 0x166   : > { %v534_v46 = vadd.f32 %v533_v24, %v455_v34 }
 0x167   : > { %v535_v26 = vpop.f32.mrf.mxu0 }
 0x168   : > { %v536_v27 = vadd.f32 %v535_v26, %v459_v23  ;;  %v604_v39 = vpop.f32.mrf.mxu1  ;;  %v463_v23 = vrot.slane %v450_v22, %v462_v18 }
 0x16a   : > { %v609_v29 = vcombine.high %v536_v27, %v536_v27  ;;  %v616_v30 = vrot.slane %v536_v27, %v2749_v25  ;;  %v1792_v45 = vpop.f32.mrf.mxu1 }
 0x16c   : > { %v623_v31 = vrot.slane %v609_v29, %v2749_v25  ;;  %v624_v32 = vcombine.high %v616_v30, %v616_v30  ;;  %v632_v33 = vrot.slane %v616_v30, %v2749_v25 }
 0x16e   : > { %v625_v35 = vcombine.high %v623_v31, %v623_v31  ;;  %v639_v36 = vrot.slane %v623_v31, %v2749_v25  ;;  %v646_v37 = vrot.slane %v624_v32, %v2749_v25  ;;  %v654_v38 = vcombine.high %v632_v33, %v632_v33 }
 0x16f   : > { %v661_v47 = vrot.slane %v632_v33, %v2751_v28  ;;  %v605_v33 = vadd.f32 %v604_v39, %v463_v23 }
 0x170   : > { %v653_v40 = vrot.slane %v625_v35, %v2749_v25  ;;  %v655_v41 = vcombine.high %v639_v36, %v639_v36  ;;  %v656_v42 = vcombine.high %v646_v37, %v646_v37  ;;  %v665_v43 = vrot.slane %v646_v37, %v2751_v28 }
 0x171   : > { %v669_v48 = vrot.slane %v654_v38, %v2751_v28  ;;  %v677_v49 = vrot.slane %v639_v36, %v2751_v28  ;;  %v698_v59 = vmul.f32 %v661_v47, %v534_v46  ;;  %v757_v35 = vrot.slane %v605_v33, %v2749_v25 }
 0x172   : > { %v657_v50 = vcombine.high %v653_v40, %v653_v40  ;;  %v673_v51 = vrot.slane %v656_v42, %v2751_v28  ;;  %v681_v52 = vrot.slane %v653_v40, %v2751_v28  ;;  %v685_v53 = vrot.slane %v655_v41, %v2751_v28 }
 0x173   : > { %v699_v54 = vmul.f32 %v665_v43, %v534_v46  ;;  %v702_v56 = vmul.f32 %v677_v49, %v534_v46  ;;  %v700_v60 = vmul.f32 %v669_v48, %v534_v46  ;;  %v765_v22 = vcombine.high %v757_v35, %v757_v35 }
 0x174   : > { %v689_v55 = vrot.slane %v657_v50, %v2751_v28  ;;  %v703_v57 = vmul.f32 %v681_v52, %v534_v46  ;;  %v704_v58 = vmul.f32 %v685_v53, %v534_v46  ;;  %v701_v61 = vmul.f32 %v673_v51, %v534_v46 }
 0x175   : > { %v706_v1 = vmax.f32 %v698_v59, %v702_v56  ;;  %v773_v43 = vrot.slane %v757_v35, %v2749_v25  ;;  %v787_v47 = vrot.slane %v765_v22, %v2749_v25  ;;  %v750_v50 = vcombine.high %v605_v33, %v605_v33 }
 0x176   : > { %v705_v62 = vmul.f32 %v689_v55, %v534_v46  ;;  %v707_v63 = vmax.f32 %v699_v54, %v703_v57  ;;  %v708_v4 = vmax.f32 %v700_v60, %v704_v58 }
 0x177   : > { %v795_v48 = vcombine.high %v773_v43, %v773_v43  ;;  %v802_v49 = vrot.slane %v773_v43, %v2751_v28  ;;  %v806_v51 = vrot.slane %v787_v47, %v2751_v28  ;;  %v797_v53 = vcombine.high %v787_v47, %v787_v47 }
 0x178   : > { %v709_v16 = vmax.f32 %v701_v61, %v705_v62  ;;  %v710_v19 = vmax.f32 %v706_v1, %v707_v63 }
 0x17a   : > { %v711_v20 = vmax.f32 %v708_v4, %v709_v16 }
 0x17c   : > { %v712_v21 = vmax.f32 %v710_v19, %v711_v20 }
 0x17e   : > { %v716_v24 = vsub.f32 %v698_v59, %v712_v21  ;;  %v717_v26 = vsub.f32 %v699_v54, %v712_v21  ;;  %v718_v27 = vsub.f32 %v700_v60, %v712_v21  ;;  %v719_v29 = vsub.f32 %v701_v61, %v712_v21 }
 0x17f   : > { %v720_v34 = vsub.f32 %v702_v56, %v712_v21  ;;  %v721_v36 = vsub.f32 %v703_v57, %v712_v21  ;;  %v722_v17 = vsub.f32 %v704_v58, %v712_v21  ;;  %v713_v40 = vsub.f32 -inf, %v712_v21 }
 0x180   : > { %v724_v30 = vmul.f32 1.442695, %v716_v24  ;;  %v726_v31 = vmul.f32 1.442695, %v717_v26  ;;  %v728_v32 = vmul.f32 1.442695, %v718_v27  ;;  %v723_v41 = vsub.f32 %v705_v62, %v712_v21 }
 0x181   : > { %v730_v37 = vmul.f32 1.442695, %v719_v29  ;;  %v732_v38 = vmul.f32 1.442695, %v720_v34  ;;  %v734_v42 = vmul.f32 1.442695, %v721_v36  ;;  %v810_v54 = vrot.slane %v795_v48, %v2751_v28 }
 0x182   : > { %2142 = vpow2.f32 %v724_v30  ;;  %v736_v45 = vmul.f32 1.442695, %v722_v17  ;;  %v714_v39 = vmul.f32 1.442695, %v713_v40  ;;  %v738_v46 = vmul.f32 1.442695, %v723_v41 }
 0x183   : > { %2144 = vpow2.f32 %v726_v31  ;;  %v764_v59 = vrot.slane %v750_v50, %v2749_v25  ;;  %v814_v61 = vrot.slane %v797_v53, %v2751_v28  ;;  %v2812_v53 = vld [vmem:[#allocation11 + $0x8] sm:$0xff] }
 0x184   : > { %2146 = vpow2.f32 %v728_v32 }
 0x185   : > { %2148 = vpow2.f32 %v730_v37  ;;  %v766_v16 = vcombine.high %v764_v59, %v764_v59  ;;  %v780_v18 = vrot.slane %v764_v59, %v2749_v25 }
 0x186   : > { %2150 = vpow2.f32 %v732_v38 }
 0x187   : > { %2152 = vpow2.f32 %v734_v42  ;;  %v818_v23 = vrot.slane %v780_v18, %v2751_v28  ;;  %v794_v30 = vrot.slane %v766_v16, %v2749_v25  ;;  %v796_v34 = vcombine.high %v780_v18, %v780_v18  ;;  %v1129_v18 = vld [vmem:[#allocation8 + $0x58] sm:$0xff] }
 0x188   : > { %2154 = vpow2.f32 %v736_v45 }
 0x189   : > { %2156 = vpow2.f32 %v714_v39  ;;  %v822_v35 = vrot.slane %v794_v30, %v2751_v28  ;;  %v798_v41 = vcombine.high %v794_v30, %v794_v30  ;;  %v826_v42 = vrot.slane %v796_v34, %v2751_v28  ;;  %v1120_v30 = vld [vmem:[#allocation8 + $0x10] sm:$0xff] }
 0x18a   : > { %2158 = vpow2.f32 %v738_v46  ;;  %v1228_v34 = vld [vmem:[#allocation10 + $0x70] sm:$0xff] }
 0x18b   : > { %v830_v25 = vrot.slane %v798_v41, %v2751_v28  ;;  %v2810_v28 = vld [vmem:[#allocation11 + $0x10] sm:$0xff] }
 0x18c   : > { %1855 = vmatpush3.msra.mxu1 %v2810_v28 }
 0x18d   : > { %1856 = vmatprep.subr.mxu1 %v2414_v0 }
 0x18e   : > { %1857 = vmatpush3.msra.mxu1 %v2812_v53 }
 0x18f   : > { %v2143_v52 = vpop.eup %2142  ;;  %1858 = vmatprep.subr.mxu1 %v2414_v0 }
 0x190   : > { %v2145_v55 = vpop.eup %2144  ;;  %v839_v56 = vmul.f32 %v2143_v52, %v802_v49 }
 0x191   : > { %v2147_v57 = vpop.eup %2146  ;;  %v741_v58 = vadd.f32 %v2145_v55, %v2143_v52  ;;  %v840_v60 = vmul.f32 %v2145_v55, %v806_v51  ;;  %v1610_v55 = vld [vmem:[%s3000_s7] ss:$0 sm:$0xff] }
 0x192   : > { %v841_v62 = vmul.f32 %v2147_v57, %v810_v54  ;;  %v2149_v4 = vpop.eup %2148  ;;  %v2817_v54 = vld [vmem:[#allocation11] sm:$0xff] }
 0x193   : > { %v847_v63 = vadd.f32 %v840_v60, %v839_v56  ;;  %v742_v1 = vadd.f32 %v2147_v57, %v741_v58  ;;  %v2151_v21 = vpop.eup %2150  ;;  %v842_v24 = vmul.f32 %v2149_v4, %v814_v61  ;;  %1859 = vmatpush3.msra.mxu1 %v2817_v54  ;;  %v1133_v60 = vld [vmem:[#allocation8 + $0x78] sm:$0xff]  ;;  %v1132_v61 = vld [vmem:[#allocation8 + $0x70] sm:$0xff] }
 0x194   : > { %v2153_v27 = vpop.eup %2152  ;;  %v843_v36 = vmul.f32 %v2151_v21, %v818_v23  ;;  %1898 = vmatprep.subr.mxu1 %v2414_v0  ;;  %v1125_v23 = vld [vmem:[#allocation8 + $0x38] sm:$0xff] }
 0x195   : > { %v848_v19 = vadd.f32 %v847_v63, %v841_v62  ;;  %v743_v20 = vadd.f32 %v2149_v4, %v742_v1  ;;  %v2155_v29 = vpop.eup %2154  ;;  %v844_v43 = vmul.f32 %v2153_v27, %v822_v35  ;;  %v1131_v62 = vld [vmem:[#allocation8 + $0x68] sm:$0xff]  ;;  %v1130_v63 = vld [vmem:[#allocation8 + $0x60] sm:$0xff] }
 0x196   : > { %v2157_v33 = vpop.eup %2156  ;;  %v845_v46 = vmul.f32 %v2155_v29, %v826_v42  ;;  %v1227_v35 = vld [vmem:[#allocation10 + $0x68] sm:$0xff]  ;;  %v1612_v42 = vld [vmem:[%s3000_s7 + $0x4] ss:$0 sm:$0xff] }
 0x197   : > { %v744_v26 = vadd.f32 %v2151_v21, %v743_v20  ;;  %v849_v31 = vadd.f32 %v848_v19, %v842_v24  ;;  %v2159_v17 = vpop.eup %2158  ;;  %v740_v40 = vmul.f32 0.0, %v2157_v33  ;;  %v1128_v19 = vld [vmem:[#allocation8 + $0x50] sm:$0xff]  ;;  %v1127_v20 = vld [vmem:[#allocation8 + $0x48] sm:$0xff]  ;;  %v1126_v21 = vld [vmem:[#allocation8 + $0x40] sm:$0xff] }
 0x198   : > { %v846_v48 = vmul.f32 %v2159_v17, %v830_v25  ;;  %v1124_v24 = vld [vmem:[#allocation8 + $0x30] sm:$0xff]  ;;  %v1229_v33 = vld [vmem:[#allocation10 + $0x78] sm:$0xff] }
 0x199   : > { %v745_v32 = vadd.f32 %v2153_v27, %v744_v26  ;;  %v850_v38 = vadd.f32 %v849_v31, %v843_v36  ;;  %v1123_v26 = vld [vmem:[#allocation8 + $0x28] sm:$0xff]  ;;  %v1122_v27 = vld [vmem:[#allocation8 + $0x20] sm:$0xff]  ;;  %v1224_v25 = vld [vmem:[#allocation10 + $0x50] sm:$0xff] }
 0x19a   : > { %v1119_v31 = vld [vmem:[#allocation8 + $0x8] sm:$0xff]  ;;  %v1226_v36 = vld [vmem:[#allocation10 + $0x60] sm:$0xff] }
 0x19b   : > { %v746_v37 = vadd.f32 %v2155_v29, %v745_v32  ;;  %v851_v39 = vadd.f32 %v850_v38, %v844_v43  ;;  %v1121_v29 = vld [vmem:[#allocation8 + $0x18] sm:$0xff]  ;;  %v1118_v32 = vld [vmem:[#allocation8] sm:$0xff] }
 0x19d   : > { %v747_v22 = vadd.f32 %v2159_v17, %v746_v37  ;;  %v852_v47 = vadd.f32 %v851_v39, %v845_v46  ;;  %v1225_v39 = vld [vmem:[#allocation10 + $0x58] sm:$0xff]  ;;  %v1223_v46 = vld [vmem:[#allocation10 + $0x48] sm:$0xff] }
 0x19f   : > { %v748_v45 = vadd.f32 %v747_v22, %v740_v40  ;;  %v853_v49 = vadd.f32 %v852_v47, %v846_v48  ;;  %v1611_v22 = vld [vmem:[%s3000_s7 + $0x3] ss:$0 sm:$0xff]  ;;  %v1222_v47 = vld [vmem:[#allocation10 + $0x40] sm:$0xff]  ;;  %v1221_v48 = vld [vmem:[#allocation10 + $0x38] sm:$0xff] }
 0x1a1   : > { %2160 = vrcp.f32 %v748_v45  ;;  %v854_v50 = vadd.f32 %v853_v49, %v740_v40  ;;  %v1220_v49 = vld [vmem:[#allocation10 + $0x30] sm:$0xff] }
 0x1ae   : > { %v2161_v51 = vpop.eup %2160 }
 0x1af   : > { %v856_v52 = vmul.f32 %v2161_v51, %v854_v50  ;;  %v1219_v50 = vld [vmem:[#allocation10 + $0x28] sm:$0xff]  ;;  %v1218_v51 = vld [vmem:[#allocation10 + $0x20] sm:$0xff] }
 0x1b1   : > { %1826 = vmatmul.mubr.f32.vlgmr.msra.gmra.mxu0 %v856_v52  ;;  %v1217_v52 = vld [vmem:[#allocation10 + $0x18] sm:$0xff] }
 0x1b2   : > { %1864 = vmatpush3.msra.mxu0 %v2691_v2  ;;  %1895 = vmatprep.mubr.msk.f32.mxu0 %vm2415_vm0, %v2414_v0 }
 0x1b3   : > { %1865 = vmatprep.subr.mxu0 %v2414_v0 }
 0x1b4   : > { %1866 = vmatpush3.msra.mxu0 %v2693_v3 }
 0x1b5   : > { %1867 = vmatprep.subr.mxu0 %v2414_v0 }
 0x1b6   : > { %1868 = vmatpush3.msra.mxu0 %v2698_v5 }
 0x1b7   : > { %1869 = vmatprep.subr.mxu0 %v2414_v0 }
 0x1b8   : > { %1870 = vmatpush3.msra.mxu0 %v2703_v6 }
 0x1b9   : > { %1871 = vmatprep.subr.mxu0 %v2414_v0 }
 0x1ba   : > { %1872 = vmatpush3.msra.mxu0 %v2707_v7 }
 0x1bb   : > { %1873 = vmatprep.subr.mxu0 %v2414_v0 }
 0x1bc   : > { %1874 = vmatpush3.msra.mxu0 %v2712_v8 }
 0x1bd   : > { %1875 = vmatprep.subr.mxu0 %v2414_v0 }
 0x1be   : > { %1876 = vmatpush3.msra.mxu0 %v2716_v9 }
 0x1bf   : > { %1877 = vmatprep.subr.mxu0 %v2414_v0 }
 0x1c0   : > { %1878 = vmatpush3.msra.mxu0 %v2720_v10 }
 0x1c1   : > { %1879 = vmatprep.subr.mxu0 %v2414_v0 }
 0x1c2   : > { %1880 = vmatpush3.msra.mxu0 %v2724_v11 }
 0x1c3   : > { %1881 = vmatprep.subr.mxu0 %v2414_v0 }
 0x1c4   : > { %1882 = vmatpush3.msra.mxu0 %v2728_v12 }
 0x1c5   : > { %1883 = vmatprep.subr.mxu0 %v2414_v0 }
 0x1c6   : > { %1884 = vmatpush3.msra.mxu0 %v2732_v13 }
 0x1c7   : > { %1885 = vmatprep.subr.mxu0 %v2414_v0 }
 0x1c8   : > { %1886 = vmatpush3.msra.mxu0 %v2736_v14 }
 0x1c9   : > { %1887 = vmatprep.subr.mxu0 %v2414_v0 }
 0x1ca   : > { %1888 = vmatpush3.msra.mxu0 %v2740_v15 }
 0x1cb   : > { %1889 = vmatprep.subr.mxu0 %v2414_v0 }
 0x1cc   : > { %1890 = vmatpush3.msra.mxu0 %v2810_v28 }
 0x1cd   : > { %1891 = vmatprep.subr.mxu0 %v2414_v0 }
 0x1ce   : > { %1892 = vmatpush3.msra.mxu0 %v2812_v53 }
 0x1cf   : > { %1893 = vmatprep.subr.mxu0 %v2414_v0 }
 0x1d0   : > { %1894 = vmatpush3.msra.mxu0 %v2817_v54 }
 0x1d1   : > { %1933 = vmatprep.subr.mxu0 %v2414_v0 }
 0x271   : > { %v943_v56 = vpop.f32.mrf.mxu0 }
 0x272   : > { %v944_v57 = vadd.f32 %v1610_v55, %v943_v56  ;;  %v1216_v55 = vld [vmem:[#allocation10 + $0x10] sm:$0xff]  ;;  %v1215_v56 = vld [vmem:[#allocation10 + $0x8] sm:$0xff] }
 0x273   : > { %v1827_v58 = vpop.f32.mrf.mxu0 }
 0x274   : > { %v963_v59 = vadd.f32 %v944_v57, %v2662_v44  ;;  %v1214_v57 = vld [vmem:[#allocation10] sm:$0xff]  ;;  %v1613_v58 = vld [vmem:[%s3000_s7 + $0x1] ss:$0 sm:$0xff] }
 0x276   : > { %1861 = vmatmul.mubr.f32.vlgmr.msra.gmra.mxu1 %v963_v59 }
 0x277   : > { %1930 = vmatprep.mubr.msk.f32.mxu1 %vm2415_vm0, %v2414_v0  ;;  %1899 = vmatpush3.msra.mxu1 %v1133_v60 }
 0x278   : > { %1900 = vmatprep.subr.mxu1 %v2414_v0 }
 0x279   : > { %1901 = vmatpush3.msra.mxu1 %v1132_v61 }
 0x27a   : > { %1902 = vmatprep.subr.mxu1 %v2414_v0 }
 0x27b   : > { %1903 = vmatpush3.msra.mxu1 %v1131_v62 }
 0x27c   : > { %1904 = vmatprep.subr.mxu1 %v2414_v0 }
 0x27d   : > { %1905 = vmatpush3.msra.mxu1 %v1130_v63 }
 0x27e   : > { %1906 = vmatprep.subr.mxu1 %v2414_v0 }
 0x27f   : > { %1907 = vmatpush3.msra.mxu1 %v1129_v18 }
 0x280   : > { %1908 = vmatprep.subr.mxu1 %v2414_v0 }
 0x281   : > { %1909 = vmatpush3.msra.mxu1 %v1128_v19 }
 0x282   : > { %1910 = vmatprep.subr.mxu1 %v2414_v0 }
 0x283   : > { %1911 = vmatpush3.msra.mxu1 %v1127_v20 }
 0x284   : > { %1912 = vmatprep.subr.mxu1 %v2414_v0 }
 0x285   : > { %1913 = vmatpush3.msra.mxu1 %v1126_v21 }
 0x286   : > { %1914 = vmatprep.subr.mxu1 %v2414_v0 }
 0x287   : > { %1915 = vmatpush3.msra.mxu1 %v1125_v23 }
 0x288   : > { %1916 = vmatprep.subr.mxu1 %v2414_v0 }
 0x289   : > { %1917 = vmatpush3.msra.mxu1 %v1124_v24 }
 0x28a   : > { %1918 = vmatprep.subr.mxu1 %v2414_v0 }
 0x28b   : > { %1919 = vmatpush3.msra.mxu1 %v1123_v26 }
 0x28c   : > { %1920 = vmatprep.subr.mxu1 %v2414_v0 }
 0x28d   : > { %1921 = vmatpush3.msra.mxu1 %v1122_v27 }
 0x28e   : > { %1922 = vmatprep.subr.mxu1 %v2414_v0 }
 0x28f   : > { %1923 = vmatpush3.msra.mxu1 %v1121_v29 }
 0x290   : > { %1924 = vmatprep.subr.mxu1 %v2414_v0 }
 0x291   : > { %1925 = vmatpush3.msra.mxu1 %v1120_v30 }
 0x292   : > { %1926 = vmatprep.subr.mxu1 %v2414_v0 }
 0x293   : > { %1927 = vmatpush3.msra.mxu1 %v1119_v31 }
 0x294   : > { %1928 = vmatprep.subr.mxu1 %v2414_v0 }
 0x295   : > { %1929 = vmatpush3.msra.mxu1 %v1118_v32 }
 0x296   : > { %1968 = vmatprep.subr.mxu1 %v2414_v0 }
 0x336   : > { %v1030_v44 = vpop.f32.mrf.mxu1 }
 0x337   : > { %v1034_v1 = vsub.f32 %v963_v59, %v1030_v44 }
 0x338   : > { %v1862_v4 = vpop.f32.mrf.mxu1 }
 0x339   : > { %v1035_v16 = vmul.f32 %v1034_v1, %v1034_v1 }
 0x33b   : > { %1896 = vmatmul.mubr.f32.vlgmr.msra.gmra.mxu0 %v1035_v16 }
 0x33c   : > { %1965 = vmatprep.mubr.msk.f32.mxu0 %vm2415_vm0, %v2414_v0  ;;  %1934 = vmatpush3.msra.mxu0 %v1229_v33 }
 0x33d   : > { %1935 = vmatprep.subr.mxu0 %v2414_v0 }
 0x33e   : > { %1936 = vmatpush3.msra.mxu0 %v1228_v34 }
 0x33f   : > { %1937 = vmatprep.subr.mxu0 %v2414_v0 }
 0x340   : > { %1938 = vmatpush3.msra.mxu0 %v1227_v35 }
 0x341   : > { %1939 = vmatprep.subr.mxu0 %v2414_v0 }
 0x342   : > { %1940 = vmatpush3.msra.mxu0 %v1226_v36 }
 0x343   : > { %1941 = vmatprep.subr.mxu0 %v2414_v0 }
 0x344   : > { %1942 = vmatpush3.msra.mxu0 %v1225_v39 }
 0x345   : > { %1943 = vmatprep.subr.mxu0 %v2414_v0 }
 0x346   : > { %1944 = vmatpush3.msra.mxu0 %v1224_v25 }
 0x347   : > { %1945 = vmatprep.subr.mxu0 %v2414_v0 }
 0x348   : > { %1946 = vmatpush3.msra.mxu0 %v1223_v46 }
 0x349   : > { %1947 = vmatprep.subr.mxu0 %v2414_v0 }
 0x34a   : > { %1948 = vmatpush3.msra.mxu0 %v1222_v47 }
 0x34b   : > { %1949 = vmatprep.subr.mxu0 %v2414_v0 }
 0x34c   : > { %1950 = vmatpush3.msra.mxu0 %v1221_v48 }
 0x34d   : > { %1951 = vmatprep.subr.mxu0 %v2414_v0 }
 0x34e   : > { %1952 = vmatpush3.msra.mxu0 %v1220_v49 }
 0x34f   : > { %1953 = vmatprep.subr.mxu0 %v2414_v0 }
 0x350   : > { %1954 = vmatpush3.msra.mxu0 %v1219_v50 }
 0x351   : > { %1955 = vmatprep.subr.mxu0 %v2414_v0 }
 0x352   : > { %1956 = vmatpush3.msra.mxu0 %v1218_v51 }
 0x353   : > { %1957 = vmatprep.subr.mxu0 %v2414_v0 }
 0x354   : > { %1958 = vmatpush3.msra.mxu0 %v1217_v52 }
 0x355   : > { %1959 = vmatprep.subr.mxu0 %v2414_v0 }
 0x356   : > { %1960 = vmatpush3.msra.mxu0 %v1216_v55 }
 0x357   : > { %1961 = vmatprep.subr.mxu0 %v2414_v0 }
 0x358   : > { %1962 = vmatpush3.msra.mxu0 %v1215_v56 }
 0x359   : > { %1963 = vmatprep.subr.mxu0 %v2414_v0 }
 0x35a   : > { %1964 = vmatpush3.msra.mxu0 %v1214_v57 }
 0x35b   : > { %2003 = vmatprep.subr.mxu0 %v2414_v0 }
 0x3fb   : > { %v1102_v37 = vpop.f32.mrf.mxu0 }
 0x3fc   : > { %v1103_v17 = vadd.f32 1e-05, %v1102_v37 }
 0x3fd   : > { %v1897_v38 = vpop.f32.mrf.mxu0 }
 0x3fe   : > { %2162 = vrsqrt.f32 %v1103_v17 }
 0x40b   : > { %v2163_v40 = vpop.eup %2162 }
 0x40c   : > { %v1107_v41 = vmul.f32 %v2163_v40, %v1034_v1 }
 0x40e   : > { %v1112_v43 = vmul.f32 %v1611_v22, %v1107_v41 }
 0x410   : > { %v2862_v45 = vadd.f32 %v1612_v42, %v1112_v43 }
 0x412   : > { %1931 = vmatmul.mubr.f32.vlgmr.msra.gmra.mxu1 %v2862_v45 }
 0x413   : > { %1969 = vmatpush3.msra.mxu1 %v2691_v2  ;;  %2000 = vmatprep.mubr.msk.f32.mxu1 %vm2415_vm0, %v2414_v0 }
 0x414   : > { %1970 = vmatprep.subr.mxu1 %v2414_v0 }
 0x415   : > { %1971 = vmatpush3.msra.mxu1 %v2693_v3 }
 0x416   : > { %1972 = vmatprep.subr.mxu1 %v2414_v0 }
 0x417   : > { %1973 = vmatpush3.msra.mxu1 %v2698_v5 }
 0x418   : > { %1974 = vmatprep.subr.mxu1 %v2414_v0 }
 0x419   : > { %1975 = vmatpush3.msra.mxu1 %v2703_v6 }
 0x41a   : > { %1976 = vmatprep.subr.mxu1 %v2414_v0 }
 0x41b   : > { %1977 = vmatpush3.msra.mxu1 %v2707_v7 }
 0x41c   : > { %1978 = vmatprep.subr.mxu1 %v2414_v0 }
 0x41d   : > { %1979 = vmatpush3.msra.mxu1 %v2712_v8 }
 0x41e   : > { %1980 = vmatprep.subr.mxu1 %v2414_v0 }
 0x41f   : > { %1981 = vmatpush3.msra.mxu1 %v2716_v9 }
 0x420   : > { %1982 = vmatprep.subr.mxu1 %v2414_v0 }
 0x421   : > { %1983 = vmatpush3.msra.mxu1 %v2720_v10 }
 0x422   : > { %1984 = vmatprep.subr.mxu1 %v2414_v0 }
 0x423   : > { %1985 = vmatpush3.msra.mxu1 %v2724_v11 }
 0x424   : > { %1986 = vmatprep.subr.mxu1 %v2414_v0 }
 0x425   : > { %1987 = vmatpush3.msra.mxu1 %v2728_v12 }
 0x426   : > { %1988 = vmatprep.subr.mxu1 %v2414_v0 }
 0x427   : > { %1989 = vmatpush3.msra.mxu1 %v2732_v13 }
 0x428   : > { %1990 = vmatprep.subr.mxu1 %v2414_v0 }
 0x429   : > { %1991 = vmatpush3.msra.mxu1 %v2736_v14 }
 0x42a   : > { %1992 = vmatprep.subr.mxu1 %v2414_v0 }
 0x42b   : > { %1993 = vmatpush3.msra.mxu1 %v2740_v15 }
 0x42c   : > { %1994 = vmatprep.subr.mxu1 %v2414_v0 }
 0x42d   : > { %1995 = vmatpush3.msra.mxu1 %v2810_v28 }
 0x42e   : > { %1996 = vmatprep.subr.mxu1 %v2414_v0 }
 0x42f   : > { %1997 = vmatpush3.msra.mxu1 %v2812_v53 }
 0x430   : > { %1998 = vmatprep.subr.mxu1 %v2414_v0 }
 0x431   : > { %1999 = vmatpush3.msra.mxu1 %v2817_v54 }
 0x4d2   : > { %v1204_v59 = vpop.f32.mrf.mxu1 }
 0x4d3   : > { %v1205_v60 = vadd.f32 %v1613_v58, %v1204_v59 }
 0x4d4   : > { %v1932_v61 = vpop.f32.mrf.mxu1 }
 0x4d5   : > { %v1209_v62 = vmin.f32 %v1205_v60, 0.0  ;;  %vm1208_vm1 = vcmp.gt.f32.partialorder %v1205_v60, 0.0 }
 0x4d7   : > { %v1210_v63 = vmul.f32 1.442695, %v1209_v62 }
 0x4d9   : > { %2164 = vpow2.f32 %v1210_v63 }
 0x4e6   : > { %v2165_v44 = vpop.eup %2164 }
 0x4e7   : > { %v1614_v1 = vadd.f32 -1.0, %v2165_v44 }
 0x4e9   : > { %v1213_v4 = vsel %vm1208_vm1, %v1205_v60, %v1614_v1 }
 0x4ea   : > { %1966 = vmatmul.mubr.f32.vlgmr.msra.gmra.mxu0 %v1213_v4 }
 0x4eb   : > { %2004 = vmatpush3.msra.mxu0 %v2691_v2  ;;  %2035 = vmatprep.mubr.msk.f32.mxu0 %vm2415_vm0, %v2414_v0  ;;  %v1615_v2 = vld [vmem:[%s3000_s7 + $0x2] ss:$0 sm:$0xff] }
 0x4ec   : > { %2005 = vmatprep.subr.mxu0 %v2414_v0 }
 0x4ed   : > { %2006 = vmatpush3.msra.mxu0 %v2693_v3 }
 0x4ee   : > { %2007 = vmatprep.subr.mxu0 %v2414_v0 }
 0x4ef   : > { %2008 = vmatpush3.msra.mxu0 %v2698_v5 }
 0x4f0   : > { %2009 = vmatprep.subr.mxu0 %v2414_v0 }
 0x4f1   : > { %2010 = vmatpush3.msra.mxu0 %v2703_v6 }
 0x4f2   : > { %2011 = vmatprep.subr.mxu0 %v2414_v0 }
 0x4f3   : > { %2012 = vmatpush3.msra.mxu0 %v2707_v7 }
 0x4f4   : > { %2013 = vmatprep.subr.mxu0 %v2414_v0 }
 0x4f5   : > { %2014 = vmatpush3.msra.mxu0 %v2712_v8 }
 0x4f6   : > { %2015 = vmatprep.subr.mxu0 %v2414_v0 }
 0x4f7   : > { %2016 = vmatpush3.msra.mxu0 %v2716_v9 }
 0x4f8   : > { %2017 = vmatprep.subr.mxu0 %v2414_v0 }
 0x4f9   : > { %2018 = vmatpush3.msra.mxu0 %v2720_v10 }
 0x4fa   : > { %2019 = vmatprep.subr.mxu0 %v2414_v0 }
 0x4fb   : > { %2020 = vmatpush3.msra.mxu0 %v2724_v11 }
 0x4fc   : > { %2021 = vmatprep.subr.mxu0 %v2414_v0 }
 0x4fd   : > { %2022 = vmatpush3.msra.mxu0 %v2728_v12 }
 0x4fe   : > { %2023 = vmatprep.subr.mxu0 %v2414_v0 }
 0x4ff   : > { %2024 = vmatpush3.msra.mxu0 %v2732_v13 }
 0x500   : > { %2025 = vmatprep.subr.mxu0 %v2414_v0 }
 0x501   : > { %2026 = vmatpush3.msra.mxu0 %v2736_v14 }
 0x502   : > { %2027 = vmatprep.subr.mxu0 %v2414_v0 }
 0x503   : > { %2028 = vmatpush3.msra.mxu0 %v2740_v15  ;;  %v1616_v15 = vld [vmem:[%s3000_s7 + $0x5] ss:$0 sm:$0xff] }
 0x504   : > { %2029 = vmatprep.subr.mxu0 %v2414_v0 }
 0x505   : > { %2030 = vmatpush3.msra.mxu0 %v2810_v28 }
 0x506   : > { %2031 = vmatprep.subr.mxu0 %v2414_v0 }
 0x507   : > { %2032 = vmatpush3.msra.mxu0 %v2812_v53  ;;  %v1617_v53 = vld [vmem:[%s3000_s7 + $0x6] ss:$0 sm:$0xff] }
 0x508   : > { %2033 = vmatprep.subr.mxu0 %v2414_v0 }
 0x509   : > { %2034 = vmatpush3.msra.mxu0 %v2817_v54 }
 0x5aa   : > { %v1300_v3 = vpop.f32.mrf.mxu0 }
 0x5ab   : > { %v1301_v5 = vadd.f32 %v1615_v2, %v1300_v3 }
 0x5ac   : > { %v1967_v6 = vpop.f32.mrf.mxu0 }
 0x5ad   : > { %v1304_v7 = vadd.f32 %v1301_v5, %v2862_v45 }
 0x5af   : > { %2001 = vmatmul.mubr.f32.vlgmr.msra.gmra.mxu1 %v1304_v7 }
 0x66f   : > { %v1371_v8 = vpop.f32.mrf.mxu1 }
 0x670   : > { %v1375_v9 = vsub.f32 %v1304_v7, %v1371_v8 }
 0x671   : > { %v2002_v10 = vpop.f32.mrf.mxu1 }
 0x672   : > { %v1376_v11 = vmul.f32 %v1375_v9, %v1375_v9 }
 0x674   : > { %2036 = vmatmul.mubr.f32.vlgmr.msra.gmra.mxu0 %v1376_v11 }
 0x734   : > { %v1443_v0 = vpop.f32.mrf.mxu0 }
 0x735   : > { %v1444_v12 = vadd.f32 1e-05, %v1443_v0 }
 0x736   : > { %v2037_v13 = vpop.f32.mrf.mxu0 }
 0x737   : > { %2166 = vrsqrt.f32 %v1444_v12 }
 0x744   : > { %v2167_v14 = vpop.eup %2166 }
 0x745   : > { %v1448_v28 = vmul.f32 %v2167_v14, %v1375_v9 }
 0x747   : > { %v1453_v54 = vmul.f32 %v1616_v15, %v1448_v28 }
 0x749   : > { %v1458_v16 = vadd.f32 %v1617_v53, %v1453_v54 }
 0x74b   : > { %1459 = vst [vmem:[%s393_s14] sm:$0xff] %v1458_v16 }
 0x74c   : > { %2339 = shalt.err (!%p2336_p1)
}
 0x74d   : > { %s2340_s19 = scalar_lea.hbm %s1472_s17, 128  ;;  %s2344_s4 = scalar_lea.hbm %s3001_s8, 256 }
 0x74e   : > { %p2341_p3 = scmp.ne.s32.totalorder %s1472_s17, %s2340_s19  ;;  %p2345_p6 = scmp.lt.s32.totalorder %s1472_s17, %s3001_s8 }
 0x74f   : > { %p2346_p2 = scmp.lt.s32.totalorder %s2344_s4, %s2340_s19 }
 0x750   : > { %p2342_p4 = pnand %p2341_p3, %p3027_p11 }
 0x751   : > { %p2347_p7 = por %p2346_p2, %p2345_p6 }
 0x752   : > { %p2343_p12 = pneg %p2342_p4 }
 0x754   : > { %p2348_p8 = pnand %p2347_p7, %p2343_p12 }
 0x756   : > { %2351 = shalt.err (!%p2348_p8)
}
 0x757   : > { %2060 = dma.vmem_to_hbm [thread:$0]  (%p3027_p11), %s1475_s13, 128, %s1472_s17, %s1461_s24  }
 0x758 PF: > { %s1486_s9 = sand.u32 1, %s2390_s27   ;;  %p3028_p0 = scmp.ne.s32.totalorder %s3017_s21, 0 }
 0x759   : > { %p3029_p13 = scmp.ge.s32.totalorder %s2402_s30, 2  ;;  %s1487_s14 = scalar_lea.sflag [#allocation4], %s1486_s9 }
 0x75b   : > { %p2083_p5 = pnand %p3029_p13, %p3028_p0 }
 0x75d   : > { %p2084_p9 = pneg %p2083_p5 }
 0x75f   : > { %2385 = dma.done.wait (%p2084_p9), %s1487_s14, 128  }
 0x760   : > { %2387 = vsyncadd (%p2084_p9), %s1487_s14, 4294967168  ;;  %p24_p10 = scmp.ge.s32.totalorder %s2567_s18, 4   ;;  %s3030_s27 = smov %s2394_s28 }
 0x761   : > { %s3031_s28 = smov %s2398_s29  ;;  %s3032_s29 = smov %s2579_s15 }
 0x762   : > { %s3033_s30 = smov %s2567_s18  ;;  %26 = sbr.rel (!%p24_p10) target bundleno = 12 (0xc), region = 117 }
 0x767   :  { %1492 = vsyncpa [#allocation3], 1 }
 0x768   :  { %1494 = vsyncpa [#allocation3 + $0x1], 1 }
 0x769   :  { %1495 = vsyncpa [#allocation6], 1 }
 0x76a   :  { %1496 = vsyncpa [#allocation9], 1 }
 0x76b   :  { %1497 = vsyncpa [#allocation12], 1 }
 0x76c   :  { %1498 = vsyncpa [#allocation4], 1 }
 0x76d   :  { %1500 = vsyncpa [#allocation4 + $0x1], 1 }

</bundles_post_ra>
